<compile_context>
chip_gen: v7x
topology: tpu7x:2x2x1
jax: 0.10.0
libtpu: 0.0.40
codegen_flags: <defaults>
</compile_context>

<pallas_src>
import jax
import jax.numpy as jnp
from jax import lax
from jax.experimental import pallas as pl
from jax.experimental.pallas import tpu as pltpu


def _double_conv_kernel(x_hbm, w1_ref, s1_ref, b1_ref, w2_ref, s2_ref, b2_ref,
                        out_ref, x0_ref, m0_ref, sem):
    # x_hbm : (N, H+4, W+4, C1)   zero-padded input, left in HBM (pl.ANY)
    # w1_ref: (3, 3*C1, C2)       stage-1 weights, dx taps folded into K
    # s1/b1 : (1, C2)             folded BN1 scale / bias (f32)
    # w2_ref: (3, 3*C2, Cout)     stage-2 weights, dx taps folded into K
    # s2/b2 : (1, Cout)           folded BN2 scale / bias (f32)
    # out_ref:(1, TH*W, Cout)     output row tile, flattened rows (f32)
    # x0_ref: (2, TH+4, W+4, C1)  scratch: double-buffered input tile (+2-row halo)
    # m0_ref: (TH+2, W+2, C2)     scratch: stage-1 activations (+1-px halo ring)
    # sem   : DMA semaphores, one per x0 slot
    TH = x0_ref.shape[1] - 4
    W = x0_ref.shape[2] - 4
    C1 = x0_ref.shape[-1]
    C2 = m0_ref.shape[-1]
    Cout = out_ref.shape[-1]

    n = pl.program_id(0)
    t = pl.program_id(1)
    num_t = pl.num_programs(1)
    slot = t % 2

    def start_fetch(row_tile, dst_slot):
        row0 = row_tile * TH
        if TH % 8 == 0:
            row0 = pl.multiple_of(row0, 8)
        pltpu.make_async_copy(x_hbm.at[n, pl.ds(row0, TH + 4)],
                              x0_ref.at[dst_slot], sem.at[dst_slot]).start()

    # Prime the pipeline on the first row tile of every image (keeps the DMA/slot
    # bookkeeping self-contained per image, hence safe under a megacore batch split).
    @pl.when(t == 0)
    def _():
        start_fetch(t, slot)

    # Wait for the current tile (started above, or prefetched by the previous step).
    pltpu.make_async_copy(x_hbm.at[n, pl.ds(0, TH + 4)],
                          x0_ref.at[slot], sem.at[slot]).wait()

    # Prefetch the next row tile of this image while we compute on the current one.
    @pl.when(t + 1 < num_t)
    def _():
        start_fetch(t + 1, 1 - slot)

    # ----- stage 1: 3x3 conv -> BN -> ReLU on the tile + 1-pixel halo ring -----
    # dx taps folded into the contraction dim: 3 matmuls with K = 3*C1, accumulated
    # in registers (single VMEM store per stage, no accumulator read-modify-write).
    acc1 = None
    for dy in range(3):
        patch = jnp.concatenate(
            [x0_ref[slot, pl.ds(dy, TH + 2), pl.ds(dx, W + 2), :] for dx in range(3)],
            axis=-1).reshape((TH + 2) * (W + 2), 3 * C1)
        d = jnp.dot(patch, w1_ref[dy], preferred_element_type=jnp.float32)
        acc1 = d if acc1 is None else acc1 + d

    m = jnp.maximum(acc1 * s1_ref[...] + b1_ref[...], 0.0)
    m0_ref[...] = m.reshape(TH + 2, W + 2, C2).astype(m0_ref.dtype)

    # Halo-ring positions outside the image are the zero padding of the SECOND conv:
    # the two edge columns are always outside the image; top/bottom rows only on the
    # first/last row tile (guarded with pl.when instead of a full-tile mask).
    zero_col = jnp.zeros((TH + 2, 1, C2), m0_ref.dtype)
    m0_ref[:, pl.ds(0, 1), :] = zero_col
    m0_ref[:, pl.ds(W + 1, 1), :] = zero_col

    @pl.when(t == 0)
    def _():
        m0_ref[pl.ds(0, 1), :, :] = jnp.zeros((1, W + 2, C2), m0_ref.dtype)

    @pl.when(t == num_t - 1)
    def _():
        m0_ref[pl.ds(TH + 1, 1), :, :] = jnp.zeros((1, W + 2, C2), m0_ref.dtype)

    # ----- stage 2: 3x3 conv -> BN -> ReLU, written straight to the output tile -----
    acc2 = None
    for dy in range(3):
        patch = jnp.concatenate(
            [m0_ref[pl.ds(dy, TH), pl.ds(dx, W), :] for dx in range(3)],
            axis=-1).reshape(TH * W, 3 * C2)
        d = jnp.dot(patch, w2_ref[dy], preferred_element_type=jnp.float32)
        acc2 = d if acc2 is None else acc2 + d

    y = jnp.maximum(acc2 * s2_ref[...] + b2_ref[...], 0.0)
    out_ref[...] = y.reshape(1, TH * W, Cout).astype(out_ref.dtype)


def _round_up(v, m):
    return (v + m - 1) // m * m


def _pick_row_tile(h):
    """Largest row tile in {32, 16, 8} dividing H (prefer >=2 tiles so the async
    prefetch has something to hide); fall back to the whole image."""
    for th in (32, 16, 8):
        if h % th == 0 and h // th >= 2:
            return th
    for th in (32, 16, 8):
        if h % th == 0:
            return th
    # TODO(synk): ragged H (not a multiple of 8) falls back to a single whole-image
    # tile; large non-multiple-of-8 H should instead get a masked last tile.
    return h


def double_conv_nhwc(x_nhwc, params, *, compute_dtype=jnp.bfloat16):
    """Fused DoubleConv on an NHWC input (preferred entry point: no layout change)."""
    N, H, W, Cin = x_nhwc.shape
    w1, w2 = params["w1"], params["w2"]          # HWIO
    Cmid, Cout = w1.shape[-1], w2.shape[-1]

    # Lane-dense channels on the contraction side (input / mid activation).
    # TODO(synk): for stem layers with tiny Cin (3/4) skip the HBM channel pad and
    # zero-fill inside VMEM instead (the pad inflates HBM + per-tile DMA bytes).
    C1 = _round_up(Cin, 128)
    C2 = _round_up(Cmid, 128)

    TH = _pick_row_tile(H)
    assert H % TH == 0, "row tile must divide H"
    T = H // TH

    cdt = jnp.dtype(compute_dtype)
    itm = cdt.itemsize

    # One combined pad (2-px spatial halo for BOTH convs + channel pad), done once in
    # the compute dtype (bf16 by default -> half the extra HBM traffic of an f32 pad).
    # TODO(synk): fuse the spatial pad into the kernel DMA (memset halo rows in VMEM).
    xp = jnp.pad(x_nhwc.astype(cdt), ((0, 0), (2, 2), (2, 2), (0, C1 - Cin)))

    # Weights: channel-pad, then fold the 3 dx taps into the contraction dim.
    # Cout is deliberately NOT padded: the kernel writes the true output channels.
    w1c = jnp.pad(w1.astype(cdt),
                  ((0, 0), (0, 0), (0, C1 - Cin), (0, C2 - Cmid))).reshape(3, 3 * C1, C2)
    w2c = jnp.pad(w2.astype(cdt),
                  ((0, 0), (0, 0), (0, C2 - Cmid), (0, 0))).reshape(3, 3 * C2, Cout)
    s1 = jnp.pad(params["scale1"].astype(jnp.float32), (0, C2 - Cmid)).reshape(1, C2)
    b1 = jnp.pad(params["bias1"].astype(jnp.float32), (0, C2 - Cmid)).reshape(1, C2)
    s2 = params["scale2"].astype(jnp.float32).reshape(1, Cout)
    b2 = params["bias2"].astype(jnp.float32).reshape(1, Cout)

    # VMEM budget: double-buffered input tile + mid scratch + (pipeline-double-buffered)
    # resident weights + output block, plus headroom for matmul patches / spills.
    vmem_bytes = (
        2 * (TH + 4) * (W + 4) * C1 * itm          # x0 double buffer
        + (TH + 2) * (W + 2) * C2 * itm            # m0
        + 2 * 3 * (3 * C1) * C2 * itm              # w1 (auto double-buffered)
        + 2 * 3 * (3 * C2) * Cout * itm            # w2
        + 2 * TH * W * Cout * 4                    # out block
        + 4 * (C2 + Cout) * 4                      # scale / bias
    )
    patch_bytes = (TH + 2) * (W + 2) * (3 * C1 * itm + C2 * 4)   # patch + f32 acc
    internal_scratch = int(min(max(2 * patch_bytes, 1 << 20), 16 << 20))
    vmem_limit = int(min(vmem_bytes + internal_scratch + 2 * patch_bytes + (4 << 20),
                         100 << 20))

    flops = int(2 * 9 * N * H * W * (C1 * C2 + C2 * Cout))
    bytes_accessed = int(xp.size * itm + w1c.size * itm + w2c.size * itm
                         + N * H * W * Cout * 4)

    out = pl.pallas_call(
        _double_conv_kernel,
        out_shape=jax.ShapeDtypeStruct((N, H * W, Cout), jnp.float32),
        grid=(N, T),
        in_specs=[
            pl.BlockSpec(memory_space=pl.ANY),                        # x stays in HBM
            # TODO(synk): pipeline_mode=pl.Buffered(1) on these constant-index blocks
            # would halve their VMEM footprint (matters on v7x's 64 MiB VMEM).
            pl.BlockSpec((3, 3 * C1, C2), lambda n, t: (0, 0, 0)),    # w1 (resident)
            pl.BlockSpec((1, C2), lambda n, t: (0, 0)),               # scale1
            pl.BlockSpec((1, C2), lambda n, t: (0, 0)),               # bias1
            pl.BlockSpec((3, 3 * C2, Cout), lambda n, t: (0, 0, 0)),  # w2 (resident)
            pl.BlockSpec((1, Cout), lambda n, t: (0, 0)),             # scale2
            pl.BlockSpec((1, Cout), lambda n, t: (0, 0)),             # bias2
        ],
        out_specs=pl.BlockSpec((1, TH * W, Cout), lambda n, t: (n, t, 0)),
        scratch_shapes=[
            pltpu.VMEM((2, TH + 4, W + 4, C1), cdt),     # input tile double buffer
            pltpu.VMEM((TH + 2, W + 2, C2), cdt),        # stage-1 activations (+halo)
            pltpu.SemaphoreType.DMA((2,)),               # one DMA sem per slot
        ],
        compiler_params=pltpu.CompilerParams(
            # Row-tile axis carries the manual prefetch pipeline -> "arbitrary";
            # batch axis is independent -> "parallel" (megacore on v7x).
            dimension_semantics=("parallel", "arbitrary"),
            vmem_limit_bytes=vmem_limit,
            internal_scratch_in_bytes=internal_scratch),
        cost_estimate=pl.CostEstimate(
            flops=flops, transcendentals=0, bytes_accessed=bytes_accessed),
    )(xp, w1c, s1, b1, w2c, s2, b2)

    return out.reshape(N, H, W, Cout)


def double_conv(x_nchw, params, *, compute_dtype=jnp.bfloat16):
    """PyTorch-compatible entry point (NCHW in / NCHW out).

    Prefer double_conv_nhwc when the surrounding model already keeps NHWC: the two
    transposes below are full HBM round-trips of the tensor.
    """
    x_nhwc = jnp.transpose(x_nchw, (0, 2, 3, 1))
    y = double_conv_nhwc(x_nhwc, params, compute_dtype=compute_dtype)
    return jnp.transpose(y, (0, 3, 1, 2))


def init_double_conv_params(key, in_channels, out_channels, mid_channels=None):
    """Deterministic parameter init mirroring DoubleConv.__init__ shapes."""
    if mid_channels is None:
        mid_channels = out_channels
    k1, k2, k3, k4 = jax.random.split(key, 4)
    eps = 1e-5

    def bn_fold(kg, c):
        gamma = 1.0 + 0.1 * jax.random.normal(kg, (c,), jnp.float32)
        beta = 0.05 * jnp.arange(c, dtype=jnp.float32)
        running_mean = 0.01 * jnp.arange(c, dtype=jnp.float32)
        running_var = jnp.ones((c,), jnp.float32) + 0.02 * jnp.arange(c, dtype=jnp.float32)
        scale = gamma * lax.rsqrt(running_var + eps)
        bias = beta - running_mean * scale
        return scale, bias

    # Conv weights in HWIO layout (PyTorch OIHW -> HWIO is a transpose).
    w1 = 0.1 * jax.random.normal(k1, (3, 3, in_channels, mid_channels), jnp.float32)
    w2 = 0.1 * jax.random.normal(k2, (3, 3, mid_channels, out_channels), jnp.float32)
    s1, b1 = bn_fold(k3, mid_channels)
    s2, b2 = bn_fold(k4, out_channels)
    return dict(w1=w1, scale1=s1, bias1=b1, w2=w2, scale2=s2, bias2=b2)


def _reference_double_conv(x_nchw, params):
    """Pure-JAX reference (XLA conv) for correctness checking."""
    def stage(x, w_hwio, scale, bias):
        w_oihw = jnp.transpose(w_hwio, (3, 2, 0, 1))
        y = lax.conv_general_dilated(
            x, w_oihw, window_strides=(1, 1), padding=((1, 1), (1, 1)),
            dimension_numbers=("NCHW", "OIHW", "NCHW"),
        )
        y = y * scale[None, :, None, None] + bias[None, :, None, None]
        return jnp.maximum(y, 0.0)

    h = stage(x_nchw, params["w1"], params["scale1"], params["bias1"])
    return stage(h, params["w2"], params["scale2"], params["bias2"])


if __name__ == "__main__":
    key = jax.random.PRNGKey(0)
    kx, kp = jax.random.split(key)

    N, C_in, H, W = 2, 4, 16, 16
    C_mid, C_out = 8, 8

    x = jax.random.normal(kx, (N, C_in, H, W), jnp.float32)
    params = init_double_conv_params(kp, C_in, C_out, C_mid)
    ref = _reference_double_conv(x, params)

    # f32 compute path: tight check of indexing / halo handling / BN folding.
    out_f32 = jax.block_until_ready(double_conv(x, params, compute_dtype=jnp.float32))
    assert out_f32.shape == (N, C_out, H, W)
    assert jnp.allclose(out_f32, ref, rtol=1e-4, atol=1e-4), "f32 mismatch vs reference"

    # bf16 compute path (default / fast MXU path): looser tolerance for bf16 rounding.
    out_bf16 = jax.block_until_ready(double_conv(x, params))
    assert out_bf16.shape == (N, C_out, H, W)
    assert jnp.allclose(out_bf16, ref, rtol=5e-2, atol=5e-2), "bf16 mismatch vs reference"

    print("KERNEL_OK")
</pallas_src>

<mosaic_0001>
module attributes {stable_mosaic.version = 11 : i64} {
  func.func @_double_conv_kernel(%arg0: i32, %arg1: i32, %arg2: memref<2x20x20x128xf32, #tpu.memory_space<any>>, %arg3: memref<3x384x128xf32, #tpu.memory_space<vmem>>, %arg4: memref<1x128xf32, #tpu.memory_space<vmem>>, %arg5: memref<1x128xf32, #tpu.memory_space<vmem>>, %arg6: memref<3x384x8xf32, #tpu.memory_space<vmem>>, %arg7: memref<1x8xf32, #tpu.memory_space<vmem>>, %arg8: memref<1x8xf32, #tpu.memory_space<vmem>>, %arg9: memref<1x128x8xf32, #tpu.memory_space<vmem>>, %arg10: memref<2x12x20x128xf32, #tpu.memory_space<vmem>>, %arg11: memref<10x18x128xf32, #tpu.memory_space<vmem>>, %arg12: memref<2x!tpu.dma_semaphore, #tpu.memory_space<semaphore_mem>>) attributes {dimension_semantics = [#tpu.dimension_semantics<parallel>, #tpu.dimension_semantics<arbitrary>], iteration_bounds = array<i64: 2, 2>, scalar_prefetch = 0 : i64, scratch_operands = 3 : i64, tpu.core_type = #tpu.core_type<tc>, window_params = [{}, {pipeline_mode = #tpu.pipeline_mode<synchronous>, transform_indices = @transform_1, window_bounds = array<i64: 3, 384, 128>}, {pipeline_mode = #tpu.pipeline_mode<synchronous>, transform_indices = @transform_2, window_bounds = array<i64: 1, 128>}, {pipeline_mode = #tpu.pipeline_mode<synchronous>, transform_indices = @transform_3, window_bounds = array<i64: 1, 128>}, {pipeline_mode = #tpu.pipeline_mode<synchronous>, transform_indices = @transform_4, window_bounds = array<i64: 3, 384, 8>}, {pipeline_mode = #tpu.pipeline_mode<synchronous>, transform_indices = @transform_5, window_bounds = array<i64: 1, 8>}, {pipeline_mode = #tpu.pipeline_mode<synchronous>, transform_indices = @transform_6, window_bounds = array<i64: 1, 8>}, {transform_indices = @transform_7, window_bounds = array<i64: 1, 128, 8>}]} {
    %c2_i32 = arith.constant 2 : i32
    %c0_i32 = arith.constant 0 : i32
    %0 = arith.cmpi eq, %c2_i32, %c0_i32 : i32
    %c1_i32 = arith.constant 1 : i32
    %1 = arith.select %0, %c1_i32, %c2_i32 : i32
    %2 = arith.remsi %arg1, %1 : i32
    %c0_i32_0 = arith.constant 0 : i32
    %3 = arith.cmpi ne, %2, %c0_i32_0 : i32
    %c0_i32_1 = arith.constant 0 : i32
    %4 = arith.cmpi slt, %2, %c0_i32_1 : i32
    %c0_i32_2 = arith.constant 0 : i32
    %5 = arith.cmpi slt, %1, %c0_i32_2 : i32
    %6 = arith.xori %4, %5 : i1
    %7 = arith.andi %6, %3 : i1
    %8 = arith.addi %2, %1 : i32
    %9 = arith.select %7, %8, %2 : i32
    %c0_i32_3 = arith.constant 0 : i32
    %10 = arith.cmpi eq, %arg1, %c0_i32_3 : i32
    %11 = arith.extui %10 : i1 to i32
    %c0_i32_4 = arith.constant 0 : i32
    %12 = arith.cmpi ne, %11, %c0_i32_4 : i32
    scf.if %12 {
      %c8_i32 = arith.constant 8 : i32
      %122 = arith.muli %arg1, %c8_i32 : i32
      %123 = tpu.assume_multiple %122, 8 : i32
      %c0_i32_114 = arith.constant 0 : i32
      %c0_i32_115 = arith.constant 0 : i32
      %124 = tpu.memref_slice %arg2[%arg0, %123, %c0_i32_114, %c0_i32_115] : memref<2x20x20x128xf32, #tpu.memory_space<any>> -> memref<1x12x20x128xf32, #tpu.memory_space<any>>
      %125 = tpu.memref_squeeze %124 : memref<1x12x20x128xf32, #tpu.memory_space<any>> -> memref<12x20x128xf32, #tpu.memory_space<any>>
      %c0_i32_116 = arith.constant 0 : i32
      %c0_i32_117 = arith.constant 0 : i32
      %c0_i32_118 = arith.constant 0 : i32
      %126 = tpu.memref_slice %arg10[%9, %c0_i32_116, %c0_i32_117, %c0_i32_118] : memref<2x12x20x128xf32, #tpu.memory_space<vmem>> -> memref<1x12x20x128xf32, #tpu.memory_space<vmem>>
      %127 = tpu.memref_squeeze %126 : memref<1x12x20x128xf32, #tpu.memory_space<vmem>> -> memref<12x20x128xf32, #tpu.memory_space<vmem>>
      %128 = tpu.memref_slice %arg12[%9] : memref<2x!tpu.dma_semaphore, #tpu.memory_space<semaphore_mem>> -> memref<1x!tpu.dma_semaphore, #tpu.memory_space<semaphore_mem>>
      %129 = tpu.memref_squeeze %128 : memref<1x!tpu.dma_semaphore, #tpu.memory_space<semaphore_mem>> -> memref<!tpu.dma_semaphore, #tpu.memory_space<semaphore_mem>>
      tpu.enqueue_dma source(%125 : memref<12x20x128xf32, #tpu.memory_space<any>>) target(%127 : memref<12x20x128xf32, #tpu.memory_space<vmem>>) target_semaphore(%129 : memref<!tpu.dma_semaphore, #tpu.memory_space<semaphore_mem>>)
    } else {
    }
    %c0_i32_5 = arith.constant 0 : i32
    %c0_i32_6 = arith.constant 0 : i32
    %c0_i32_7 = arith.constant 0 : i32
    %13 = tpu.memref_slice %arg2[%arg0, %c0_i32_5, %c0_i32_6, %c0_i32_7] : memref<2x20x20x128xf32, #tpu.memory_space<any>> -> memref<1x12x20x128xf32, #tpu.memory_space<any>>
    %14 = tpu.memref_squeeze %13 : memref<1x12x20x128xf32, #tpu.memory_space<any>> -> memref<12x20x128xf32, #tpu.memory_space<any>>
    %c0_i32_8 = arith.constant 0 : i32
    %c0_i32_9 = arith.constant 0 : i32
    %c0_i32_10 = arith.constant 0 : i32
    %15 = tpu.memref_slice %arg10[%9, %c0_i32_8, %c0_i32_9, %c0_i32_10] : memref<2x12x20x128xf32, #tpu.memory_space<vmem>> -> memref<1x12x20x128xf32, #tpu.memory_space<vmem>>
    %16 = tpu.memref_squeeze %15 : memref<1x12x20x128xf32, #tpu.memory_space<vmem>> -> memref<12x20x128xf32, #tpu.memory_space<vmem>>
    %17 = tpu.memref_slice %arg12[%9] : memref<2x!tpu.dma_semaphore, #tpu.memory_space<semaphore_mem>> -> memref<1x!tpu.dma_semaphore, #tpu.memory_space<semaphore_mem>>
    %18 = tpu.memref_squeeze %17 : memref<1x!tpu.dma_semaphore, #tpu.memory_space<semaphore_mem>> -> memref<!tpu.dma_semaphore, #tpu.memory_space<semaphore_mem>>
    tpu.wait_dma2 semaphore(%18 : memref<!tpu.dma_semaphore, #tpu.memory_space<semaphore_mem>>) src(%14 : memref<12x20x128xf32, #tpu.memory_space<any>>) dst(%16 : memref<12x20x128xf32, #tpu.memory_space<vmem>>)
    %c1_i32_11 = arith.constant 1 : i32
    %19 = arith.addi %arg1, %c1_i32_11 : i32
    %c2_i32_12 = arith.constant 2 : i32
    %20 = arith.cmpi slt, %19, %c2_i32_12 : i32
    %21 = arith.extui %20 : i1 to i32
    %c0_i32_13 = arith.constant 0 : i32
    %22 = arith.cmpi ne, %21, %c0_i32_13 : i32
    scf.if %22 {
      %c1_i32_114 = arith.constant 1 : i32
      %122 = arith.addi %arg1, %c1_i32_114 : i32
      %c1_i32_115 = arith.constant 1 : i32
      %123 = arith.subi %c1_i32_115, %9 : i32
      %c8_i32 = arith.constant 8 : i32
      %124 = arith.muli %122, %c8_i32 : i32
      %125 = tpu.assume_multiple %124, 8 : i32
      %c0_i32_116 = arith.constant 0 : i32
      %c0_i32_117 = arith.constant 0 : i32
      %126 = tpu.memref_slice %arg2[%arg0, %125, %c0_i32_116, %c0_i32_117] : memref<2x20x20x128xf32, #tpu.memory_space<any>> -> memref<1x12x20x128xf32, #tpu.memory_space<any>>
      %127 = tpu.memref_squeeze %126 : memref<1x12x20x128xf32, #tpu.memory_space<any>> -> memref<12x20x128xf32, #tpu.memory_space<any>>
      %c0_i32_118 = arith.constant 0 : i32
      %c0_i32_119 = arith.constant 0 : i32
      %c0_i32_120 = arith.constant 0 : i32
      %128 = tpu.memref_slice %arg10[%123, %c0_i32_118, %c0_i32_119, %c0_i32_120] : memref<2x12x20x128xf32, #tpu.memory_space<vmem>> -> memref<1x12x20x128xf32, #tpu.memory_space<vmem>>
      %129 = tpu.memref_squeeze %128 : memref<1x12x20x128xf32, #tpu.memory_space<vmem>> -> memref<12x20x128xf32, #tpu.memory_space<vmem>>
      %130 = tpu.memref_slice %arg12[%123] : memref<2x!tpu.dma_semaphore, #tpu.memory_space<semaphore_mem>> -> memref<1x!tpu.dma_semaphore, #tpu.memory_space<semaphore_mem>>
      %131 = tpu.memref_squeeze %130 : memref<1x!tpu.dma_semaphore, #tpu.memory_space<semaphore_mem>> -> memref<!tpu.dma_semaphore, #tpu.memory_space<semaphore_mem>>
      tpu.enqueue_dma source(%127 : memref<12x20x128xf32, #tpu.memory_space<any>>) target(%129 : memref<12x20x128xf32, #tpu.memory_space<vmem>>) target_semaphore(%131 : memref<!tpu.dma_semaphore, #tpu.memory_space<semaphore_mem>>)
    } else {
    }
    %23 = arith.index_cast %9 : i32 to index
    %c0 = arith.constant 0 : index
    %c0_14 = arith.constant 0 : index
    %c0_15 = arith.constant 0 : index
    %24 = vector.load %arg10[%23, %c0, %c0_14, %c0_15] : memref<2x12x20x128xf32, #tpu.memory_space<vmem>>, vector<1x10x18x128xf32>
    %25 = vector.shape_cast %24 : vector<1x10x18x128xf32> to vector<10x18x128xf32>
    %26 = arith.index_cast %9 : i32 to index
    %c0_16 = arith.constant 0 : index
    %c1 = arith.constant 1 : index
    %c0_17 = arith.constant 0 : index
    %27 = vector.load %arg10[%26, %c0_16, %c1, %c0_17] : memref<2x12x20x128xf32, #tpu.memory_space<vmem>>, vector<1x10x18x128xf32>
    %28 = vector.shape_cast %27 : vector<1x10x18x128xf32> to vector<10x18x128xf32>
    %29 = arith.index_cast %9 : i32 to index
    %c0_18 = arith.constant 0 : index
    %c2 = arith.constant 2 : index
    %c0_19 = arith.constant 0 : index
    %30 = vector.load %arg10[%29, %c0_18, %c2, %c0_19] : memref<2x12x20x128xf32, #tpu.memory_space<vmem>>, vector<1x10x18x128xf32>
    %31 = vector.shape_cast %30 : vector<1x10x18x128xf32> to vector<10x18x128xf32>
    %32 = tpu.concatenate %25, %28, %31 in 2 : vector<10x18x128xf32>, vector<10x18x128xf32>, vector<10x18x128xf32> -> vector<10x18x384xf32>
    %33 = vector.shape_cast %32 : vector<10x18x384xf32> to vector<180x384xf32>
    %c0_20 = arith.constant 0 : index
    %c0_21 = arith.constant 0 : index
    %c0_22 = arith.constant 0 : index
    %34 = vector.load %arg3[%c0_20, %c0_21, %c0_22] : memref<3x384x128xf32, #tpu.memory_space<vmem>>, vector<1x384x128xf32>
    %35 = vector.shape_cast %34 : vector<1x384x128xf32> to vector<384x128xf32>
    %cst = arith.constant dense<0.000000e+00> : vector<180x128xf32>
    %36 = tpu.matmul %33, %35, %cst {dimension_numbers = #tpu.dot_dimension_numbers<[1], [0], [0], [1], [0, 0, 1, 1], [], []>} : vector<180x384xf32>, vector<384x128xf32>, vector<180x128xf32> -> vector<180x128xf32>
    %37 = arith.index_cast %9 : i32 to index
    %c1_23 = arith.constant 1 : index
    %c0_24 = arith.constant 0 : index
    %c0_25 = arith.constant 0 : index
    %38 = vector.load %arg10[%37, %c1_23, %c0_24, %c0_25] : memref<2x12x20x128xf32, #tpu.memory_space<vmem>>, vector<1x10x18x128xf32>
    %39 = vector.shape_cast %38 : vector<1x10x18x128xf32> to vector<10x18x128xf32>
    %40 = arith.index_cast %9 : i32 to index
    %c1_26 = arith.constant 1 : index
    %c1_27 = arith.constant 1 : index
    %c0_28 = arith.constant 0 : index
    %41 = vector.load %arg10[%40, %c1_26, %c1_27, %c0_28] : memref<2x12x20x128xf32, #tpu.memory_space<vmem>>, vector<1x10x18x128xf32>
    %42 = vector.shape_cast %41 : vector<1x10x18x128xf32> to vector<10x18x128xf32>
    %43 = arith.index_cast %9 : i32 to index
    %c1_29 = arith.constant 1 : index
    %c2_30 = arith.constant 2 : index
    %c0_31 = arith.constant 0 : index
    %44 = vector.load %arg10[%43, %c1_29, %c2_30, %c0_31] : memref<2x12x20x128xf32, #tpu.memory_space<vmem>>, vector<1x10x18x128xf32>
    %45 = vector.shape_cast %44 : vector<1x10x18x128xf32> to vector<10x18x128xf32>
    %46 = tpu.concatenate %39, %42, %45 in 2 : vector<10x18x128xf32>, vector<10x18x128xf32>, vector<10x18x128xf32> -> vector<10x18x384xf32>
    %47 = vector.shape_cast %46 : vector<10x18x384xf32> to vector<180x384xf32>
    %c1_32 = arith.constant 1 : index
    %c0_33 = arith.constant 0 : index
    %c0_34 = arith.constant 0 : index
    %48 = vector.load %arg3[%c1_32, %c0_33, %c0_34] : memref<3x384x128xf32, #tpu.memory_space<vmem>>, vector<1x384x128xf32>
    %49 = vector.shape_cast %48 : vector<1x384x128xf32> to vector<384x128xf32>
    %cst_35 = arith.constant dense<0.000000e+00> : vector<180x128xf32>
    %50 = tpu.matmul %47, %49, %cst_35 {dimension_numbers = #tpu.dot_dimension_numbers<[1], [0], [0], [1], [0, 0, 1, 1], [], []>} : vector<180x384xf32>, vector<384x128xf32>, vector<180x128xf32> -> vector<180x128xf32>
    %51 = arith.addf %36, %50 : vector<180x128xf32>
    %52 = arith.index_cast %9 : i32 to index
    %c2_36 = arith.constant 2 : index
    %c0_37 = arith.constant 0 : index
    %c0_38 = arith.constant 0 : index
    %53 = vector.load %arg10[%52, %c2_36, %c0_37, %c0_38] : memref<2x12x20x128xf32, #tpu.memory_space<vmem>>, vector<1x10x18x128xf32>
    %54 = vector.shape_cast %53 : vector<1x10x18x128xf32> to vector<10x18x128xf32>
    %55 = arith.index_cast %9 : i32 to index
    %c2_39 = arith.constant 2 : index
    %c1_40 = arith.constant 1 : index
    %c0_41 = arith.constant 0 : index
    %56 = vector.load %arg10[%55, %c2_39, %c1_40, %c0_41] : memref<2x12x20x128xf32, #tpu.memory_space<vmem>>, vector<1x10x18x128xf32>
    %57 = vector.shape_cast %56 : vector<1x10x18x128xf32> to vector<10x18x128xf32>
    %58 = arith.index_cast %9 : i32 to index
    %c2_42 = arith.constant 2 : index
    %c2_43 = arith.constant 2 : index
    %c0_44 = arith.constant 0 : index
    %59 = vector.load %arg10[%58, %c2_42, %c2_43, %c0_44] : memref<2x12x20x128xf32, #tpu.memory_space<vmem>>, vector<1x10x18x128xf32>
    %60 = vector.shape_cast %59 : vector<1x10x18x128xf32> to vector<10x18x128xf32>
    %61 = tpu.concatenate %54, %57, %60 in 2 : vector<10x18x128xf32>, vector<10x18x128xf32>, vector<10x18x128xf32> -> vector<10x18x384xf32>
    %62 = vector.shape_cast %61 : vector<10x18x384xf32> to vector<180x384xf32>
    %c2_45 = arith.constant 2 : index
    %c0_46 = arith.constant 0 : index
    %c0_47 = arith.constant 0 : index
    %63 = vector.load %arg3[%c2_45, %c0_46, %c0_47] : memref<3x384x128xf32, #tpu.memory_space<vmem>>, vector<1x384x128xf32>
    %64 = vector.shape_cast %63 : vector<1x384x128xf32> to vector<384x128xf32>
    %cst_48 = arith.constant dense<0.000000e+00> : vector<180x128xf32>
    %65 = tpu.matmul %62, %64, %cst_48 {dimension_numbers = #tpu.dot_dimension_numbers<[1], [0], [0], [1], [0, 0, 1, 1], [], []>} : vector<180x384xf32>, vector<384x128xf32>, vector<180x128xf32> -> vector<180x128xf32>
    %66 = arith.addf %51, %65 : vector<180x128xf32>
    %c0_49 = arith.constant 0 : index
    %c0_50 = arith.constant 0 : index
    %67 = vector.load %arg4[%c0_49, %c0_50] : memref<1x128xf32, #tpu.memory_space<vmem>>, vector<1x128xf32>
    %68 = vector.broadcast %67 : vector<1x128xf32> to vector<180x128xf32>
    %69 = arith.mulf %66, %68 : vector<180x128xf32>
    %c0_51 = arith.constant 0 : index
    %c0_52 = arith.constant 0 : index
    %70 = vector.load %arg5[%c0_51, %c0_52] : memref<1x128xf32, #tpu.memory_space<vmem>>, vector<1x128xf32>
    %71 = vector.broadcast %70 : vector<1x128xf32> to vector<180x128xf32>
    %72 = arith.addf %69, %71 : vector<180x128xf32>
    %cst_53 = arith.constant 0.000000e+00 : f32
    %73 = vector.broadcast %cst_53 : f32 to vector<180x128xf32>
    %74 = arith.maximumf %72, %73 : vector<180x128xf32>
    %75 = vector.shape_cast %74 : vector<180x128xf32> to vector<10x18x128xf32>
    %c0_54 = arith.constant 0 : index
    %c0_55 = arith.constant 0 : index
    %c0_56 = arith.constant 0 : index
    %76 = vector.load %arg11[%c0_54, %c0_55, %c0_56] : memref<10x18x128xf32, #tpu.memory_space<vmem>>, vector<10x18x128xf32>
    tpu.vector_store %arg11[%c0_54, %c0_55, %c0_56], %75 {strides = array<i32>} : memref<10x18x128xf32, #tpu.memory_space<vmem>>, vector<10x18x128xf32>,
    %cst_57 = arith.constant 0.000000e+00 : f32
    %77 = vector.broadcast %cst_57 : f32 to vector<10x1x128xf32>
    %c0_58 = arith.constant 0 : index
    %c0_59 = arith.constant 0 : index
    %c0_60 = arith.constant 0 : index
    %78 = vector.load %arg11[%c0_58, %c0_59, %c0_60] : memref<10x18x128xf32, #tpu.memory_space<vmem>>, vector<10x1x128xf32>
    tpu.vector_store %arg11[%c0_58, %c0_59, %c0_60], %77 {strides = array<i32>} : memref<10x18x128xf32, #tpu.memory_space<vmem>>, vector<10x1x128xf32>,
    %c0_61 = arith.constant 0 : index
    %c17 = arith.constant 17 : index
    %c0_62 = arith.constant 0 : index
    %79 = vector.load %arg11[%c0_61, %c17, %c0_62] : memref<10x18x128xf32, #tpu.memory_space<vmem>>, vector<10x1x128xf32>
    tpu.vector_store %arg11[%c0_61, %c17, %c0_62], %77 {strides = array<i32>} : memref<10x18x128xf32, #tpu.memory_space<vmem>>, vector<10x1x128xf32>,
    %c0_i32_63 = arith.constant 0 : i32
    %80 = arith.cmpi eq, %arg1, %c0_i32_63 : i32
    %81 = arith.extui %80 : i1 to i32
    %c0_i32_64 = arith.constant 0 : i32
    %82 = arith.cmpi ne, %81, %c0_i32_64 : i32
    scf.if %82 {
      %cst_114 = arith.constant 0.000000e+00 : f32
      %122 = vector.broadcast %cst_114 : f32 to vector<1x18x128xf32>
      %c0_115 = arith.constant 0 : index
      %c0_116 = arith.constant 0 : index
      %c0_117 = arith.constant 0 : index
      %123 = vector.load %arg11[%c0_115, %c0_116, %c0_117] : memref<10x18x128xf32, #tpu.memory_space<vmem>>, vector<1x18x128xf32>
      tpu.vector_store %arg11[%c0_115, %c0_116, %c0_117], %122 {strides = array<i32>} : memref<10x18x128xf32, #tpu.memory_space<vmem>>, vector<1x18x128xf32>,
    } else {
    }
    %c1_i32_65 = arith.constant 1 : i32
    %83 = arith.cmpi eq, %arg1, %c1_i32_65 : i32
    %84 = arith.extui %83 : i1 to i32
    %c0_i32_66 = arith.constant 0 : i32
    %85 = arith.cmpi ne, %84, %c0_i32_66 : i32
    scf.if %85 {
      %cst_114 = arith.constant 0.000000e+00 : f32
      %122 = vector.broadcast %cst_114 : f32 to vector<1x18x128xf32>
      %c9 = arith.constant 9 : index
      %c0_115 = arith.constant 0 : index
      %c0_116 = arith.constant 0 : index
      %123 = vector.load %arg11[%c9, %c0_115, %c0_116] : memref<10x18x128xf32, #tpu.memory_space<vmem>>, vector<1x18x128xf32>
      tpu.vector_store %arg11[%c9, %c0_115, %c0_116], %122 {strides = array<i32>} : memref<10x18x128xf32, #tpu.memory_space<vmem>>, vector<1x18x128xf32>,
    } else {
    }
    %c0_67 = arith.constant 0 : index
    %c0_68 = arith.constant 0 : index
    %c0_69 = arith.constant 0 : index
    %86 = vector.load %arg11[%c0_67, %c0_68, %c0_69] : memref<10x18x128xf32, #tpu.memory_space<vmem>>, vector<8x16x128xf32>
    %c0_70 = arith.constant 0 : index
    %c1_71 = arith.constant 1 : index
    %c0_72 = arith.constant 0 : index
    %87 = vector.load %arg11[%c0_70, %c1_71, %c0_72] : memref<10x18x128xf32, #tpu.memory_space<vmem>>, vector<8x16x128xf32>
    %c0_73 = arith.constant 0 : index
    %c2_74 = arith.constant 2 : index
    %c0_75 = arith.constant 0 : index
    %88 = vector.load %arg11[%c0_73, %c2_74, %c0_75] : memref<10x18x128xf32, #tpu.memory_space<vmem>>, vector<8x16x128xf32>
    %89 = tpu.concatenate %86, %87, %88 in 2 : vector<8x16x128xf32>, vector<8x16x128xf32>, vector<8x16x128xf32> -> vector<8x16x384xf32>
    %90 = vector.shape_cast %89 : vector<8x16x384xf32> to vector<128x384xf32>
    %c0_76 = arith.constant 0 : index
    %c0_77 = arith.constant 0 : index
    %c0_78 = arith.constant 0 : index
    %91 = vector.load %arg6[%c0_76, %c0_77, %c0_78] : memref<3x384x8xf32, #tpu.memory_space<vmem>>, vector<1x384x8xf32>
    %92 = vector.shape_cast %91 : vector<1x384x8xf32> to vector<384x8xf32>
    %cst_79 = arith.constant dense<0.000000e+00> : vector<128x8xf32>
    %93 = tpu.matmul %90, %92, %cst_79 {dimension_numbers = #tpu.dot_dimension_numbers<[1], [0], [0], [1], [0, 0, 1, 1], [], []>} : vector<128x384xf32>, vector<384x8xf32>, vector<128x8xf32> -> vector<128x8xf32>
    %c1_80 = arith.constant 1 : index
    %c0_81 = arith.constant 0 : index
    %c0_82 = arith.constant 0 : index
    %94 = vector.load %arg11[%c1_80, %c0_81, %c0_82] : memref<10x18x128xf32, #tpu.memory_space<vmem>>, vector<8x16x128xf32>
    %c1_83 = arith.constant 1 : index
    %c1_84 = arith.constant 1 : index
    %c0_85 = arith.constant 0 : index
    %95 = vector.load %arg11[%c1_83, %c1_84, %c0_85] : memref<10x18x128xf32, #tpu.memory_space<vmem>>, vector<8x16x128xf32>
    %c1_86 = arith.constant 1 : index
    %c2_87 = arith.constant 2 : index
    %c0_88 = arith.constant 0 : index
    %96 = vector.load %arg11[%c1_86, %c2_87, %c0_88] : memref<10x18x128xf32, #tpu.memory_space<vmem>>, vector<8x16x128xf32>
    %97 = tpu.concatenate %94, %95, %96 in 2 : vector<8x16x128xf32>, vector<8x16x128xf32>, vector<8x16x128xf32> -> vector<8x16x384xf32>
    %98 = vector.shape_cast %97 : vector<8x16x384xf32> to vector<128x384xf32>
    %c1_89 = arith.constant 1 : index
    %c0_90 = arith.constant 0 : index
    %c0_91 = arith.constant 0 : index
    %99 = vector.load %arg6[%c1_89, %c0_90, %c0_91] : memref<3x384x8xf32, #tpu.memory_space<vmem>>, vector<1x384x8xf32>
    %100 = vector.shape_cast %99 : vector<1x384x8xf32> to vector<384x8xf32>
    %cst_92 = arith.constant dense<0.000000e+00> : vector<128x8xf32>
    %101 = tpu.matmul %98, %100, %cst_92 {dimension_numbers = #tpu.dot_dimension_numbers<[1], [0], [0], [1], [0, 0, 1, 1], [], []>} : vector<128x384xf32>, vector<384x8xf32>, vector<128x8xf32> -> vector<128x8xf32>
    %102 = arith.addf %93, %101 : vector<128x8xf32>
    %c2_93 = arith.constant 2 : index
    %c0_94 = arith.constant 0 : index
    %c0_95 = arith.constant 0 : index
    %103 = vector.load %arg11[%c2_93, %c0_94, %c0_95] : memref<10x18x128xf32, #tpu.memory_space<vmem>>, vector<8x16x128xf32>
    %c2_96 = arith.constant 2 : index
    %c1_97 = arith.constant 1 : index
    %c0_98 = arith.constant 0 : index
    %104 = vector.load %arg11[%c2_96, %c1_97, %c0_98] : memref<10x18x128xf32, #tpu.memory_space<vmem>>, vector<8x16x128xf32>
    %c2_99 = arith.constant 2 : index
    %c2_100 = arith.constant 2 : index
    %c0_101 = arith.constant 0 : index
    %105 = vector.load %arg11[%c2_99, %c2_100, %c0_101] : memref<10x18x128xf32, #tpu.memory_space<vmem>>, vector<8x16x128xf32>
    %106 = tpu.concatenate %103, %104, %105 in 2 : vector<8x16x128xf32>, vector<8x16x128xf32>, vector<8x16x128xf32> -> vector<8x16x384xf32>
    %107 = vector.shape_cast %106 : vector<8x16x384xf32> to vector<128x384xf32>
    %c2_102 = arith.constant 2 : index
    %c0_103 = arith.constant 0 : index
    %c0_104 = arith.constant 0 : index
    %108 = vector.load %arg6[%c2_102, %c0_103, %c0_104] : memref<3x384x8xf32, #tpu.memory_space<vmem>>, vector<1x384x8xf32>
    %109 = vector.shape_cast %108 : vector<1x384x8xf32> to vector<384x8xf32>
    %cst_105 = arith.constant dense<0.000000e+00> : vector<128x8xf32>
    %110 = tpu.matmul %107, %109, %cst_105 {dimension_numbers = #tpu.dot_dimension_numbers<[1], [0], [0], [1], [0, 0, 1, 1], [], []>} : vector<128x384xf32>, vector<384x8xf32>, vector<128x8xf32> -> vector<128x8xf32>
    %111 = arith.addf %102, %110 : vector<128x8xf32>
    %c0_106 = arith.constant 0 : index
    %c0_107 = arith.constant 0 : index
    %112 = vector.load %arg7[%c0_106, %c0_107] : memref<1x8xf32, #tpu.memory_space<vmem>>, vector<1x8xf32>
    %113 = vector.broadcast %112 : vector<1x8xf32> to vector<128x8xf32>
    %114 = arith.mulf %111, %113 : vector<128x8xf32>
    %c0_108 = arith.constant 0 : index
    %c0_109 = arith.constant 0 : index
    %115 = vector.load %arg8[%c0_108, %c0_109] : memref<1x8xf32, #tpu.memory_space<vmem>>, vector<1x8xf32>
    %116 = vector.broadcast %115 : vector<1x8xf32> to vector<128x8xf32>
    %117 = arith.addf %114, %116 : vector<128x8xf32>
    %cst_110 = arith.constant 0.000000e+00 : f32
    %118 = vector.broadcast %cst_110 : f32 to vector<128x8xf32>
    %119 = arith.maximumf %117, %118 : vector<128x8xf32>
    %120 = vector.shape_cast %119 : vector<128x8xf32> to vector<1x128x8xf32>
    %c0_111 = arith.constant 0 : index
    %c0_112 = arith.constant 0 : index
    %c0_113 = arith.constant 0 : index
    %121 = vector.load %arg9[%c0_111, %c0_112, %c0_113] : memref<1x128x8xf32, #tpu.memory_space<vmem>>, vector<1x128x8xf32>
    tpu.vector_store %arg9[%c0_111, %c0_112, %c0_113], %120 {strides = array<i32>} : memref<1x128x8xf32, #tpu.memory_space<vmem>>, vector<1x128x8xf32>,
    return
  }
  func.func @transform_1(%arg0: i32, %arg1: i32) -> (i32, i32, i32) {
    %c0_i32 = arith.constant 0 : i32
    %c0_i32_0 = arith.constant 0 : i32
    %c0_i32_1 = arith.constant 0 : i32
    %c0_i32_2 = arith.constant 0 : i32
    return %c0_i32, %c0_i32_0, %c0_i32_1 : i32, i32, i32
  }
  func.func @transform_2(%arg0: i32, %arg1: i32) -> (i32, i32) {
    %c0_i32 = arith.constant 0 : i32
    %c0_i32_0 = arith.constant 0 : i32
    %c0_i32_1 = arith.constant 0 : i32
    return %c0_i32, %c0_i32_0 : i32, i32
  }
  func.func @transform_3(%arg0: i32, %arg1: i32) -> (i32, i32) {
    %c0_i32 = arith.constant 0 : i32
    %c0_i32_0 = arith.constant 0 : i32
    %c0_i32_1 = arith.constant 0 : i32
    return %c0_i32, %c0_i32_0 : i32, i32
  }
  func.func @transform_4(%arg0: i32, %arg1: i32) -> (i32, i32, i32) {
    %c0_i32 = arith.constant 0 : i32
    %c0_i32_0 = arith.constant 0 : i32
    %c0_i32_1 = arith.constant 0 : i32
    %c0_i32_2 = arith.constant 0 : i32
    return %c0_i32, %c0_i32_0, %c0_i32_1 : i32, i32, i32
  }
  func.func @transform_5(%arg0: i32, %arg1: i32) -> (i32, i32) {
    %c0_i32 = arith.constant 0 : i32
    %c0_i32_0 = arith.constant 0 : i32
    %c0_i32_1 = arith.constant 0 : i32
    return %c0_i32, %c0_i32_0 : i32, i32
  }
  func.func @transform_6(%arg0: i32, %arg1: i32) -> (i32, i32) {
    %c0_i32 = arith.constant 0 : i32
    %c0_i32_0 = arith.constant 0 : i32
    %c0_i32_1 = arith.constant 0 : i32
    return %c0_i32, %c0_i32_0 : i32, i32
  }
  func.func @transform_7(%arg0: i32, %arg1: i32) -> (i32, i32, i32) {
    %c0_i32 = arith.constant 0 : i32
    %c0_i32_0 = arith.constant 0 : i32
    return %arg0, %arg1, %c0_i32 : i32, i32, i32
  }
}

</mosaic_0001>

<bundles_post_ra>
// kernel: tpu_custom_call.1
= control target key start
LH: loop header
LB: loop body
LE: loop exit
PB: predicated region body
PF: predicated region fallthrough
CT: control target
= control target key end

     0   :  { %s12428_s24 = smov 0   ;;  %s12430_s25 = smov 0   ;;  %s16634_s0 = inlined_call_operand.vmem [shape: f32[2,20,20,128], index: 0, kind: input, shape index: {}]   ;;  %s16635_s1 = inlined_call_operand.vmem [shape: f32[3,384,128], index: 1, kind: input, shape index: {}]   ;;  %s16636_s2 = inlined_call_operand.vmem [shape: f32[1,128], index: 2, kind: input, shape index: {}]   ;;  %s16637_s3 = inlined_call_operand.vmem [shape: f32[1,128], index: 3, kind: input, shape index: {}]   ;;  %s16638_s4 = inlined_call_operand.vmem [shape: f32[3,384,8], index: 4, kind: input, shape index: {}]   ;;  %s16639_s5 = inlined_call_operand.vmem [shape: f32[1,8], index: 5, kind: input, shape index: {}]   ;;  %s16640_s6 = inlined_call_operand.vmem [shape: f32[1,8], index: 6, kind: input, shape index: {}]   ;;  %s16641_s7 = inlined_call_operand.vmem [shape: f32[2,256,8], index: 7, kind: output, shape index: {}]  }
   0x1   :  { %s12432_s26 = smov 0   ;;  %s12434_s27 = smov 0  }
   0x2   :  { %s12436_s28 = smov 0  }
   0x3 LB: > { %s26_s29 = sadd.s32 1, %s12372_s26  ;;  %s29_s30 = sadd.s32 1, %s12376_s27  ;;  %s12380_s28 = sphi %s12436_s28, %s17_s28   ;;  %s12376_s27 = sphi %s12434_s27, %s16908_s27   ;;  %s12372_s26 = sphi %s12432_s26, %s16907_s26   ;;  %s12368_s25 = sphi %s12430_s25, %s16906_s25   ;;  %s12364_s24 = sphi %s12428_s24, %s16905_s24  }
   0x4   : > { %p27_p0 = scmp.ge.s32.totalorder %s26_s29, 2  ;;  %p9920_p1 = scmp.ge.s32.totalorder %s12380_s28, 1 }
   0x5   : > { %p217_p2 = scmp.lt.s32.totalorder %s12380_s28, 5 }
   0x6   : > { %s16910_s29 = smov (%p27_p0, %s26_s29), 0  ;;  %s16912_s30 = smov (!%p27_p0, %s29_s30), %s12376_s27 }
   0x7   : > { %p218_p3 = pnand %p9920_p1, %p217_p2  ;;  %p31_p4 = scmp.ge.s32.totalorder %s16912_s30, 2 }
   0x9   : > { %s16914_s30 = smov (%p31_p4, %s16912_s30), 0  ;;  %221 = sbr.rel (%p218_p3) target bundleno = 1327 (0x52f), region = 44 }
  0x10   : > { %s9921_s8 = sshll.u32 %s12364_s24, 4  ;;  %p247_p5 = scmp.lt.s32.totalorder %s12368_s25, 1 }
  0x11   : > { %p249_p6 = scmp.lt.s32.totalorder %s9921_s8, 31  ;;  %p256_p7 = scmp.lt.s32.totalorder %s12364_s24, 0 }
  0x12   : > { %s248_s9 = scalar_select %p247_p5, %s12368_s25, 1 }
  0x13   : > { %s16916_s8 = smov (!%p249_p6, %s9921_s8), 31  ;;  %s257_s11 = ssub.s32 0, %s12364_s24 }
  0x14   : > { %s9922_s10 = sshll.u32 %s248_s9, 5  ;;  %s9924_s13 = smin.u32 %s12364_s24, %s257_s11 }
  0x15   : > { %s252_s12 = sadd.s32 %s9922_s10, %s16916_s8  ;;  %s259_s15 = sand.u32 1, %s9924_s13  }
  0x16   : > { %s9923_s14 = sshll.u32 %s252_s12, 3  ;;  %s260_s19 = ssub.s32 0, %s259_s15 }
  0x17   : > { %s12471_s18 = scalar_lea.vmem %s16641_s7, %s9923_s14  ;;  %s16918_s19 = smov (!%p256_p7, %s260_s19), %s259_s15 }
  0x18   : > { %p9926_p8 = scmp.lt.s32.totalorder %s16918_s19, 0  ;;  %s266_s20 = sadd.s32 2, %s16918_s19 }
  0x19   : > { %p9927_p9 = scmp.ne.s32.totalorder %s12364_s24, 0 }
  0x1a   : > { %s16920_s20 = smov (!%p9926_p8, %s266_s20), %s16918_s19  ;;  %s9929_s21 = smul.u32 (!%p9927_p9), 192, %s12364_s24 }
  0x1b   : > { %271 = sbr.rel (%p9927_p9) target bundleno = 54 (0x36), region = 48  ;;  %s279_s13 = scalar_lea.sflag (!%p9927_p9), [#allocation4], %s16920_s20 }
  0x1c   : > { %s274_s22 = smul.u32 (!%p9927_p9), 480, %s12368_s25 }
  0x1d   : > { %s277_s23 = smul.u32 (!%p9927_p9), 288, %s16920_s20 }
  0x1e   : > { %s275_s8 = sadd.s32 (!%p9927_p9), %s9929_s21, %s274_s22 }
  0x1f   : > { %s12484_s11 = scalar_lea.vmem (!%p9927_p9), %s16634_s0, %s275_s8  ;;  %s12489_s12 = scalar_lea.vmem (!%p9927_p9), [#allocation2], %s277_s23 }
  0x20   : > { %v339_v0 = vld [vmem:[%s12484_s11] sm:$0xff] (!%p9927_p9)  ;;  %v341_v1 = vld [vmem:[%s12484_s11 + $0x8] sm:$0xff] (!%p9927_p9)  ;;  %v343_v2 = vld [vmem:[%s12484_s11 + $0x18] sm:$0xff] (!%p9927_p9) }
  0x21   : > { %340 = vst [vmem:[%s12489_s12] sm:$0xff] (!%p9927_p9), %v339_v0  ;;  %342 = vst [vmem:[%s12489_s12 + $0x8] sm:$0xff] (!%p9927_p9), %v341_v1  ;;  %v345_v3 = vld [vmem:[%s12484_s11 + $0x20] sm:$0xff] (!%p9927_p9)  ;;  %v347_v4 = vld [vmem:[%s12484_s11 + $0x30] sm:$0xff] (!%p9927_p9) }
  0x22   : > { %344 = vst [vmem:[%s12489_s12 + $0x18] sm:$0xff] %v343_v2  ;;  %v349_v5 = vld [vmem:[%s12484_s11 + $0x38] sm:$0xff]  ;;  %346 = vst [vmem:[%s12489_s12 + $0x20] sm:$0xff] %v345_v3  ;;  %v351_v6 = vld [vmem:[%s12484_s11 + $0x48] sm:$0xff] }
  0x23   : > { %348 = vst [vmem:[%s12489_s12 + $0x30] sm:$0xff] %v347_v4  ;;  %350 = vst [vmem:[%s12489_s12 + $0x38] sm:$0xff] %v349_v5  ;;  %v353_v7 = vld [vmem:[%s12484_s11 + $0x50] sm:$0xff]  ;;  %v355_v8 = vld [vmem:[%s12484_s11 + $0x60] sm:$0xff] }
  0x24   : > { %352 = vst [vmem:[%s12489_s12 + $0x48] sm:$0xff] %v351_v6  ;;  %354 = vst [vmem:[%s12489_s12 + $0x50] sm:$0xff] %v353_v7  ;;  %v357_v9 = vld [vmem:[%s12484_s11 + $0x68] sm:$0xff]  ;;  %v359_v10 = vld [vmem:[%s12484_s11 + $0x78] sm:$0xff] }
  0x25   : > { %356 = vst [vmem:[%s12489_s12 + $0x60] sm:$0xff] %v355_v8  ;;  %v361_v11 = vld [vmem:[%s12484_s11 + $0x80] sm:$0xff]  ;;  %358 = vst [vmem:[%s12489_s12 + $0x68] sm:$0xff] %v357_v9  ;;  %v363_v12 = vld [vmem:[%s12484_s11 + $0x90] sm:$0xff] }
  0x26   : > { %360 = vst [vmem:[%s12489_s12 + $0x78] sm:$0xff] %v359_v10  ;;  %362 = vst [vmem:[%s12489_s12 + $0x80] sm:$0xff] %v361_v11  ;;  %v365_v13 = vld [vmem:[%s12484_s11 + $0x98] sm:$0xff]  ;;  %v367_v14 = vld [vmem:[%s12484_s11 + $0xa8] sm:$0xff] }
  0x27   : > { %364 = vst [vmem:[%s12489_s12 + $0x90] sm:$0xff] %v363_v12  ;;  %366 = vst [vmem:[%s12489_s12 + $0x98] sm:$0xff] %v365_v13  ;;  %v369_v15 = vld [vmem:[%s12484_s11 + $0xb0] sm:$0xff]  ;;  %v371_v16 = vld [vmem:[%s12484_s11 + $0xc0] sm:$0xff] }
  0x28   : > { %368 = vst [vmem:[%s12489_s12 + $0xa8] sm:$0xff] %v367_v14  ;;  %v373_v17 = vld [vmem:[%s12484_s11 + $0xc8] sm:$0xff]  ;;  %370 = vst [vmem:[%s12489_s12 + $0xb0] sm:$0xff] %v369_v15  ;;  %v375_v18 = vld [vmem:[%s12484_s11 + $0xd8] sm:$0xff] }
  0x29   : > { %372 = vst [vmem:[%s12489_s12 + $0xc0] sm:$0xff] %v371_v16  ;;  %374 = vst [vmem:[%s12489_s12 + $0xc8] sm:$0xff] %v373_v17  ;;  %v377_v19 = vld [vmem:[%s12484_s11 + $0xe0] sm:$0xff]  ;;  %v379_v20 = vld [vmem:[%s12484_s11 + $0xf0] sm:$0xff] }
  0x2a   : > { %376 = vst [vmem:[%s12489_s12 + $0xd8] sm:$0xff] %v375_v18  ;;  %378 = vst [vmem:[%s12489_s12 + $0xe0] sm:$0xff] %v377_v19  ;;  %v381_v21 = vld [vmem:[%s12484_s11 + $0xf8] sm:$0xff]  ;;  %v383_v22 = vld [vmem:[%s12484_s11 + $0x108] sm:$0xff] }
  0x2b   : > { %380 = vst [vmem:[%s12489_s12 + $0xf0] sm:$0xff] %v379_v20  ;;  %v385_v23 = vld [vmem:[%s12484_s11 + $0x110] sm:$0xff]  ;;  %382 = vst [vmem:[%s12489_s12 + $0xf8] sm:$0xff] %v381_v21  ;;  %v9932_v25 = vld [vmem:[%s12484_s11 + $0x28] sm:$0xf] }
  0x2c   : > { %384 = vst [vmem:[%s12489_s12 + $0x108] sm:$0xff] %v383_v22  ;;  %386 = vst [vmem:[%s12489_s12 + $0x110] sm:$0xff] %v385_v23  ;;  %v9930_v24 = vld [vmem:[%s12484_s11 + $0x10] sm:$0xf]  ;;  %v9934_v26 = vld [vmem:[%s12484_s11 + $0x40] sm:$0xf] }
  0x2d   : > { %9931 = vst [vmem:[%s12489_s12 + $0x10] sm:$0xf] %v9930_v24  ;;  %9933 = vst [vmem:[%s12489_s12 + $0x28] sm:$0xf] %v9932_v25  ;;  %v9936_v27 = vld [vmem:[%s12484_s11 + $0x58] sm:$0xf] }
  0x2e   : > { %9935 = vst [vmem:[%s12489_s12 + $0x40] sm:$0xf] %v9934_v26  ;;  %v9938_v28 = vld [vmem:[%s12484_s11 + $0x70] sm:$0xf]  ;;  %v9940_v29 = vld [vmem:[%s12484_s11 + $0x88] sm:$0xf] }
  0x2f   : > { %9937 = vst [vmem:[%s12489_s12 + $0x58] sm:$0xf] %v9936_v27  ;;  %9939 = vst [vmem:[%s12489_s12 + $0x70] sm:$0xf] %v9938_v28  ;;  %v9942_v30 = vld [vmem:[%s12484_s11 + $0xa0] sm:$0xf] }
  0x30   : > { %9941 = vst [vmem:[%s12489_s12 + $0x88] sm:$0xf] %v9940_v29  ;;  %v9944_v31 = vld [vmem:[%s12484_s11 + $0xb8] sm:$0xf]  ;;  %v9946_v32 = vld [vmem:[%s12484_s11 + $0xd0] sm:$0xf] }
  0x31   : > { %9943 = vst [vmem:[%s12489_s12 + $0xa0] sm:$0xf] %v9942_v30  ;;  %9945 = vst [vmem:[%s12489_s12 + $0xb8] sm:$0xf] %v9944_v31  ;;  %v9948_v33 = vld [vmem:[%s12484_s11 + $0xe8] sm:$0xf] }
  0x32   : > { %9947 = vst [vmem:[%s12489_s12 + $0xd0] sm:$0xf] %v9946_v32  ;;  %v9950_v34 = vld [vmem:[%s12484_s11 + $0x100] sm:$0xf]  ;;  %v9952_v35 = vld [vmem:[%s12484_s11 + $0x118] sm:$0xf] }
  0x33   : > { %9949 = vst [vmem:[%s12489_s12 + $0xe8] sm:$0xf] %v9948_v33  ;;  %9951 = vst [vmem:[%s12489_s12 + $0x100] sm:$0xf] %v9950_v34 }
  0x34   : > { %9953 = vst [vmem:[%s12489_s12 + $0x118] sm:$0xf] %v9952_v35 }
  0x35   : > { %423 = vsyncadd %s279_s13, 3840 }
  0x36 PF: > { %s424_s14 = scalar_lea.sflag [#allocation4], %s16920_s20 }
  0x37   : > { %12360 = dma.done.wait %s424_s14, 3840 }
  0x38   : > { %12361 = vsyncadd %s424_s14, 4294963456  ;;  %s429_s15 = sadd.s32 1, %s12364_s24 }
  0x39   : > { %p9954_p10 = scmp.ge.s32.totalorder %s429_s15, 2 }
  0x3a   : > { %s434_s16 = ssub.s32 (!%p9954_p10), 1, %s16920_s20  ;;  %s9840_s17 = smul.u32 (!%p9954_p10), 192, %s12364_s24 }
  0x3b   : > { %433 = sbr.rel (%p9954_p10) target bundleno = 86 (0x56), region = 89  ;;  %s442_s10 = scalar_lea.sflag (!%p9954_p10), [#allocation4], %s434_s16 }
  0x3c   : > { %s9841_s19 = smul.u32 (!%p9954_p10), 480, %s12368_s25 }
  0x3d   : > { %s440_s21 = smul.u32 (!%p9954_p10), 288, %s434_s16 }
  0x3e   : > { %s9842_s22 = sadd.s32 (!%p9954_p10), %s9841_s19, %s9840_s17 }
  0x3f   : > { %s12571_s9 = scalar_lea.vmem (!%p9954_p10), %s16634_s0, %s9842_s22  ;;  %s12576_s25 = scalar_lea.vmem (!%p9954_p10), [#allocation2], %s440_s21 }
  0x40   : > { %v9956_v36 = vld [vmem:[%s12571_s9 + $0xc0] sm:$0xff] (!%p9954_p10)  ;;  %v9957_v37 = vld [vmem:[%s12571_s9 + $0xc8] sm:$0xff] (!%p9954_p10)  ;;  %v9958_v38 = vld [vmem:[%s12571_s9 + $0xd8] sm:$0xff] (!%p9954_p10) }
  0x41   : > { %503 = vst [vmem:[%s12576_s25] sm:$0xff] (!%p9954_p10), %v9956_v36  ;;  %505 = vst [vmem:[%s12576_s25 + $0x8] sm:$0xff] (!%p9954_p10), %v9957_v37  ;;  %v9959_v39 = vld [vmem:[%s12571_s9 + $0xe0] sm:$0xff] (!%p9954_p10)  ;;  %v9960_v40 = vld [vmem:[%s12571_s9 + $0xf0] sm:$0xff] (!%p9954_p10) }
  0x42   : > { %507 = vst [vmem:[%s12576_s25 + $0x18] sm:$0xff] %v9958_v38  ;;  %v9961_v41 = vld [vmem:[%s12571_s9 + $0xf8] sm:$0xff]  ;;  %509 = vst [vmem:[%s12576_s25 + $0x20] sm:$0xff] %v9959_v39  ;;  %v9962_v42 = vld [vmem:[%s12571_s9 + $0x108] sm:$0xff] }
  0x43   : > { %511 = vst [vmem:[%s12576_s25 + $0x30] sm:$0xff] %v9960_v40  ;;  %513 = vst [vmem:[%s12576_s25 + $0x38] sm:$0xff] %v9961_v41  ;;  %v9963_v43 = vld [vmem:[%s12571_s9 + $0x110] sm:$0xff]  ;;  %v9964_v44 = vld [vmem:[%s12571_s9 + $0x120] sm:$0xff] }
  0x44   : > { %515 = vst [vmem:[%s12576_s25 + $0x48] sm:$0xff] %v9962_v42  ;;  %517 = vst [vmem:[%s12576_s25 + $0x50] sm:$0xff] %v9963_v43  ;;  %v9965_v45 = vld [vmem:[%s12571_s9 + $0x128] sm:$0xff]  ;;  %v9966_v46 = vld [vmem:[%s12571_s9 + $0x138] sm:$0xff] }
  0x45   : > { %519 = vst [vmem:[%s12576_s25 + $0x60] sm:$0xff] %v9964_v44  ;;  %v9967_v47 = vld [vmem:[%s12571_s9 + $0x140] sm:$0xff]  ;;  %521 = vst [vmem:[%s12576_s25 + $0x68] sm:$0xff] %v9965_v45  ;;  %v9968_v48 = vld [vmem:[%s12571_s9 + $0x150] sm:$0xff] }
  0x46   : > { %523 = vst [vmem:[%s12576_s25 + $0x78] sm:$0xff] %v9966_v46  ;;  %525 = vst [vmem:[%s12576_s25 + $0x80] sm:$0xff] %v9967_v47  ;;  %v9969_v49 = vld [vmem:[%s12571_s9 + $0x158] sm:$0xff]  ;;  %v9970_v50 = vld [vmem:[%s12571_s9 + $0x168] sm:$0xff] }
  0x47   : > { %527 = vst [vmem:[%s12576_s25 + $0x90] sm:$0xff] %v9968_v48  ;;  %529 = vst [vmem:[%s12576_s25 + $0x98] sm:$0xff] %v9969_v49  ;;  %v9971_v51 = vld [vmem:[%s12571_s9 + $0x170] sm:$0xff]  ;;  %v9972_v52 = vld [vmem:[%s12571_s9 + $0x180] sm:$0xff] }
  0x48   : > { %531 = vst [vmem:[%s12576_s25 + $0xa8] sm:$0xff] %v9970_v50  ;;  %v9973_v53 = vld [vmem:[%s12571_s9 + $0x188] sm:$0xff]  ;;  %533 = vst [vmem:[%s12576_s25 + $0xb0] sm:$0xff] %v9971_v51  ;;  %v9974_v54 = vld [vmem:[%s12571_s9 + $0x198] sm:$0xff] }
  0x49   : > { %535 = vst [vmem:[%s12576_s25 + $0xc0] sm:$0xff] %v9972_v52  ;;  %537 = vst [vmem:[%s12576_s25 + $0xc8] sm:$0xff] %v9973_v53  ;;  %v9975_v55 = vld [vmem:[%s12571_s9 + $0x1a0] sm:$0xff]  ;;  %v9976_v56 = vld [vmem:[%s12571_s9 + $0x1b0] sm:$0xff] }
  0x4a   : > { %539 = vst [vmem:[%s12576_s25 + $0xd8] sm:$0xff] %v9974_v54  ;;  %541 = vst [vmem:[%s12576_s25 + $0xe0] sm:$0xff] %v9975_v55  ;;  %v9977_v57 = vld [vmem:[%s12571_s9 + $0x1b8] sm:$0xff]  ;;  %v9978_v58 = vld [vmem:[%s12571_s9 + $0x1c8] sm:$0xff] }
  0x4b   : > { %543 = vst [vmem:[%s12576_s25 + $0xf0] sm:$0xff] %v9976_v56  ;;  %v9979_v59 = vld [vmem:[%s12571_s9 + $0x1d0] sm:$0xff]  ;;  %545 = vst [vmem:[%s12576_s25 + $0xf8] sm:$0xff] %v9977_v57  ;;  %v9982_v61 = vld [vmem:[%s12571_s9 + $0xe8] sm:$0xf] }
  0x4c   : > { %547 = vst [vmem:[%s12576_s25 + $0x108] sm:$0xff] %v9978_v58  ;;  %549 = vst [vmem:[%s12576_s25 + $0x110] sm:$0xff] %v9979_v59  ;;  %v9980_v60 = vld [vmem:[%s12571_s9 + $0xd0] sm:$0xf]  ;;  %v9984_v62 = vld [vmem:[%s12571_s9 + $0x100] sm:$0xf] }
  0x4d   : > { %9981 = vst [vmem:[%s12576_s25 + $0x10] sm:$0xf] %v9980_v60  ;;  %9983 = vst [vmem:[%s12576_s25 + $0x28] sm:$0xf] %v9982_v61  ;;  %v9986_v63 = vld [vmem:[%s12571_s9 + $0x118] sm:$0xf] }
  0x4e   : > { %9985 = vst [vmem:[%s12576_s25 + $0x40] sm:$0xf] %v9984_v62  ;;  %v9988_v0 = vld [vmem:[%s12571_s9 + $0x130] sm:$0xf]  ;;  %v9990_v1 = vld [vmem:[%s12571_s9 + $0x148] sm:$0xf] }
  0x4f   : > { %9987 = vst [vmem:[%s12576_s25 + $0x58] sm:$0xf] %v9986_v63  ;;  %9989 = vst [vmem:[%s12576_s25 + $0x70] sm:$0xf] %v9988_v0  ;;  %v9992_v2 = vld [vmem:[%s12571_s9 + $0x160] sm:$0xf] }
  0x50   : > { %9991 = vst [vmem:[%s12576_s25 + $0x88] sm:$0xf] %v9990_v1  ;;  %v9994_v3 = vld [vmem:[%s12571_s9 + $0x178] sm:$0xf]  ;;  %v9996_v4 = vld [vmem:[%s12571_s9 + $0x190] sm:$0xf] }
  0x51   : > { %9993 = vst [vmem:[%s12576_s25 + $0xa0] sm:$0xf] %v9992_v2  ;;  %9995 = vst [vmem:[%s12576_s25 + $0xb8] sm:$0xf] %v9994_v3  ;;  %v9998_v5 = vld [vmem:[%s12571_s9 + $0x1a8] sm:$0xf] }
  0x52   : > { %9997 = vst [vmem:[%s12576_s25 + $0xd0] sm:$0xf] %v9996_v4  ;;  %v10000_v6 = vld [vmem:[%s12571_s9 + $0x1c0] sm:$0xf]  ;;  %v10002_v7 = vld [vmem:[%s12571_s9 + $0x1d8] sm:$0xf] }
  0x53   : > { %9999 = vst [vmem:[%s12576_s25 + $0xe8] sm:$0xf] %v9998_v5  ;;  %10001 = vst [vmem:[%s12576_s25 + $0x100] sm:$0xf] %v10000_v6 }
  0x54   : > { %10003 = vst [vmem:[%s12576_s25 + $0x118] sm:$0xf] %v10002_v7 }
  0x55   : > { %586 = vsyncadd %s442_s10, 3840 }
  0x56 PF: > { %v10158_v8 = vld [vmem:[%s16635_s1 + $0x280] sm:$0xff]  ;;  %v10159_v9 = vld [vmem:[%s16635_s1 + $0x288] sm:$0xff]  ;;  %v10160_v10 = vld [vmem:[%s16635_s1 + $0x290] sm:$0xff]  ;;  %v16642_v11 = vmov 0.0|0.0   ;;  %vm12383_vm0 = vmmov 0   ;;  %v16645_v14 = vmov 0.0   ;;  %v775_v23 = vlaneseq }
  0x57   : > { %11560 = vmatprep.subr.bf16.mxu0 %v16642_v11  ;;  %v12659_v12 = vpack.c.bf16 %v10159_v9, %v10158_v8  ;;  %v10161_v13 = vld [vmem:[%s16635_s1 + $0x298] sm:$0xff]  ;;  %11073 = vmatprep.mubr.msk.f32.mxu0 %vm12383_vm0, %v16645_v14  ;;  %v10162_v16 = vld [vmem:[%s16635_s1 + $0x2a0] sm:$0xff]  ;;  %v10163_v17 = vld [vmem:[%s16635_s1 + $0x2a8] sm:$0xff]  ;;  %s587_s9 = smul.u32 288, %s16920_s20  ;;  %v12385_v21 = vmov 1983009808  }
  0x58   : > { %11512 = vmatprep.subr.bf16.mxu1 %v16642_v11  ;;  %v12668_v15 = vpack.c.bf16 %v10161_v13, %v10160_v10  ;;  %v12678_v18 = vpack.c.bf16 %v10163_v17, %v10162_v16  ;;  %v10164_v19 = vld [vmem:[%s16635_s1 + $0x2b0] sm:$0xff]  ;;  %v10165_v20 = vld [vmem:[%s16635_s1 + $0x2b8] sm:$0xff]  ;;  %v773_v22 = vunpack.c.l.s4 %v12385_v21  ;;  %v10166_v25 = vld [vmem:[%s16635_s1 + $0x2c0] sm:$0xff]  ;;  %v776_v28 = vshrl.u32 %v775_v23, 7 }
  0x59   : > { %16730 = vst [vmem:[#allocation8_spill] sm:$0xff] %v12659_v12  ;;  %11562 = vmatpush3.bf16.msra.mxu0 %v12659_v12  ;;  %v12689_v24 = vpack.c.bf16 %v10165_v20, %v10164_v19  ;;  %v10167_v26 = vld [vmem:[%s16635_s1 + $0x2c8] sm:$0xff]  ;;  %s12698_s17 = scalar_lea.vmem [#allocation2], %s587_s9  ;;  %v10168_v34 = vld [vmem:[%s16635_s1 + $0x2d0] sm:$0xff]  ;;  %v10169_v35 = vld [vmem:[%s16635_s1 + $0x2d8] sm:$0xff] }
  0x5a   : > { %16731 = vst [vmem:[#allocation9_spill] sm:$0xff] %v12668_v15  ;;  %11563 = vmatprep.subr.bf16.mxu0 %v16642_v11  ;;  %16732 = vst [vmem:[#allocation10_spill] sm:$0xff] %v12678_v18  ;;  %v774_v27 = vunpack.c.0.s8 %v773_v22  ;;  %v12702_v30 = vpack.c.bf16 %v10167_v26, %v10166_v25  ;;  %v12727_v44 = vpack.c.bf16 %v10169_v35, %v10168_v34  ;;  %v10170_v45 = vld [vmem:[%s16635_s1 + $0x2e0] sm:$0xff]  ;;  %v10171_v46 = vld [vmem:[%s16635_s1 + $0x2e8] sm:$0xff] }
  0x5b   : > { %16733 = vst [vmem:[#allocation11_spill] sm:$0xff] %v12689_v24  ;;  %v12751_v57 = vpack.c.bf16 %v10171_v46, %v10170_v45  ;;  %v10172_v58 = vld [vmem:[%s16635_s1 + $0x2f0] sm:$0xff]  ;;  %v10173_v59 = vld [vmem:[%s16635_s1 + $0x2f8] sm:$0xff]  ;;  %v1629_v9 = vld [vmem:[%s16635_s1] sm:$0xff] }
  0x5c   : > { %16734 = vst [vmem:[#allocation12_spill] sm:$0xff] %v12702_v30  ;;  %v12719_v37 = vsub.s32 %v774_v27, %v776_v28  ;;  %16735 = vst [vmem:[#allocation13_spill] sm:$0xff] %v12727_v44  ;;  %v12788_v7 = vpack.c.bf16 %v10173_v59, %v10172_v58  ;;  %v10116_v8 = vld.sshfl [vmem:[%s12698_s17 + $0x2a] sm:$0x3 pattern:$0x76325410] }
  0x5d   : > { %11565 = vmatpush3.bf16.msra.mxu0 %v12668_v15  ;;  %v10086_v29 = vld [vmem:[%s12698_s17 + $0x1a] sm:$0xff]  ;;  %v12705_v31 = vld [vmem:[%s12698_s17 + $0x30] sm:$0xff]  ;;  %v10087_v36 = vld [vmem:[%s12698_s17 + $0x22] sm:$0xff]  ;;  %16738 = vst [vmem:[#allocation16_spill] sm:$0xff] %v12751_v57 }
  0x5e   : > { %11566 = vmatprep.subr.bf16.mxu0 %v16642_v11  ;;  %v12708_v32 = vld [vmem:[%s12698_s17 + $0x31] sm:$0xff]  ;;  %v1861_v38 = vcombine.high %v10086_v29, %v10086_v29  ;;  %v10060_v42 = vld [vmem:[%s12698_s17 + $0x39] sm:$0xff]  ;;  %v1896_v47 = vcombine.high %v10087_v36, %v10087_v36  ;;  %v12737_v51 = vrot.slane %v10086_v29, %v12719_v37  ;;  %v10061_v56 = vld [vmem:[%s12698_s17 + $0x41] sm:$0x3]  ;;  %v12761_v60 = vrot.slane %v10087_v36, %v12719_v37 }
  0x5f   : > { %v10089_v33 = vld [vmem:[%s12698_s17 + $0x32] sm:$0xff]  ;;  %v1946_v39 = vcombine.high %v12705_v31, %v12708_v32  ;;  %v10090_v43 = vld [vmem:[%s12698_s17 + $0x3a] sm:$0xff]  ;;  %16742 = vst [vmem:[#allocation20_spill] sm:$0xff] %v12788_v7  ;;  %v1630_v10 = vld [vmem:[%s16635_s1 + $0x8] sm:$0xff] }
  0x60   : > { %v1947_v40 = vcombine.high %v10089_v33, %v10089_v33  ;;  %v10030_v41 = vld [vmem:[%s12698_s17 + $0x38] sm:$0xff]  ;;  %v1982_v50 = vcombine.high %v10090_v43, %v10090_v43  ;;  %16736 = vst [vmem:[#allocation14_spill] sm:$0xff] %v12737_v51  ;;  %v12740_v52 = vrot.slane %v1861_v38, %v12719_v37  ;;  %v10031_v55 = vld [vmem:[%s12698_s17 + $0x40] sm:$0x3]  ;;  %v12764_v61 = vrot.slane %v1896_v47, %v12719_v37  ;;  %v1631_v27 = vld [vmem:[%s16635_s1 + $0x10] sm:$0xff] }
  0x61   : > { %11568 = vmatpush3.bf16.msra.mxu0 %v12678_v18  ;;  %v1980_v48 = vcombine.low %v10030_v41, %v10060_v42  ;;  %v1981_v49 = vcombine.high %v10030_v41, %v10060_v42  ;;  %v12743_v53 = vrot.slane %v1946_v39, %v12719_v37  ;;  %v12767_v62 = vrot.slane %v10090_v43, %v12719_v37  ;;  %v10117_v25 = vld.sshfl [vmem:[%s12698_s17 + $0x42] sm:$0x3 pattern:$0x76325410]  ;;  %v1632_v28 = vld [vmem:[%s16635_s1 + $0x18] sm:$0xff]  ;;  %v10092_v29 = vld [vmem:[%s12698_s17 + $0x4a] sm:$0xff] }
  0x62   : > { %11569 = vmatprep.subr.bf16.mxu0 %v16642_v11  ;;  %v12746_v54 = vrot.slane %v1947_v40, %v12719_v37  ;;  %v12776_v1 = vrot.slane %v1982_v50, %v12719_v37  ;;  %v2015_v2 = vcombine.low %v10031_v55, %v10061_v56  ;;  %v2785_v3 = vrot.slane %v12737_v51, %v12719_v37  ;;  %v10095_v40 = vld [vmem:[%s12698_s17 + $0x62] sm:$0xff]  ;;  %v10093_v50 = vld [vmem:[%s12698_s17 + $0x52] sm:$0xff] }
  0x63   : > { %16739 = vst [vmem:[#allocation17_spill] sm:$0xff] %v12767_v62  ;;  %v12770_v63 = vrot.slane %v1980_v48, %v12719_v37  ;;  %v12773_v0 = vrot.slane %v1981_v49, %v12719_v37  ;;  %v2799_v4 = vrot.slane %v12740_v52, %v12719_v37  ;;  %v12783_v5 = vrot.slane %v10089_v33, %v12719_v37  ;;  %v12828_v41 = vld [vmem:[%s12698_s17 + $0x60] sm:$0xff]  ;;  %v10036_v45 = vld [vmem:[%s12698_s17 + $0x68] sm:$0xff] }
  0x64   : > { %16737 = vst [vmem:[#allocation15_spill] sm:$0xff] %v12746_v54  ;;  %16740 = vst [vmem:[#allocation18_spill] sm:$0xff] %v12776_v1  ;;  %v1978_v6 = vcombine.low %v12743_v53, %v12746_v54  ;;  %v2820_v13 = vrot.slane %v12761_v60, %v12719_v37  ;;  %v12805_v19 = vrot.slane %v2015_v2, %v12719_v37  ;;  %v12837_v46 = vld [vmem:[%s12698_s17 + $0x61] sm:$0xff]  ;;  %v10066_v47 = vld [vmem:[%s12698_s17 + $0x69] sm:$0xff] }
  0x65   : > { %11571 = vmatpush3.bf16.msra.mxu0 %v12689_v24  ;;  %16741 = vst [vmem:[#allocation19_spill] sm:$0xff] %v12783_v5  ;;  %v2011_v16 = vcombine.low %v12770_v63, %v12767_v62  ;;  %v2013_v17 = vcombine.low %v12773_v0, %v12776_v1  ;;  %v2802_v20 = vcombine.low %v2785_v3, %v2799_v4  ;;  %v1633_v48 = vld [vmem:[%s16635_s1 + $0x20] sm:$0xff]  ;;  %v1634_v49 = vld [vmem:[%s16635_s1 + $0x28] sm:$0xff] }
  0x66   : > { %11572 = vmatprep.subr.bf16.mxu0 %v16642_v11  ;;  %16743 = vst [vmem:[#allocation21_spill] sm:$0xff] %v12805_v19  ;;  %v2834_v21 = vrot.slane %v12764_v61, %v12719_v37  ;;  %v10175_v22 = vcombine.low %v10116_v8, %v12783_v5  ;;  %v10177_v23 = vcombine.high %v12783_v5, %v1978_v6  ;;  %v10037_v8 = vld [vmem:[%s12698_s17 + $0x70] sm:$0x3]  ;;  %v10073_v24 = vld [vmem:[%s12698_s17 + $0xa1] sm:$0x3] }
  0x67   : > { %v11585_v26 = vpack.c.bf16 %v1630_v10, %v1629_v9  ;;  %v10179_v33 = vcombine.high %v12746_v54, %v2011_v16  ;;  %v10181_v34 = vcombine.high %v12767_v62, %v2013_v17  ;;  %v2030_v35 = vcombine.low %v12805_v19, %v10117_v25  ;;  %v10067_v9 = vld [vmem:[%s12698_s17 + $0x71] sm:$0x3] }
  0x68   : > { %v2837_v36 = vcombine.low %v2820_v13, %v2834_v21  ;;  %v2855_v38 = vrot.slane %v10175_v22, %v12719_v37  ;;  %v2869_v39 = vrot.slane %v10177_v23, %v12719_v37  ;;  %v11588_v42 = vpack.c.bf16 %v1632_v28, %v1631_v27  ;;  %v10096_v17 = vld [vmem:[%s12698_s17 + $0x6a] sm:$0xff]  ;;  %v1636_v21 = vld [vmem:[%s16635_s1 + $0x38] sm:$0xff] }
  0x69   : > { %11574 = vmatpush3.bf16.msra.mxu0 %v12702_v30  ;;  %v12833_v43 = vrot.slane %v10092_v29, %v12719_v37  ;;  %v2033_v55 = vcombine.high %v10092_v29, %v10092_v29  ;;  %v2890_v56 = vrot.slane %v10179_v33, %v12719_v37  ;;  %v2904_v58 = vrot.slane %v10181_v34, %v12719_v37  ;;  %v10043_v30 = vld [vmem:[%s12698_s17 + $0xa0] sm:$0x3]  ;;  %v621_v19 = vld [vmem:[%s12698_s17 + $0x11] sm:$0x3] }
  0x6a   : > { %11575 = vmatprep.subr.bf16.mxu0 %v16642_v11  ;;  %v10183_v59 = vcombine.high %v12776_v1, %v2030_v35  ;;  %v2872_v2 = vcombine.low %v2855_v38, %v2869_v39  ;;  %v2118_v3 = vcombine.high %v12828_v41, %v12837_v46  ;;  %v2119_v4 = vcombine.high %v10095_v40, %v10095_v40 }
  0x6b   : > { %v2152_v6 = vcombine.low %v10036_v45, %v10066_v47  ;;  %v11591_v10 = vpack.c.bf16 %v1634_v49, %v1633_v48  ;;  %v2939_v13 = vrot.slane %v12833_v43, %v12719_v37  ;;  %v12860_v16 = vrot.slane %v10093_v50, %v12719_v37 }
  0x6c   : > { %v12871_v22 = vrot.slane %v2033_v55, %v12719_v37  ;;  %v2068_v23 = vcombine.high %v10093_v50, %v10093_v50  ;;  %v2153_v25 = vcombine.high %v10036_v45, %v10066_v47  ;;  %v2907_v27 = vcombine.low %v2890_v56, %v2904_v58  ;;  %v1638_v45 = vld [vmem:[%s16635_s1 + $0x48] sm:$0xff] }
  0x6d   : > { %11577 = vmatpush3.bf16.msra.mxu0 %v12727_v44  ;;  %v2925_v28 = vrot.slane %v10183_v59, %v12719_v37  ;;  %v12875_v29 = vrot.slane %v10095_v40, %v12719_v37  ;;  %v2187_v33 = vcombine.low %v10037_v8, %v10067_v9  ;;  %v12878_v34 = vrot.slane %v2118_v3, %v12719_v37  ;;  %v10118_v40 = vld.sshfl [vmem:[%s12698_s17 + $0x5a] sm:$0x3 pattern:$0x76325410]  ;;  %v1639_v8 = vld [vmem:[%s16635_s1 + $0x50] sm:$0xff] }
  0x6e   : > { %11578 = vmatprep.subr.bf16.mxu0 %v16642_v11  ;;  %v12881_v35 = vrot.slane %v2119_v4, %v12719_v37  ;;  %v12887_v38 = vrot.slane %v10096_v17, %v12719_v37  ;;  %v12900_v47 = vrot.slane %v2153_v25, %v12719_v37  ;;  %v2960_v49 = vrot.slane %v12871_v22, %v12719_v37  ;;  %v10119_v4 = vld.sshfl [vmem:[%s12698_s17 + $0x72] sm:$0x3 pattern:$0x76325410]  ;;  %v1640_v9 = vld [vmem:[%s16635_s1 + $0x58] sm:$0xff] }
  0x6f   : > { %16744 = vst [vmem:[#allocation22_spill] sm:$0xff] %v12875_v29  ;;  %16745 = vst [vmem:[#allocation23_spill] sm:$0xff] %v12878_v34  ;;  %v2974_v50 = vrot.slane %v12860_v16, %v12719_v37  ;;  %v12910_v55 = vrot.slane %v2068_v23, %v12719_v37  ;;  %v12913_v56 = vrot.slane %v2187_v33, %v12719_v37  ;;  %v10101_v33 = vld [vmem:[%s12698_s17 + $0x92] sm:$0xff] }
  0x70   : > { %16746 = vst [vmem:[#allocation24_spill] sm:$0xff] %v12881_v35  ;;  %16748 = vst [vmem:[#allocation26_spill] sm:$0xff] %v12887_v38  ;;  %v2942_v58 = vcombine.low %v2925_v28, %v2939_v13  ;;  %v10185_v59 = vcombine.low %v10118_v40, %v12875_v29  ;;  %v12943_v28 = vld [vmem:[%s12698_s17 + $0x91] sm:$0xff]  ;;  %v1641_v40 = vld [vmem:[%s16635_s1 + $0x60] sm:$0xff] }
  0x71   : > { %11580 = vmatpush3.bf16.msra.mxu0 %v12751_v57  ;;  %16749 = vst [vmem:[#allocation27_spill] sm:$0xff] %v12900_v47  ;;  %16751 = vst [vmem:[#allocation29_spill] sm:$0xff] %v12913_v56  ;;  %v2977_v13 = vcombine.low %v2960_v49, %v2974_v50 }
  0x72   : > { %11581 = vmatprep.subr.bf16.mxu0 %v16642_v11  ;;  %v3009_v23 = vrot.slane %v10185_v59, %v12719_v37 }
  0x75   : > { %11583 = vmatpush3.bf16.msra.mxu0 %v12788_v7  ;;  %v1643_v7 = vld [vmem:[%s16635_s1 + $0x70] sm:$0xff] }
  0x76   : > { %11584 = vmatprep.subr.bf16.mxu0 %v16642_v11 }
  0x78   : > { %11074 = vmatmul.mubr.f32.vlgmr.msra.gmra.mrb[0].mxu0 %v2802_v20  ;;  %v1635_v20 = vld [vmem:[%s16635_s1 + $0x30] sm:$0xff] }
  0x79   : > { %11586 = vmatpush1.bf16.msra.mxu0 %v11585_v26  ;;  %11076 = vmatprep.mubr.msk.f32.mxu0 %vm12383_vm0, %v16645_v14  ;;  %v2154_v26 = vcombine.high %v10096_v17, %v10096_v17  ;;  %v11594_v39 = vpack.c.bf16 %v1636_v21, %v1635_v20  ;;  %v2202_v17 = vcombine.low %v12913_v56, %v10119_v4  ;;  %v10098_v20 = vld [vmem:[%s12698_s17 + $0x7a] sm:$0xff] }
  0x7a   : > { %11587 = vmatprep.subr.bf16.mxu0 %v16642_v11  ;;  %v2995_v21 = vrot.slane %v12910_v55, %v12719_v37  ;;  %v2205_v49 = vcombine.high %v10098_v20, %v10098_v20  ;;  %v10122_v56 = vld.sshfl [vmem:[%s12698_s17 + $0xba] sm:$0x3 pattern:$0x76325410] }
  0x7b   : > { %v12903_v48 = vrot.slane %v2154_v26, %v12719_v37 }
  0x7c   : > { %11077 = vmatmul.mubr.f32.gmra.mrb[2].mxu0 %v2837_v36  ;;  %v12884_v36 = vrot.slane %v2152_v6, %v12719_v37 }
  0x7d   : > { %11589 = vmatpush1.bf16.msra.mxu0 %v11588_v42  ;;  %11079 = vmatprep.mubr.msk.f32.mxu0 %vm12383_vm0, %v16645_v14  ;;  %v1637_v42 = vld [vmem:[%s16635_s1 + $0x40] sm:$0xff]  ;;  %16750 = vst [vmem:[#allocation28_spill] sm:$0xff] %v12903_v48  ;;  %v10193_v50 = vcombine.high %v12903_v48, %v2202_v17  ;;  %v16752_v17 = vmov 0.0|0.0  }
  0x7e   : > { %11590 = vmatprep.subr.bf16.mxu0 %v16642_v11  ;;  %16747 = vst [vmem:[#allocation25_spill] sm:$0xff] %v12884_v36  ;;  %v2183_v3 = vcombine.low %v12884_v36, %v12887_v38  ;;  %v11597_v6 = vpack.c.bf16 %v1638_v45, %v1637_v42  ;;  %v1642_v42 = vld [vmem:[%s16635_s1 + $0x68] sm:$0xff] }
  0x80   : > { %11080 = vmatmul.mubr.f32.gmra.mrb[4].mxu0 %v2872_v2  ;;  %v2150_v2 = vcombine.low %v12878_v34, %v12881_v35  ;;  %v10189_v26 = vcombine.high %v12881_v35, %v2183_v3  ;;  %v3012_v3 = vcombine.low %v2995_v21, %v3009_v23  ;;  %v12976_v23 = vrot.slane %v10098_v20, %v12719_v37 }
  0x81   : > { %11592 = vmatpush1.bf16.msra.mxu0 %v11591_v10  ;;  %11082 = vmatprep.mubr.msk.f32.mxu0 %vm12383_vm0, %v16645_v14  ;;  %v2185_v10 = vcombine.low %v12900_v47, %v12903_v48  ;;  %v16755_v20 = vmov 0.0   ;;  %v593_v48 = vld [vmem:[%s12698_s17 + $0x20] sm:$0xff] }
  0x82   : > { %11593 = vmatprep.subr.bf16.mxu0 %v16642_v11  ;;  %v10187_v25 = vcombine.high %v12875_v29, %v2150_v2  ;;  %v2291_v2 = vcombine.high %v10101_v33, %v10101_v33  ;;  %v591_v29 = vld [vmem:[%s12698_s17 + $0x10] sm:$0x3] }
  0x83   : > { %v10191_v45 = vcombine.high %v12887_v38, %v2185_v10  ;;  %v11603_v10 = vpack.c.bf16 %v1642_v42, %v1641_v40  ;;  %v623_v38 = vld [vmem:[%s12698_s17 + $0x21] sm:$0xff]  ;;  %v839_v62 = vcombine.low %v591_v29, %v621_v19 }
  0x84   : > { %11083 = vmatmul.mubr.f32.gmra.mrb[6].mxu0 %v2907_v27  ;;  %v12940_v27 = vld [vmem:[%s12698_s17 + $0x90] sm:$0xff]  ;;  %v3030_v4 = vrot.slane %v10187_v25, %v12719_v37  ;;  %v12979_v25 = vrot.slane %v2205_v49, %v12719_v37  ;;  %v12986_v42 = vrot.slane %v2291_v2, %v12719_v37  ;;  %v3100_v2 = vrot.slane %v12976_v23, %v12719_v37  ;;  %v1658_v19 = vld [vmem:[%s16635_s1 + $0xe8] sm:$0xff] }
  0x85   : > { %11595 = vmatpush1.bf16.msra.mxu0 %v11594_v39  ;;  %11085 = vmatprep.mubr.msk.f32.mxu0 %vm12383_vm0, %v16645_v14  ;;  %v11600_v39 = vpack.c.bf16 %v1640_v9, %v1639_v8  ;;  %v2290_v59 = vcombine.high %v12940_v27, %v12943_v28  ;;  %v10042_v8 = vld [vmem:[%s12698_s17 + $0x98] sm:$0xff]  ;;  %v3065_v21 = vrot.slane %v10191_v45, %v12719_v37 }
  0x86   : > { %11596 = vmatprep.subr.bf16.mxu0 %v16642_v11  ;;  %v10072_v9 = vld [vmem:[%s12698_s17 + $0x99] sm:$0xff]  ;;  %16754 = vst [vmem:[#allocation31_spill] sm:$0xff] %v12986_v42 }
  0x87   : > { %v12983_v40 = vrot.slane %v2290_v59, %v12719_v37  ;;  %v2325_v45 = vcombine.high %v10042_v8, %v10072_v9  ;;  %v1646_v59 = vld [vmem:[%s16635_s1 + $0x88] sm:$0xff] }
  0x88   : > { %11086 = vmatmul.mubr.f32.gmra.mrb[8].mxu0 %v2942_v58  ;;  %v10099_v58 = vld [vmem:[%s12698_s17 + $0x82] sm:$0xff] }
  0x89   : > { %11598 = vmatpush1.bf16.msra.mxu0 %v11597_v6  ;;  %11088 = vmatprep.mubr.msk.f32.mxu0 %vm12383_vm0, %v16645_v14  ;;  %v3044_v6 = vrot.slane %v10189_v26, %v12719_v37  ;;  %v2240_v26 = vcombine.high %v10099_v58, %v10099_v58  ;;  %16753 = vst [vmem:[#allocation30_spill] sm:$0xff] %v12983_v40 }
  0x8a   : > { %11599 = vmatprep.subr.bf16.mxu0 %v16642_v11  ;;  %v10102_v11 = vld [vmem:[%s12698_s17 + $0x9a] sm:$0xff]  ;;  %v13019_v18 = vrot.slane %v2325_v45, %v12719_v37 }
  0x8b   : > { %v3047_v57 = vcombine.low %v3030_v4, %v3044_v6  ;;  %v2326_v44 = vcombine.high %v10102_v11, %v10102_v11  ;;  %v13007_v4 = vrot.slane %v2240_v26, %v12719_v37 }
  0x8c   : > { %11089 = vmatmul.mubr.f32.gmra.mrb[10].mxu0 %v2977_v13  ;;  %v1644_v13 = vld [vmem:[%s16635_s1 + $0x78] sm:$0xff]  ;;  %16758 = vst [vmem:[#allocation34_spill] sm:$0xff] %v13019_v18 }
  0x8d   : > { %11601 = vmatpush1.bf16.msra.mxu0 %v11600_v39  ;;  %11091 = vmatprep.mubr.msk.f32.mxu0 %vm12383_vm0, %v16645_v14  ;;  %v3079_v39 = vrot.slane %v10193_v50, %v12719_v37  ;;  %v2324_v14 = vcombine.low %v10042_v8, %v10072_v9  ;;  %v11606_v49 = vpack.c.bf16 %v1644_v13, %v1643_v7  ;;  %v1645_v50 = vld [vmem:[%s16635_s1 + $0x80] sm:$0xff]  ;;  %v10120_v13 = vld.sshfl [vmem:[%s12698_s17 + $0x8a] sm:$0x3 pattern:$0x76325410] }
  0x8e   : > { %11602 = vmatprep.subr.bf16.mxu0 %v16752_v17  ;;  %v13004_v7 = vrot.slane %v10099_v58, %v12719_v37  ;;  %v13010_v8 = vrot.slane %v10101_v33, %v12719_v37  ;;  %v2322_v9 = vcombine.low %v12983_v40, %v12986_v42  ;;  %v13022_v58 = vrot.slane %v10102_v11, %v12719_v37  ;;  %v1648_v11 = vld [vmem:[%s16635_s1 + $0x98] sm:$0xff] }
  0x8f   : > { %v3082_v6 = vcombine.low %v3065_v21, %v3079_v39  ;;  %v13025_v26 = vrot.slane %v2326_v44, %v12719_v37  ;;  %v2359_v21 = vcombine.low %v10043_v30, %v10073_v24  ;;  %v11609_v33 = vpack.c.bf16 %v1646_v59, %v1645_v50 }
  0x90   : > { %11092 = vmatmul.mubr.f32.gmra.mrb[12].mxu0 %v3012_v3  ;;  %v3114_v3 = vrot.slane %v12979_v25, %v12719_v37  ;;  %16756 = vst [vmem:[#allocation32_spill] sm:$0xff] %v13010_v8  ;;  %16759 = vst [vmem:[#allocation35_spill] sm:$0xff] %v13022_v58  ;;  %v3135_v24 = vrot.slane %v13004_v7, %v12719_v37  ;;  %v3149_v30 = vrot.slane %v13007_v4, %v12719_v37 }
  0x91   : > { %11604 = vmatpush1.bf16.msra.mxu0 %v11603_v10  ;;  %11094 = vmatprep.mubr.msk.f32.mxu0 %vm12383_vm0, %v16755_v20  ;;  %v13015_v10 = vrot.slane %v2324_v14, %v12719_v37  ;;  %16760 = vst [vmem:[#allocation36_spill] sm:$0xff] %v13025_v26  ;;  %v1647_v14 = vld [vmem:[%s16635_s1 + $0x90] sm:$0xff]  ;;  %v10195_v44 = vcombine.low %v10120_v13, %v13010_v8 }
  0x92   : > { %11605 = vmatprep.subr.bf16.mxu0 %v16752_v17  ;;  %v10197_v39 = vcombine.high %v13010_v8, %v2322_v9  ;;  %v13047_v50 = vrot.slane %v2359_v21, %v12719_v37  ;;  %v11612_v59 = vpack.c.bf16 %v1648_v11, %v1647_v14  ;;  %v3152_v9 = vcombine.low %v3135_v24, %v3149_v30  ;;  %v10104_v11 = vld [vmem:[%s12698_s17 + $0xaa] sm:$0xff]  ;;  %v1652_v24 = vld [vmem:[%s16635_s1 + $0xb8] sm:$0xff] }
  0x93   : > { %16757 = vst [vmem:[#allocation33_spill] sm:$0xff] %v13015_v10  ;;  %v2355_v45 = vcombine.low %v13015_v10, %v13022_v58  ;;  %v3170_v13 = vrot.slane %v10195_v44, %v12719_v37  ;;  %v2377_v30 = vcombine.high %v10104_v11, %v10104_v11  ;;  %v13075_v44 = vrot.slane %v10104_v11, %v12719_v37  ;;  %v619_v11 = vld [vmem:[%s12698_s17 + $0x1] sm:$0xff] }
  0x94   : > { %11095 = vmatmul.mubr.f32.gmra.mrb[14].mxu0 %v3047_v57  ;;  %v3117_v57 = vcombine.low %v3100_v2, %v3114_v3  ;;  %16761 = vst [vmem:[#allocation37_spill] sm:$0xff] %v13047_v50  ;;  %v10121_v2 = vld.sshfl [vmem:[%s12698_s17 + $0xa2] sm:$0x3 pattern:$0x76325410]  ;;  %v3184_v21 = vrot.slane %v10197_v39, %v12719_v37  ;;  %v10105_v39 = vld [vmem:[%s12698_s17 + $0xb2] sm:$0xff] }
  0x95   : > { %11607 = vmatpush1.bf16.msra.mxu0 %v11606_v49  ;;  %11097 = vmatprep.mubr.msk.f32.mxu0 %vm12383_vm0, %v16755_v20  ;;  %v2357_v49 = vcombine.low %v13019_v18, %v13025_v26  ;;  %v1649_v3 = vld [vmem:[%s16635_s1 + $0xa0] sm:$0xff]  ;;  %v2374_v8 = vcombine.low %v13047_v50, %v10121_v2  ;;  %v620_v50 = vld [vmem:[%s12698_s17 + $0x9] sm:$0xff] }
  0x96   : > { %11608 = vmatprep.subr.bf16.mxu0 %v16752_v17 }
  0x97   : > { %v10201_v14 = vcombine.high %v13022_v58, %v2357_v49  ;;  %v10203_v2 = vcombine.high %v13025_v26, %v2374_v8  ;;  %v1654_v8 = vld [vmem:[%s16635_s1 + $0xc8] sm:$0xff] }
  0x98   : > { %11098 = vmatmul.mubr.f32.gmra.mrb[16].mxu0 %v3082_v6  ;;  %v1650_v6 = vld [vmem:[%s16635_s1 + $0xa8] sm:$0xff] }
  0x99   : > { %11610 = vmatpush1.bf16.msra.mxu0 %v11609_v33  ;;  %11100 = vmatprep.mubr.msk.f32.mxu0 %vm12383_vm0, %v16755_v20  ;;  %v10199_v33 = vcombine.high %v12986_v42, %v2355_v45  ;;  %v11615_v15 = vpack.c.bf16 %v1650_v6, %v1649_v3  ;;  %v3187_v45 = vcombine.low %v3170_v13, %v3184_v21  ;;  %v13082_v3 = vld.sshfl [vmem:[%s12698_s17 + $0xc2] sm:$0xff pattern:$0x76325410]  ;;  %v592_v13 = vld [vmem:[%s12698_s17 + $0x18] sm:$0xff] }
  0x9a   : > { %11611 = vmatprep.subr.bf16.mxu0 %v16752_v17  ;;  %16762 = vst [vmem:[#allocation38_spill] sm:$0xff] %v13082_v3  ;;  %v622_v21 = vld [vmem:[%s12698_s17 + $0x19] sm:$0xff]  ;;  %v3240_v58 = vrot.slane %v10203_v2, %v12719_v37  ;;  %v3254_v42 = vrot.slane %v13075_v44, %v12719_v37 }
  0x9b   : > { %v3205_v49 = vrot.slane %v10199_v33, %v12719_v37  ;;  %v13099_v33 = vrot.slane %v10105_v39, %v12719_v37  ;;  %v856_v54 = vcombine.high %v592_v13, %v622_v21 }
  0x9c   : > { %11101 = vmatmul.mubr.f32.gmra.mrb[18].mxu0 %v3117_v57  ;;  %v1651_v57 = vld [vmem:[%s16635_s1 + $0xb0] sm:$0xff]  ;;  %v3257_v1 = vcombine.low %v3240_v58, %v3254_v42  ;;  %v1657_v42 = vld [vmem:[%s16635_s1 + $0xe0] sm:$0xff] }
  0x9d   : > { %11613 = vmatpush1.bf16.msra.mxu0 %v11612_v59  ;;  %11103 = vmatprep.mubr.msk.f32.mxu0 %vm12383_vm0, %v16755_v20  ;;  %v3219_v59 = vrot.slane %v10201_v14, %v12719_v37  ;;  %v11618_v6 = vpack.c.bf16 %v1652_v24, %v1651_v57  ;;  %16764 = vst [vmem:[#allocation40_spill] sm:$0xff] %v13099_v33  ;;  %v589_v14 = vld [vmem:[%s12698_s17] sm:$0xff]  ;;  %v590_v24 = vld [vmem:[%s12698_s17 + $0x8] sm:$0xff] }
  0x9e   : > { %11614 = vmatprep.subr.bf16.mxu0 %v16752_v17  ;;  %v2412_v57 = vcombine.high %v10105_v39, %v10105_v39  ;;  %v769_v12 = vcombine.low %v589_v14, %v619_v11  ;;  %v770_v35 = vcombine.high %v589_v14, %v619_v11  ;;  %v3289_v2 = vrot.slane %v13099_v33, %v12719_v37 }
  0x9f   : > { %v3222_v26 = vcombine.low %v3205_v49, %v3219_v59  ;;  %v1656_v49 = vld [vmem:[%s16635_s1 + $0xd8] sm:$0xff]  ;;  %v805_v14 = vcombine.high %v590_v24, %v620_v50  ;;  %v890_v11 = vcombine.low %v593_v48, %v623_v38 }
  0xa0   : > { %11104 = vmatmul.mubr.f32.gmra.mrb[20].mxu0 %v3152_v9  ;;  %v1653_v9 = vld [vmem:[%s16635_s1 + $0xc0] sm:$0xff]  ;;  %v778_v33 = vrot.slane %v769_v12, %v12719_v37 }
  0xa1   : > { %11616 = vmatpush1.bf16.msra.mxu0 %v11615_v15  ;;  %11106 = vmatprep.mubr.msk.f32.mxu0 %vm12383_vm0, %v16755_v20  ;;  %v13096_v15 = vrot.slane %v2377_v30, %v12719_v37  ;;  %v855_v30 = vcombine.low %v592_v13, %v622_v21  ;;  %v11621_v39 = vpack.c.bf16 %v1654_v8, %v1653_v9 }
  0xa2   : > { %11617 = vmatprep.subr.bf16.mxu0 %v16752_v17  ;;  %v13127_v9 = vrot.slane %v2412_v57, %v12719_v37  ;;  %v10205_v8 = vcombine.low %v10122_v56, %v13082_v3  ;;  %v785_v57 = vrot.slane %v770_v35, %v12719_v37  ;;  %v820_v12 = vrot.slane %v805_v14, %v12719_v37  ;;  %v598_v3 = vld [vmem:[%s12698_s17 + $0x48] sm:$0xff] }
  0xa3   : > { %16763 = vst [vmem:[#allocation39_spill] sm:$0xff] %v13096_v15  ;;  %v3275_v59 = vrot.slane %v13096_v15, %v12719_v37  ;;  %v864_v5 = vrot.slane %v855_v30, %v12719_v37  ;;  %v13147_v35 = vrot.slane %v890_v11, %v12719_v37  ;;  %v846_v13 = vrot.slane %v839_v62, %v12719_v37 }
  0xa4   : > { %11107 = vmatmul.mubr.f32.gmra.mrb[22].mxu0 %v3187_v45  ;;  %v1655_v45 = vld [vmem:[%s16635_s1 + $0xd0] sm:$0xff]  ;;  %16765 = vst [vmem:[#allocation41_spill] sm:$0xff] %v13127_v9  ;;  %v3310_v58 = vrot.slane %v13127_v9, %v12719_v37  ;;  %v13152_v21 = vrot.slane %v856_v54, %v12719_v37  ;;  %v4008_v30 = vrot.slane %v785_v57, %v12719_v37  ;;  %v1660_v54 = vld [vmem:[%s16635_s1 + $0xf8] sm:$0xff] }
  0xa5   : > { %11619 = vmatpush1.bf16.msra.mxu0 %v11618_v6  ;;  %11109 = vmatprep.mubr.msk.f32.mxu0 %vm12383_vm0, %v16755_v20  ;;  %v804_v6 = vcombine.low %v590_v24, %v620_v50  ;;  %v11624_v15 = vpack.c.bf16 %v1656_v49, %v1655_v45  ;;  %v3292_v56 = vcombine.low %v3275_v59, %v3289_v2  ;;  %v1661_v45 = vld [vmem:[%s16635_s1 + $0x100] sm:$0xff]  ;;  %v628_v9 = vld [vmem:[%s12698_s17 + $0x49] sm:$0xff] }
  0xa6   : > { %11620 = vmatprep.subr.bf16.mxu0 %v16752_v17  ;;  %v3324_v50 = vrot.slane %v10205_v8, %v12719_v37  ;;  %v887_v24 = vcombine.high %v864_v5, %v12737_v51  ;;  %v13178_v49 = vrot.slane %v820_v12, %v12719_v37  ;;  %v889_v59 = vcombine.high %v13152_v21, %v12740_v52  ;;  %v627_v51 = vld [vmem:[%s12698_s17 + $0x41] sm:$0x3] }
  0xa7   : > { %v813_v29 = vrot.slane %v804_v6, %v12719_v37  ;;  %v922_v6 = vcombine.high %v13147_v35, %v12761_v60  ;;  %v10224_v14 = vcombine.low %v846_v13, %v864_v5 }
  0xa8   : > { %11110 = vmatmul.mubr.f32.gmra.mrb[24].mxu0 %v3222_v26  ;;  %v891_v26 = vcombine.high %v593_v48, %v623_v38  ;;  %v11627_v38 = vpack.c.bf16 %v1658_v19, %v1657_v42  ;;  %v1659_v48 = vld [vmem:[%s16635_s1 + $0xf0] sm:$0xff]  ;;  %v3327_v8 = vcombine.low %v3310_v58, %v3324_v50  ;;  %v10226_v11 = vcombine.low %v887_v24, %v13152_v21 }
  0xa9   : > { %11622 = vmatpush1.bf16.msra.mxu0 %v11621_v39  ;;  %11112 = vmatprep.mubr.msk.f32.mxu0 %vm12383_vm0, %v16755_v20  ;;  %v13167_v62 = vrot.slane %v813_v29, %v12719_v37  ;;  %v624_v39 = vld [vmem:[%s12698_s17 + $0x29] sm:$0x3]  ;;  %v11630_v57 = vpack.c.bf16 %v1660_v54, %v1659_v48  ;;  %v597_v29 = vld [vmem:[%s12698_s17 + $0x40] sm:$0x3]  ;;  %v941_v50 = vcombine.low %v12705_v31, %v12708_v32 }
  0xaa   : > { %11623 = vmatprep.subr.bf16.mxu0 %v16752_v17  ;;  %v13183_v2 = vrot.slane %v891_v26, %v12719_v37  ;;  %v4064_v13 = vrot.slane %v10224_v14, %v12719_v37  ;;  %v4078_v24 = vrot.slane %v10226_v11, %v12719_v37  ;;  %v1011_v32 = vcombine.low %v597_v29, %v627_v51  ;;  %v1665_v29 = vld [vmem:[%s16635_s1 + $0x120] sm:$0xff] }
  0xab   : > { %v4052_v5 = vcombine.high %v13167_v62, %v13178_v49  ;;  %v1027_v54 = vcombine.low %v598_v3, %v628_v9 }
  0xac   : > { %11113 = vmatmul.mubr.f32.gmra.mrb[26].mxu0 %v3257_v1  ;;  %v3994_v1 = vrot.slane %v778_v33, %v12719_v37  ;;  %v1662_v33 = vld [vmem:[%s16635_s1 + $0x108] sm:$0xff]  ;;  %v10230_v58 = vcombine.low %v922_v6, %v13183_v2  ;;  %v924_v48 = vcombine.high %v13183_v2, %v12764_v61  ;;  %v950_v6 = vrot.slane %v941_v50, %v12719_v37 }
  0xad   : > { %11625 = vmatpush1.bf16.msra.mxu0 %v11624_v15  ;;  %11115 = vmatprep.mubr.msk.f32.mxu0 %vm12383_vm0, %v16755_v20  ;;  %v594_v15 = vld [vmem:[%s12698_s17 + $0x28] sm:$0x3]  ;;  %v11633_v26 = vpack.c.bf16 %v1662_v33, %v1661_v45  ;;  %v4051_v45 = vcombine.low %v13167_v62, %v13178_v49  ;;  %v4087_v14 = vcombine.high %v4064_v13, %v4078_v24 }
  0xae   : > { %11626 = vmatprep.subr.bf16.mxu0 %v16752_v17  ;;  %v4017_v42 = vcombine.high %v3994_v1, %v4008_v30  ;;  %v925_v19 = vcombine.low %v594_v15, %v624_v39  ;;  %v4016_v12 = vcombine.low %v3994_v1, %v4008_v30  ;;  %v1028_v1 = vcombine.high %v598_v3, %v628_v9  ;;  %v1664_v30 = vld [vmem:[%s16635_s1 + $0x118] sm:$0xff]  ;;  %v599_v15 = vld [vmem:[%s12698_s17 + $0x50] sm:$0xff] }
  0xaf   : > { %v629_v39 = vld [vmem:[%s12698_s17 + $0x51] sm:$0xff]  ;;  %v1018_v49 = vrot.slane %v1011_v32, %v12719_v37  ;;  %v13254_v32 = vrot.slane %v12743_v53, %v12719_v37 }
  0xb0   : > { %11116 = vmatmul.mubr.f32.gmra.mrb[28].mxu0 %v3292_v56  ;;  %v10228_v56 = vcombine.low %v889_v59, %v13147_v35  ;;  %v13212_v31 = vrot.slane %v925_v19, %v12719_v37  ;;  %v4113_v59 = vrot.slane %v10230_v58, %v12719_v37  ;;  %v13223_v51 = vrot.slane %v1028_v1, %v12719_v37  ;;  %v600_v9 = vld [vmem:[%s12698_s17 + $0x58] sm:$0x3] }
  0xb1   : > { %11628 = vmatpush1.bf16.msra.mxu0 %v11627_v38  ;;  %11118 = vmatprep.mubr.msk.f32.mxu0 %vm12383_vm0, %v16755_v20  ;;  %v1663_v38 = vld [vmem:[%s16635_s1 + $0x110] sm:$0xff]  ;;  %v1062_v3 = vcombine.low %v599_v15, %v629_v39  ;;  %v4086_v19 = vcombine.low %v4064_v13, %v4078_v24 }
  0xb2   : > { %11629 = vmatprep.subr.bf16.mxu0 %v16752_v17  ;;  %v4099_v33 = vrot.slane %v10228_v56, %v12719_v37  ;;  %v11636_v11 = vpack.c.bf16 %v1664_v30, %v1663_v38  ;;  %v10232_v62 = vcombine.low %v924_v48, %v13212_v31  ;;  %v1061_v13 = vcombine.high %v13223_v51, %v12871_v22 }
  0xb3   : > { %v13247_v24 = vrot.slane %v1062_v3, %v12719_v37  ;;  %v1113_v38 = vcombine.low %v12828_v41, %v12837_v46  ;;  %v1667_v41 = vld [vmem:[%s16635_s1 + $0x130] sm:$0xff]  ;;  %v1668_v46 = vld [vmem:[%s16635_s1 + $0x138] sm:$0xff] }
  0xb4   : > { %11119 = vmatmul.mubr.f32.gmra.mrb[30].mxu0 %v3327_v8  ;;  %v1063_v8 = vcombine.high %v599_v15, %v629_v39  ;;  %v4122_v56 = vcombine.high %v4099_v33, %v4113_v59  ;;  %v4134_v48 = vrot.slane %v10232_v62, %v12719_v37  ;;  %v13269_v15 = vrot.slane %v12773_v0, %v12719_v37 }
  0xb5   : > { %11631 = vmatpush1.bf16.msra.mxu0 %v11630_v57  ;;  %4904 = vmatprep.mubr.f32.mxu0 %v4017_v42  ;;  %v630_v57 = vld [vmem:[%s12698_s17 + $0x59] sm:$0x3]  ;;  %v1036_v42 = vrot.slane %v1027_v54, %v12719_v37  ;;  %v13258_v54 = vrot.slane %v12770_v63, %v12719_v37  ;;  %v1094_v39 = vcombine.high %v13247_v24, %v12860_v16 }
  0xb6   : > { %11632 = vmatprep.subr.bf16.mxu0 %v16752_v17  ;;  %v1097_v58 = vcombine.low %v600_v9, %v630_v57  ;;  %v1122_v3 = vrot.slane %v1113_v38, %v12719_v37  ;;  %v11642_v62 = vpack.c.bf16 %v1668_v46, %v1667_v41  ;;  %v604_v38 = vld [vmem:[%s12698_s17 + $0x78] sm:$0xff]  ;;  %v605_v41 = vld [vmem:[%s12698_s17 + $0x80] sm:$0xff] }
  0xb7   : > { %v1059_v50 = vcombine.high %v1036_v42, %v12833_v43  ;;  %v10234_v1 = vcombine.low %v1018_v49, %v1036_v42  ;;  %v4192_v42 = vcombine.high %v13254_v32, %v13258_v54 }
  0xb8   : > { %4905 = vmatmul.mubr.f32.vlgmr.msra.gmra.mrb[0].mxu0 %v4016_v12  ;;  %v1666_v12 = vld [vmem:[%s16635_s1 + $0x128] sm:$0xff] }
  0xb9   : > { %11634 = vmatpush3.bf16.msra.mxu0 %v11633_v26  ;;  %4909 = vmatprep.mubr.f32.mxu0 %v4052_v5  ;;  %v13238_v26 = vrot.slane %v950_v6, %v12719_v37  ;;  %v13241_v5 = vrot.slane %v1063_v8, %v12719_v37  ;;  %v11639_v30 = vpack.c.bf16 %v1666_v12, %v1665_v29  ;;  %v603_v12 = vld [vmem:[%s12698_s17 + $0x70] sm:$0x3] }
  0xba   : > { %11635 = vmatprep.subr.bf16.mxu0 %v16752_v17  ;;  %v13276_v6 = vrot.slane %v1097_v58, %v12719_v37  ;;  %v4121_v8 = vcombine.low %v4099_v33, %v4113_v59  ;;  %v13283_v57 = vrot.slane %v10234_v1, %v12719_v37  ;;  %v1669_v33 = vld [vmem:[%s16635_s1 + $0x140] sm:$0xff]  ;;  %v1670_v59 = vld [vmem:[%s16635_s1 + $0x148] sm:$0xff]  ;;  %v4191_v1 = vcombine.low %v13254_v32, %v13258_v54 }
  0xbb   : > { %v4157_v9 = vcombine.high %v4134_v48, %v13238_v26  ;;  %v4156_v49 = vcombine.low %v4134_v48, %v13238_v26  ;;  %v13306_v26 = vrot.slane %v1122_v3, %v12719_v37  ;;  %v634_v48 = vld [vmem:[%s12698_s17 + $0x79] sm:$0xff]  ;;  %v11645_v46 = vpack.c.bf16 %v1670_v59, %v1669_v33  ;;  %v635_v54 = vld [vmem:[%s12698_s17 + $0x81] sm:$0xff] }
  0xbc   : > { %4910 = vmatmul.mubr.f32.gmra.mrb[2].mxu0 %v4051_v45  ;;  %v1096_v45 = vcombine.high %v13241_v5, %v12910_v55  ;;  %v1673_v59 = vld [vmem:[%s16635_s1 + $0x160] sm:$0xff]  ;;  %v1674_v33 = vld [vmem:[%s16635_s1 + $0x168] sm:$0xff] }
  0xbd   : > { %4914 = vmatprep.mubr.f32.mxu0 %v4087_v14  ;;  %11637 = vmatpush3.bf16.msra.mxu0 %v11636_v11  ;;  %v10236_v14 = vcombine.low %v1059_v50, %v13223_v51  ;;  %v10238_v11 = vcombine.low %v1061_v13, %v13247_v24  ;;  %v13310_v13 = vrot.slane %v12878_v34, %v12719_v37 }
  0xbe   : > { %11638 = vmatprep.subr.bf16.mxu0 %v16752_v17  ;;  %v10242_v29 = vcombine.low %v1096_v45, %v13276_v6  ;;  %v13323_v45 = vrot.slane %v12884_v36, %v12719_v37  ;;  %v1235_v36 = vcombine.high %v605_v41, %v635_v54 }
  0xbf   : > { %v13300_v58 = vrot.slane %v10236_v14, %v12719_v37  ;;  %v13303_v50 = vrot.slane %v10238_v11, %v12719_v37  ;;  %v1671_v14 = vld [vmem:[%s16635_s1 + $0x150] sm:$0xff] }
  0xc0   : > { %4915 = vmatmul.mubr.f32.gmra.mrb[4].mxu0 %v4086_v19  ;;  %v10240_v19 = vcombine.low %v1094_v39, %v13241_v5  ;;  %v4226_v39 = vcombine.low %v13269_v15, %v13283_v57  ;;  %v13341_v3 = vrot.slane %v10242_v29, %v12719_v37  ;;  %v923_v29 = vcombine.low %v13183_v2, %v12764_v61 }
  0xc1   : > { %4919 = vmatprep.mubr.f32.mxu0 %v4122_v56  ;;  %11640 = vmatpush3.bf16.msra.mxu0 %v11639_v30  ;;  %v633_v56 = vld [vmem:[%s12698_s17 + $0x71] sm:$0x3]  ;;  %v4227_v30 = vcombine.high %v13269_v15, %v13283_v57  ;;  %v1672_v15 = vld [vmem:[%s16635_s1 + $0x158] sm:$0xff]  ;;  %v921_v57 = vcombine.low %v13147_v35, %v12761_v60  ;;  %v1234_v35 = vcombine.low %v605_v41, %v635_v54 }
  0xc2   : > { %11641 = vmatprep.subr.bf16.mxu0 %v16752_v17  ;;  %v1183_v32 = vcombine.low %v603_v12, %v633_v56  ;;  %v13338_v11 = vrot.slane %v10240_v19, %v12719_v37  ;;  %v606_v12 = vld [vmem:[%s12698_s17 + $0x88] sm:$0x3] }
  0xc3   : > { %v636_v19 = vld [vmem:[%s12698_s17 + $0x89] sm:$0x3]  ;;  %v10229_v2 = vcombine.high %v12740_v52, %v921_v57  ;;  %v13379_v57 = vrot.slane %v1234_v35, %v12719_v37  ;;  %v1093_v35 = vcombine.low %v13247_v24, %v12860_v16 }
  0xc4   : > { %4920 = vmatmul.mubr.f32.gmra.mrb[6].mxu0 %v4121_v8  ;;  %v13327_v8 = vrot.slane %v12900_v47, %v12719_v37  ;;  %v1200_v47 = vcombine.high %v604_v38, %v634_v48  ;;  %v1269_v41 = vcombine.low %v606_v12, %v636_v19  ;;  %v4296_v54 = vcombine.low %v13338_v11, %v13341_v3 }
  0xc5   : > { %4924 = vmatprep.mubr.f32.mxu0 %v4157_v9  ;;  %11643 = vmatpush3.bf16.msra.mxu0 %v11642_v62  ;;  %v1199_v9 = vcombine.low %v604_v38, %v634_v48  ;;  %v4262_v62 = vcombine.high %v13300_v58, %v13303_v50  ;;  %v11651_v12 = vpack.c.bf16 %v1674_v33, %v1673_v59  ;;  %v609_v59 = vld [vmem:[%s12698_s17 + $0xa0] sm:$0x3] }
  0xc6   : > { %11644 = vmatprep.subr.bf16.mxu0 %v16752_v17  ;;  %v13385_v19 = vrot.slane %v1200_v47, %v12719_v37  ;;  %v1676_v47 = vld [vmem:[%s16635_s1 + $0x178] sm:$0xff]  ;;  %v13406_v33 = vrot.slane %v1269_v41, %v12719_v37  ;;  %v1095_v41 = vcombine.low %v13241_v5, %v12910_v55 }
  0xc7   : > { %v13371_v48 = vrot.slane %v1199_v9, %v12719_v37  ;;  %v1285_v9 = vcombine.low %v12940_v27, %v12943_v28  ;;  %v1675_v27 = vld [vmem:[%s16635_s1 + $0x170] sm:$0xff] }
  0xc8   : > { %4925 = vmatmul.mubr.f32.gmra.mrb[8].mxu0 %v4156_v49  ;;  %v11648_v49 = vpack.c.bf16 %v1672_v15, %v1671_v14  ;;  %v1190_v14 = vrot.slane %v1183_v32, %v12719_v37  ;;  %v4106_v15 = vrot.slane %v10229_v2, %v12719_v37  ;;  %v13388_v32 = vrot.slane %v1235_v36, %v12719_v37 }
  0xc9   : > { %4929 = vmatprep.mubr.f32.mxu0 %v4192_v42  ;;  %11646 = vmatpush3.bf16.msra.mxu0 %v11645_v46  ;;  %v10231_v42 = vcombine.high %v12761_v60, %v923_v29  ;;  %v4297_v46 = vcombine.high %v13338_v11, %v13341_v3  ;;  %v1231_v36 = vcombine.high %v13371_v48, %v12976_v23  ;;  %v13567_v3 = vld [vmem:[%s12698_s17 + $0xc0] sm:$0xff] }
  0xca   : > { %11647 = vmatprep.subr.bf16.mxu0 %v16752_v17  ;;  %v1060_v29 = vcombine.low %v13223_v51, %v12871_v22  ;;  %v1233_v2 = vcombine.high %v13385_v19, %v12979_v25  ;;  %v1266_v51 = vcombine.high %v13379_v57, %v13004_v7  ;;  %v11654_v24 = vpack.c.bf16 %v1676_v47, %v1675_v27 }
  0xcb   : > { %v4120_v60 = vrot.slane %v10231_v42, %v12719_v37  ;;  %v610_v42 = vld [vmem:[%s12698_s17 + $0xa8] sm:$0xff]  ;;  %v10241_v56 = vcombine.high %v12860_v16, %v1095_v41  ;;  %v16766_v27 = vcombine.low %v13300_v58, %v13303_v50  ;;  %v1294_v47 = vrot.slane %v1285_v9, %v12719_v37  ;;  %v611_v9 = vld [vmem:[%s12698_s17 + $0xb0] sm:$0xff] }
  0xcc   : > { %4930 = vmatmul.mubr.f32.gmra.mrb[10].mxu0 %v4191_v1  ;;  %v10019_v1 = vld.sshfl [vmem:[%s12698_s17 + $0x5a] sm:$0x3 pattern:$0x76325410]  ;;  %v4366_v58 = vcombine.low %v13323_v45, %v13327_v8 }
  0xcd   : > { %4934 = vmatprep.mubr.f32.mxu0 %v4227_v30  ;;  %11649 = vmatpush3.bf16.msra.mxu0 %v11648_v49  ;;  %v13392_v30 = vrot.slane %v12983_v40, %v12719_v37  ;;  %v13401_v28 = vcombine.low %v4106_v15, %v4120_v60  ;;  %v10244_v49 = vcombine.low %v1190_v14, %v13371_v48  ;;  %v639_v15 = vld [vmem:[%s12698_s17 + $0xa1] sm:$0x3]  ;;  %v640_v60 = vld [vmem:[%s12698_s17 + $0xa9] sm:$0xff] }
  0xce   : > { %11650 = vmatprep.subr.bf16.mxu0 %v16752_v17  ;;  %v1112_v38 = vcombine.low %v13276_v6, %v10019_v1  ;;  %v1268_v48 = vcombine.high %v13388_v32, %v13007_v4  ;;  %v10239_v14 = vcombine.high %v12871_v22, %v1093_v35  ;;  %v10246_v6 = vcombine.low %v1231_v36, %v13385_v19 }
  0xcf   : > { %v4281_v16 = vrot.slane %v10241_v56, %v12719_v37  ;;  %v10250_v36 = vcombine.low %v1266_v51, %v13388_v32  ;;  %v13457_v35 = vrot.slane %v10244_v49, %v12719_v37  ;;  %v13468_v51 = vrot.slane %v1294_v47, %v12719_v37 }
  0xd0   : > { %4935 = vmatmul.mubr.f32.gmra.mrb[12].mxu0 %v4226_v39  ;;  %v10237_v39 = vcombine.high %v12833_v43, %v1060_v29  ;;  %v10243_v5 = vcombine.high %v12910_v55, %v1112_v38  ;;  %v4260_v22 = vrot.slane %v10239_v14, %v12719_v37  ;;  %v10248_v38 = vcombine.low %v1233_v2, %v13379_v57  ;;  %v641_v29 = vld [vmem:[%s12698_s17 + $0xb1] sm:$0xff] }
  0xd1   : > { %4939 = vmatprep.mubr.f32.mxu0 %v4262_v62  ;;  %11652 = vmatpush3.bf16.msra.mxu0 %v11651_v12  ;;  %v1355_v62 = vcombine.low %v609_v59, %v639_v15  ;;  %v1371_v12 = vcombine.low %v610_v42, %v640_v60  ;;  %v13444_v59 = vrot.slane %v13015_v10, %v12719_v37 }
  0xd2   : > { %11653 = vmatprep.subr.bf16.mxu0 %v16752_v17  ;;  %v4246_v1 = vrot.slane %v10237_v39, %v12719_v37  ;;  %v4295_v55 = vrot.slane %v10243_v5, %v12719_v37  ;;  %v10252_v50 = vcombine.low %v1268_v48, %v13406_v33  ;;  %v13460_v2 = vrot.slane %v10246_v6, %v12719_v37 }
  0xd3   : > { %v1362_v15 = vrot.slane %v1355_v62, %v12719_v37  ;;  %v1380_v41 = vrot.slane %v1371_v12, %v12719_v37  ;;  %v1265_v39 = vcombine.low %v13379_v57, %v13004_v7  ;;  %v1267_v49 = vcombine.low %v13388_v32, %v13007_v4 }
  0xd4   : > { %4940 = vmatmul.mubr.f32.gmra.mrb[14].mxu0 %v16766_v27  ;;  %v13452_v56 = vcombine.low %v4246_v1, %v4260_v22  ;;  %v16769_v48 = vcombine.high %v13306_v26, %v13310_v13  ;;  %v13478_v14 = vrot.slane %v10248_v38, %v12719_v37  ;;  %v13481_v11 = vrot.slane %v10250_v36, %v12719_v37 }
  0xd5   : > { %4944 = vmatprep.mubr.f32.mxu0 %v4297_v46  ;;  %11655 = vmatpush3.bf16.msra.mxu0 %v11654_v24  ;;  %v13454_v46 = vcombine.low %v4281_v16, %v4295_v55  ;;  %v1372_v24 = vcombine.high %v610_v42, %v640_v60  ;;  %v612_v42 = vld [vmem:[%s12698_s17 + $0xb8] sm:$0x3]  ;;  %v13488_v57 = vrot.slane %v10252_v50, %v12719_v37 }
  0xd6   : > { %11656 = vmatprep.subr.bf16.mxu0 %v16752_v17  ;;  %16767 = vst [vmem:[#allocation42_spill] sm:$0xff] %v13452_v56  ;;  %v642_v60 = vld [vmem:[%s12698_s17 + $0xb9] sm:$0x3]  ;;  %v10249_v5 = vcombine.high %v12979_v25, %v1265_v39  ;;  %v10251_v6 = vcombine.high %v13004_v7, %v1267_v49  ;;  %v4402_v62 = vcombine.high %v13457_v35, %v13460_v2  ;;  %v647_v39 = vld [vmem:[%s12698_s17 + $0xe1] sm:$0xff] }
  0xd7   : > { %16768 = vst [vmem:[#allocation43_spill] sm:$0xff] %v13454_v46  ;;  %v10254_v12 = vcombine.low %v1362_v15, %v1380_v41  ;;  %v13498_v1 = vrot.slane %v13019_v18, %v12719_v37  ;;  %v1407_v27 = vcombine.high %v611_v9, %v641_v29  ;;  %v16770_v47 = vcombine.low %v13306_v26, %v13310_v13  ;;  %v13535_v15 = vld [vmem:[%s12698_s17 + $0xd9] sm:$0xff]  ;;  %v648_v46 = vld [vmem:[%s12698_s17 + $0xe9] sm:$0x3] }
  0xd8   : > { %4945 = vmatmul.mubr.f32.gmra.mrb[16].mxu0 %v4296_v54  ;;  %v1406_v54 = vcombine.low %v611_v9, %v641_v29  ;;  %v13504_v22 = vrot.slane %v1372_v24, %v12719_v37  ;;  %v1441_v16 = vcombine.low %v612_v42, %v642_v60  ;;  %v4421_v7 = vrot.slane %v10249_v5, %v12719_v37  ;;  %v13521_v9 = vld [vmem:[%s12698_s17 + $0xd8] sm:$0xff]  ;;  %v617_v24 = vld [vmem:[%s12698_s17 + $0xe0] sm:$0xff]  ;;  %v16773_v42 = vld [vmem:[#allocation39_spill] sm:$0xff] }
  0xd9   : > { %4949 = vmatprep.mubr.f32.mxu0 %v16769_v48  ;;  %v4435_v55 = vrot.slane %v10251_v6, %v12719_v37  ;;  %v16771_v38 = vcombine.high %v13323_v45, %v13327_v8  ;;  %v4401_v36 = vcombine.low %v13457_v35, %v13460_v2  ;;  %v4437_v26 = vcombine.high %v13478_v14, %v13481_v11  ;;  %v10126_v45 = vld [vmem:[%s16635_s1 + $0x180] sm:$0xff]  ;;  %v10127_v8 = vld [vmem:[%s16635_s1 + $0x188] sm:$0xff]  ;;  %v16774_v5 = vld [vmem:[#allocation40_spill] sm:$0xff] }
  0xda   : > { %v13518_v50 = vrot.slane %v1406_v54, %v12719_v37  ;;  %v1403_v2 = vcombine.high %v1380_v41, %v13075_v44  ;;  %v13542_v48 = vrot.slane %v10254_v12, %v12719_v37  ;;  %v13545_v54 = vrot.slane %v1407_v27, %v12719_v37  ;;  %v10023_v6 = vld.sshfl [vmem:[%s12698_s17 + $0xba] sm:$0x3 pattern:$0x76325410]  ;;  %v13570_v35 = vld [vmem:[%s12698_s17 + $0xc1] sm:$0xff] }
  0xdb   : > { %v13539_v49 = vcombine.low %v4421_v7, %v4435_v55  ;;  %v1404_v60 = vcombine.low %v13504_v22, %v16773_v42  ;;  %v10129_v7 = vld [vmem:[%s16635_s1 + $0x198] sm:$0xff]  ;;  %v1405_v12 = vcombine.high %v13504_v22, %v16773_v42  ;;  %v13561_v27 = vrot.slane %v1441_v16, %v12719_v37 }
  0xdc   : > { %4950 = vmatmul.mubr.f32.gmra.mrb[18].mxu0 %v16770_v47  ;;  %v1437_v41 = vcombine.low %v13518_v50, %v16774_v5  ;;  %v10128_v47 = vld [vmem:[%s16635_s1 + $0x190] sm:$0xff]  ;;  %v676_v55 = vld [vmem:[%s12698_s17 + $0xda] sm:$0xff]  ;;  %v11513_v32 = vpack.c.bf16 %v10127_v8, %v10126_v45  ;;  %v10256_v10 = vcombine.low %v1403_v2, %v13504_v22  ;;  %v1578_v40 = vcombine.low %v617_v24, %v647_v39  ;;  %v677_v8 = vld [vmem:[%s12698_s17 + $0xe2] sm:$0xff] }
  0xdd   : > { %4954 = vmatprep.mubr.f32.mxu0 %v16771_v38  ;;  %16772 = vst [vmem:[#allocation44_spill] sm:$0xff] %v13539_v49  ;;  %v1544_v38 = vcombine.high %v13521_v9, %v13535_v15  ;;  %v1545_v29 = vcombine.high %v676_v55, %v676_v55  ;;  %v16775_v18 = vld [vmem:[#allocation41_spill] sm:$0xff]  ;;  %v618_v49 = vld [vmem:[%s12698_s17 + $0xe8] sm:$0x3]  ;;  %v11516_v45 = vpack.c.bf16 %v10129_v7, %v10128_v47  ;;  %v10130_v22 = vld [vmem:[%s16635_s1 + $0x1a0] sm:$0xff] }
  0xde   : > { %v10259_v13 = vcombine.high %v16773_v42, %v1437_v41  ;;  %v1439_v16 = vcombine.low %v13545_v54, %v16775_v18  ;;  %11514 = vmatpush1.bf16.msra.mxu1 %v11513_v32  ;;  %v1579_v34 = vcombine.high %v617_v24, %v647_v39  ;;  %v10131_v32 = vld [vmem:[%s16635_s1 + $0x1a8] sm:$0xff]  ;;  %v615_v2 = vld [vmem:[%s12698_s17 + $0xd0] sm:$0x3] }
  0xdf   : > { %11515 = vmatprep.subr.bf16.mxu1 %v16752_v17  ;;  %v13594_v24 = vrot.slane %v1544_v38, %v12719_v37  ;;  %v13598_v41 = vrot.slane %v1545_v29, %v12719_v37  ;;  %v10132_v29 = vld [vmem:[%s16635_s1 + $0x1b0] sm:$0xff] }
  0xe0   : > { %4955 = vmatmul.mubr.f32.gmra.mrb[20].mxu0 %v4366_v58  ;;  %v10257_v58 = vcombine.high %v13075_v44, %v1404_v60  ;;  %v4575_v60 = vrot.slane %v10259_v13, %v12719_v37  ;;  %v10261_v42 = vcombine.high %v16774_v5, %v1439_v16  ;;  %v1580_v13 = vcombine.high %v677_v8, %v677_v8 }
  0xe1   : > { %4959 = vmatprep.mubr.f32.mxu0 %v4402_v62  ;;  %v1456_v62 = vcombine.low %v13561_v27, %v10023_v6  ;;  %v1613_v6 = vcombine.low %v618_v49, %v648_v46  ;;  %v13606_v16 = vrot.slane %v676_v55, %v12719_v37  ;;  %v13612_v46 = vrot.slane %v1578_v40, %v12719_v37  ;;  %v10133_v49 = vld [vmem:[%s16635_s1 + $0x1b8] sm:$0xff] }
  0xe2   : > { %v4561_v56 = vrot.slane %v10257_v58, %v12719_v37  ;;  %v4596_v7 = vrot.slane %v10261_v42, %v12719_v37  ;;  %v10024_v58 = vld.sshfl [vmem:[%s12698_s17 + $0xd2] sm:$0x3 pattern:$0x76325410]  ;;  %11517 = vmatpush1.bf16.msra.mxu1 %v11516_v45  ;;  %v16776_v40 = vcombine.low %v13478_v14, %v13481_v11  ;;  %v4542_v42 = vcombine.high %v13498_v1, %v13542_v48 }
  0xe3   : > { %v10263_v39 = vcombine.high %v16775_v18, %v1456_v62  ;;  %v11519_v62 = vpack.c.bf16 %v10131_v32, %v10130_v22  ;;  %11518 = vmatprep.subr.bf16.mxu1 %v16752_v17  ;;  %v10265_v55 = vcombine.low %v10024_v58, %v13606_v16  ;;  %v10025_v45 = vld.sshfl [vmem:[%s12698_s17 + $0xea] sm:$0x3 pattern:$0x76325410]  ;;  %v1440_v14 = vcombine.high %v13545_v54, %v16775_v18  ;;  %v10134_v58 = vld [vmem:[%s16635_s1 + $0x1c0] sm:$0xff] }
  0xe4   : > { %4960 = vmatmul.mubr.f32.gmra.mrb[22].mxu0 %v4401_v36  ;;  %v13600_v47 = vcombine.low %v4561_v56, %v4575_v60  ;;  %v10258_v36 = vcombine.low %v1405_v12, %v13518_v50  ;;  %v13615_v56 = vrot.slane %v1579_v34, %v12719_v37  ;;  %v1576_v12 = vcombine.low %v13594_v24, %v13598_v41 }
  0xe5   : > { %4964 = vmatprep.mubr.f32.mxu0 %v4437_v26  ;;  %v4610_v38 = vrot.slane %v10263_v39, %v12719_v37  ;;  %v1438_v26 = vcombine.high %v13518_v50, %v16774_v5  ;;  %v13630_v34 = vrot.slane %v677_v8, %v12719_v37  ;;  %v13633_v50 = vrot.slane %v1580_v13, %v12719_v37 }
  0xe6   : > { %v16778_v60 = vcombine.high %v13488_v57, %v13468_v51  ;;  %v13647_v11 = vrot.slane %v1613_v6, %v12719_v37  ;;  %v10267_v8 = vcombine.high %v13606_v16, %v1576_v12  ;;  %11520 = vmatpush1.bf16.msra.mxu1 %v11519_v62  ;;  %v11522_v22 = vpack.c.bf16 %v10133_v49, %v10132_v29  ;;  %v614_v12 = vld [vmem:[%s12698_s17 + $0xc8] sm:$0xff] }
  0xe7   : > { %v13635_v5 = vcombine.low %v4596_v7, %v4610_v38  ;;  %v4701_v32 = vrot.slane %v10265_v55, %v12719_v37  ;;  %v1609_v13 = vcombine.low %v13612_v46, %v13630_v34  ;;  %v1611_v39 = vcombine.low %v13615_v56, %v13633_v50  ;;  %11521 = vmatprep.subr.bf16.mxu1 %v16752_v17  ;;  %v10135_v38 = vld [vmem:[%s16635_s1 + $0x1c8] sm:$0xff] }
  0xe8   : > { %4965 = vmatmul.mubr.f32.gmra.mrb[24].mxu0 %v16776_v40  ;;  %v4554_v7 = vrot.slane %v10256_v10, %v12719_v37  ;;  %v1458_v18 = vcombine.high %v13567_v3, %v13570_v35  ;;  %v4715_v6 = vrot.slane %v10267_v8, %v12719_v37  ;;  %v1628_v62 = vcombine.low %v13647_v11, %v10025_v45  ;;  %v644_v40 = vld [vmem:[%s12698_s17 + $0xc9] sm:$0xff] }
  0xe9   : > { %16777 = vst [vmem:[#allocation39_spill] sm:$0xff] %v13635_v5  ;;  %4969 = vmatprep.mubr.f32.mxu0 %v16778_v60  ;;  %v16779_v10 = vcombine.low %v13488_v57, %v13468_v51  ;;  %v4568_v29 = vrot.slane %v10258_v36, %v12719_v37  ;;  %v10260_v49 = vcombine.low %v1438_v26, %v13545_v54  ;;  %v645_v5 = vld [vmem:[%s12698_s17 + $0xd1] sm:$0x3] }
  0xea   : > { %v10269_v55 = vcombine.high %v13598_v41, %v1609_v13  ;;  %v10271_v60 = vcombine.high %v13630_v34, %v1611_v39  ;;  %v16780_v8 = vcombine.high %v13392_v30, %v13444_v59  ;;  %v10262_v45 = vcombine.low %v1440_v14, %v13561_v27  ;;  %11523 = vmatpush1.bf16.msra.mxu1 %v11522_v22  ;;  %v10137_v22 = vld [vmem:[%s16635_s1 + $0x1d8] sm:$0xff] }
  0xeb   : > { %v1543_v51 = vcombine.low %v13521_v9, %v13535_v15  ;;  %v13684_v57 = vcombine.low %v4701_v32, %v4715_v6  ;;  %v13687_v54 = vcombine.high %v13633_v50, %v1628_v62  ;;  %v11525_v36 = vpack.c.bf16 %v10135_v38, %v10134_v58  ;;  %11524 = vmatprep.subr.bf16.mxu1 %v16752_v17  ;;  %v10136_v15 = vld [vmem:[%s16635_s1 + $0x1d0] sm:$0xff] }
  0xec   : > { %4970 = vmatmul.mubr.f32.gmra.mrb[26].mxu0 %v16779_v10  ;;  %v4736_v26 = vrot.slane %v10269_v55, %v12719_v37  ;;  %v4750_v13 = vrot.slane %v10271_v60, %v12719_v37  ;;  %v4541_v39 = vcombine.low %v13498_v1, %v13542_v48  ;;  %v16783_v27 = vcombine.low %v13567_v3, %v13570_v35 }
  0xed   : > { %4974 = vmatprep.mubr.f32.mxu0 %v16780_v8  ;;  %16781 = vst [vmem:[#allocation40_spill] sm:$0xff] %v13684_v57  ;;  %16782 = vst [vmem:[#allocation41_spill] sm:$0xff] %v13687_v54  ;;  %v1492_v9 = vcombine.low %v614_v12, %v644_v40  ;;  %v16784_v32 = vcombine.low %v13392_v30, %v13444_v59  ;;  %v1473_v1 = vrot.slane %v1458_v18, %v12719_v37  ;;  %v10138_v30 = vld [vmem:[%s16635_s1 + $0x1e0] sm:$0xff]  ;;  %v10139_v59 = vld [vmem:[%s16635_s1 + $0x1e8] sm:$0xff] }
  0xee   : > { %v1466_v14 = vrot.slane %v16783_v27, %v12719_v37  ;;  %v1493_v48 = vcombine.high %v614_v12, %v644_v40  ;;  %v1527_v3 = vcombine.low %v615_v2, %v645_v5  ;;  %v13708_v35 = vcombine.low %v4736_v26, %v4750_v13  ;;  %11526 = vmatpush1.bf16.msra.mxu1 %v11525_v36 }
  0xef   : > { %v4577_v6 = vcombine.high %v4554_v7, %v4568_v29  ;;  %v4589_v58 = vrot.slane %v10260_v49, %v12719_v37  ;;  %v4603_v38 = vrot.slane %v10262_v45, %v12719_v37  ;;  %v1552_v62 = vrot.slane %v1543_v51, %v12719_v37  ;;  %11527 = vmatprep.subr.bf16.mxu1 %v16752_v17 }
  0xf0   : > { %4975 = vmatmul.mubr.f32.gmra.mrb[28].mxu0 %v16784_v32  ;;  %16785 = vst [vmem:[#allocation45_spill] sm:$0xff] %v13708_v35  ;;  %v11528_v10 = vpack.c.bf16 %v10137_v22, %v10136_v15  ;;  %v4576_v2 = vcombine.low %v4554_v7, %v4568_v29  ;;  %v1501_v5 = vrot.slane %v1492_v9, %v12719_v37  ;;  %v10140_v7 = vld [vmem:[%s16635_s1 + $0x1f0] sm:$0xff]  ;;  %v10141_v29 = vld [vmem:[%s16635_s1 + $0x1f8] sm:$0xff]  ;;  %v10142_v15 = vld [vmem:[%s16635_s1 + $0x200] sm:$0xff] }
  0xf1   : > { %4979 = vmatprep.mubr.f32.mxu0 %v4542_v42  ;;  %v1508_v42 = vrot.slane %v1493_v48, %v12719_v37  ;;  %v1534_v18 = vrot.slane %v1527_v3, %v12719_v37  ;;  %v4612_v49 = vcombine.high %v4589_v58, %v4603_v38  ;;  %v4624_v12 = vrot.slane %v1466_v14, %v12719_v37  ;;  %v10143_v22 = vld [vmem:[%s16635_s1 + $0x208] sm:$0xff] }
  0xf2   : > { %v4638_v40 = vrot.slane %v1473_v1, %v12719_v37  ;;  %v1575_v55 = vcombine.high %v1552_v62, %v13606_v16  ;;  %11529 = vmatpush1.bf16.msra.mxu1 %v11528_v10  ;;  %v11531_v60 = vpack.c.bf16 %v10139_v59, %v10138_v30  ;;  %v4611_v8 = vcombine.low %v4589_v58, %v4603_v38  ;;  %v649_v16 = vld [vmem:[%s12698_s17 + $0x2] sm:$0xff]  ;;  %v10144_v10 = vld [vmem:[%s16635_s1 + $0x210] sm:$0xff] }
  0xf3   : > { %11530 = vmatprep.subr.bf16.mxu1 %v16752_v17  ;;  %v4659_v45 = vrot.slane %v1501_v5, %v12719_v37  ;;  %v4673_v51 = vrot.slane %v1508_v42, %v12719_v37  ;;  %v10264_v36 = vcombine.low %v1534_v18, %v1552_v62  ;;  %v1610_v27 = vcombine.high %v13612_v46, %v13630_v34  ;;  %v650_v62 = vld [vmem:[%s12698_s17 + $0xa] sm:$0xff]  ;;  %v13775_v42 = vld [vmem:[%s16635_s1 + $0x300] sm:$0xff] }
  0xf4   : > { %4980 = vmatmul.mubr.f32.gmra.mrb[30].mxu0 %v4541_v39  ;;  %v4647_v26 = vcombine.high %v4624_v12, %v4638_v40  ;;  %v10266_v13 = vcombine.low %v1575_v55, %v13594_v24  ;;  %v1577_v39 = vcombine.high %v13594_v24, %v13598_v41  ;;  %v11534_v14 = vpack.c.bf16 %v10141_v29, %v10140_v7  ;;  %v10017_v5 = vld.sshfl [vmem:[%s12698_s17 + $0x2a] sm:$0x3 pattern:$0x76325410]  ;;  %v10146_v7 = vld [vmem:[%s16635_s1 + $0x220] sm:$0xff] }
  0xf5   : > { %4984 = vmatprep.mubr.f32.mxu0 %v4577_v6  ;;  %v771_v9 = vcombine.high %v649_v16, %v649_v16  ;;  %v4646_v32 = vcombine.low %v4624_v12, %v4638_v40  ;;  %v4682_v24 = vcombine.high %v4659_v45, %v4673_v51  ;;  %v4694_v41 = vrot.slane %v10264_v36, %v12719_v37  ;;  %v13780_v18 = vld [vmem:[%s16635_s1 + $0x308] sm:$0xff]  ;;  %v655_v36 = vld [vmem:[%s12698_s17 + $0x32] sm:$0xff] }
  0xf6   : > { %11532 = vmatpush1.bf16.msra.mxu1 %v11531_v60  ;;  %v4708_v34 = vrot.slane %v10266_v13, %v12719_v37  ;;  %v10268_v1 = vcombine.low %v1577_v39, %v13612_v46  ;;  %v10270_v48 = vcombine.low %v1610_v27, %v13615_v56  ;;  %v1612_v3 = vcombine.high %v13615_v56, %v13633_v50  ;;  %v10145_v46 = vld [vmem:[%s16635_s1 + $0x218] sm:$0xff]  ;;  %v10147_v29 = vld [vmem:[%s16635_s1 + $0x228] sm:$0xff] }
  0xf7   : > { %11533 = vmatprep.subr.bf16.mxu1 %v16752_v17  ;;  %v11537_v6 = vpack.c.bf16 %v10143_v22, %v10142_v15  ;;  %v792_v58 = vrot.slane %v649_v16, %v12719_v37  ;;  %v799_v38 = vrot.slane %v771_v9, %v12719_v37  ;;  %v4681_v56 = vcombine.low %v4659_v45, %v4673_v51  ;;  %v656_v27 = vld [vmem:[%s12698_s17 + $0x3a] sm:$0xff]  ;;  %v10018_v22 = vld.sshfl [vmem:[%s12698_s17 + $0x42] sm:$0x3 pattern:$0x76325410]  ;;  %v13971_v45 = vld [vmem:[%s16635_s1 + $0x370] sm:$0xff] }
  0xf8   : > { %4985 = vmatmul.mubr.f32.gmra.mrb[32].mxu0 %v4576_v2  ;;  %v4717_v50 = vcombine.high %v4694_v41, %v4708_v34  ;;  %v13765_v30 = vrot.slane %v10268_v1, %v12719_v37  ;;  %v13768_v59 = vrot.slane %v10270_v48, %v12719_v37  ;;  %v10272_v2 = vcombine.low %v1612_v3, %v13647_v11  ;;  %v10016_v11 = vld.sshfl [vmem:[%s12698_s17 + $0x12] sm:$0x3 pattern:$0x76325410]  ;;  %v13829_v3 = vld [vmem:[%s12698_s17 + $0x62] sm:$0xff] }
  0xf9   : > { %4989 = vmatprep.mubr.f32.mxu0 %v4612_v49  ;;  %v806_v49 = vcombine.high %v650_v62, %v650_v62  ;;  %v11540_v12 = vpack.c.bf16 %v10145_v46, %v10144_v10  ;;  %v4001_v40 = vrot.slane %v792_v58, %v12719_v37  ;;  %v4015_v55 = vrot.slane %v799_v38, %v12719_v37  ;;  %v10149_v58 = vld [vmem:[%s16635_s1 + $0x238] sm:$0xff] }
  0xfa   : > { %11535 = vmatpush1.bf16.msra.mxu1 %v11534_v14  ;;  %v888_v60 = vcombine.low %v13152_v21, %v12740_v52  ;;  %v4716_v51 = vcombine.low %v4694_v41, %v4708_v34  ;;  %v13802_v52 = vld [vmem:[%s16635_s1 + $0x310] sm:$0xff]  ;;  %v13807_v21 = vld [vmem:[%s16635_s1 + $0x318] sm:$0xff]  ;;  %v940_v16 = vcombine.low %v13212_v31, %v10017_v5  ;;  %v13814_v13 = vrot.slane %v10272_v2, %v12719_v37  ;;  %v16786_v34 = vld [vmem:[#allocation14_spill] sm:$0xff] }
  0xfb   : > { %11536 = vmatprep.subr.bf16.mxu1 %v16752_v17  ;;  %v827_v39 = vrot.slane %v650_v62, %v12719_v37  ;;  %v943_v14 = vcombine.high %v655_v36, %v655_v36  ;;  %v834_v15 = vrot.slane %v806_v49, %v12719_v37  ;;  %v11543_v31 = vpack.c.bf16 %v10147_v29, %v10146_v7  ;;  %v13849_v2 = vld [vmem:[%s16635_s1 + $0x320] sm:$0xff]  ;;  %v10026_v5 = vld [vmem:[%s12698_s17 + $0x18] sm:$0xff]  ;;  %v10151_v29 = vld [vmem:[%s16635_s1 + $0x248] sm:$0xff] }
  0xfc   : > { %4990 = vmatmul.mubr.f32.gmra.mrb[34].mxu0 %v4611_v8  ;;  %v13795_v8 = vld [vmem:[%s12698_s17 + $0xc2] sm:$0xff]  ;;  %v10225_v1 = vcombine.low %v10016_v11, %v16786_v34  ;;  %v10227_v48 = vcombine.high %v16786_v34, %v888_v60  ;;  %v4751_v38 = vcombine.low %v13765_v30, %v13768_v59  ;;  %v964_v62 = vrot.slane %v655_v36, %v12719_v37  ;;  %v10056_v11 = vld [vmem:[%s12698_s17 + $0x19] sm:$0xff]  ;;  %v12333_v41 = vld [vmem:[%s12698_s17 + $0x30] sm:$0xff] }
  0xfd   : > { %4994 = vmatprep.mubr.f32.mxu0 %v4647_v26  ;;  %v4752_v26 = vcombine.high %v13765_v30, %v13768_v59  ;;  %v10233_v10 = vcombine.high %v12764_v61, %v940_v16  ;;  %v999_v46 = vrot.slane %v656_v27, %v12719_v37  ;;  %v13854_v30 = vld [vmem:[%s16635_s1 + $0x328] sm:$0xff]  ;;  %v971_v61 = vrot.slane %v943_v14, %v12719_v37  ;;  %v13885_v14 = vld [vmem:[%s16635_s1 + $0x338] sm:$0xff] }
  0xfe   : > { %11538 = vmatpush1.bf16.msra.mxu1 %v11537_v6  ;;  %v10148_v6 = vld [vmem:[%s16635_s1 + $0x230] sm:$0xff]  ;;  %v10235_v59 = vcombine.low %v10018_v22, %v12833_v43  ;;  %v4050_v49 = vrot.slane %v834_v15, %v12719_v37  ;;  %v4071_v60 = vrot.slane %v10225_v1, %v12719_v37  ;;  %v4085_v7 = vrot.slane %v10227_v48, %v12719_v37  ;;  %v10150_v43 = vld [vmem:[%s16635_s1 + $0x240] sm:$0xff]  ;;  %v13898_v34 = vld [vmem:[%s16635_s1 + $0x348] sm:$0xff] }
  0xff   : > { %11539 = vmatprep.subr.bf16.mxu1 %v16752_v17  ;;  %v1860_v36 = vcombine.high %v10026_v5, %v10056_v11  ;;  %v4190_v15 = vrot.slane %v999_v46, %v12719_v37  ;;  %v4176_v22 = vrot.slane %v971_v61, %v12719_v37  ;;  %v662_v1 = vld [vmem:[%s12698_s17 + $0x6a] sm:$0xff] }
 0x100   : > { %4995 = vmatmul.mubr.f32.gmra.mrb[36].mxu0 %v4646_v32  ;;  %v978_v32 = vcombine.high %v656_v27, %v656_v27  ;;  %v13880_v27 = vld [vmem:[%s16635_s1 + $0x330] sm:$0xff] }
 0x101   : > { %4999 = vmatprep.mubr.f32.mxu0 %v4682_v24  ;;  %v13822_v24 = vcombine.low %v4001_v40, %v4015_v55  ;;  %v1115_v40 = vcombine.high %v13829_v3, %v13829_v3  ;;  %v11546_v55 = vpack.c.bf16 %v10149_v58, %v10148_v6  ;;  %v1875_v6 = vrot.slane %v1860_v36, %v12719_v37  ;;  %v13954_v36 = vld [vmem:[%s16635_s1 + $0x360] sm:$0xff]  ;;  %v12334_v9 = vld [vmem:[%s12698_s17 + $0x31] sm:$0xff] }
 0x102   : > { %11541 = vmatpush1.bf16.msra.mxu1 %v11540_v12  ;;  %v1006_v12 = vrot.slane %v978_v32, %v12719_v37  ;;  %v4225_v32 = vrot.slane %v10235_v59, %v12719_v37  ;;  %v13919_v59 = vcombine.low %v4071_v60, %v4085_v7  ;;  %v1150_v60 = vcombine.high %v662_v1, %v662_v1  ;;  %v10057_v7 = vld [vmem:[%s12698_s17 + $0x21] sm:$0xff] }
 0x103   : > { %11542 = vmatprep.subr.bf16.mxu1 %v16752_v17  ;;  %v1143_v46 = vrot.slane %v1115_v40, %v12719_v37  ;;  %v13932_v40 = vrot.slane %v1875_v6, %v12719_v37  ;;  %v1945_v35 = vcombine.low %v12333_v41, %v12334_v9 }
 0x104   : > { %5000 = vmatmul.mubr.f32.gmra.mrb[38].mxu0 %v4681_v56  ;;  %v4770_v56 = vcombine.high %v13814_v13, %v13814_v13  ;;  %v4211_v58 = vrot.slane %v1006_v12, %v12719_v37 }
 0x105   : > { %5004 = vmatprep.mubr.f32.mxu0 %v4717_v50  ;;  %v4036_v50 = vrot.slane %v827_v39, %v12719_v37  ;;  %v4155_v39 = vrot.slane %v964_v62, %v12719_v37  ;;  %v13912_v62 = vld [vmem:[%s16635_s1 + $0x358] sm:$0xff]  ;;  %v4330_v6 = vrot.slane %v1143_v46, %v12719_v37  ;;  %v10155_v46 = vld [vmem:[%s16635_s1 + $0x268] sm:$0xff] }
 0x106   : > { %11544 = vmatpush1.bf16.msra.mxu1 %v11543_v31  ;;  %v13893_v31 = vld [vmem:[%s16635_s1 + $0x340] sm:$0xff] }
 0x107   : > { %11545 = vmatprep.subr.bf16.mxu1 %v16752_v17  ;;  %v13917_v61 = vcombine.low %v4036_v50, %v4050_v49  ;;  %v10027_v50 = vld [vmem:[%s12698_s17 + $0x20] sm:$0xff] }
 0x108   : > { %5005 = vmatmul.mubr.f32.gmra.mrb[40].mxu0 %v4716_v51  ;;  %v1859_v51 = vcombine.low %v10026_v5, %v10056_v11  ;;  %v10152_v5 = vld [vmem:[%s16635_s1 + $0x250] sm:$0xff]  ;;  %v1894_v11 = vcombine.low %v10027_v50, %v10057_v7 }
 0x109   : > { %5009 = vmatprep.mubr.f32.mxu0 %v4752_v26  ;;  %v4141_v26 = vrot.slane %v10233_v10, %v12719_v37  ;;  %v1136_v10 = vrot.slane %v13829_v3, %v12719_v37  ;;  %v10153_v3 = vld [vmem:[%s16635_s1 + $0x258] sm:$0xff] }
 0x10a   : > { %v1868_v48 = vrot.slane %v1859_v51, %v12719_v37  ;;  %11547 = vmatpush1.bf16.msra.mxu1 %v11546_v55  ;;  %v13947_v51 = vcombine.low %v4176_v22, %v4190_v15  ;;  %v13964_v15 = vcombine.low %v4211_v58, %v4225_v32  ;;  %v11552_v32 = vpack.c.bf16 %v10153_v3, %v10152_v5  ;;  %v10020_v58 = vld.sshfl [vmem:[%s12698_s17 + $0x72] sm:$0x3 pattern:$0x76325410] }
 0x10b   : > { %11548 = vmatprep.subr.bf16.mxu1 %v16752_v17  ;;  %v13936_v49 = vcombine.low %v4141_v26, %v4155_v39  ;;  %v13959_v26 = vld [vmem:[%s16635_s1 + $0x368] sm:$0xff]  ;;  %v1171_v39 = vrot.slane %v662_v1, %v12719_v37  ;;  %v4316_v22 = vrot.slane %v1136_v10, %v12719_v37  ;;  %v10154_v10 = vld [vmem:[%s16635_s1 + $0x260] sm:$0xff]  ;;  %v1895_v55 = vcombine.high %v10027_v50, %v10057_v7  ;;  %v10156_v7 = vld [vmem:[%s16635_s1 + $0x270] sm:$0xff] }
 0x10c   : > { %5010 = vmatmul.mubr.f32.gmra.mrb[42].mxu0 %v4751_v38  ;;  %v13907_v38 = vld [vmem:[%s16635_s1 + $0x350] sm:$0xff]  ;;  %v13929_v12 = vrot.slane %v1868_v48, %v12719_v37  ;;  %v10021_v1 = vld.sshfl [vmem:[%s12698_s17 + $0x8a] sm:$0x3 pattern:$0x76325410]  ;;  %v13991_v5 = vrot.slane %v1150_v60, %v12719_v37  ;;  %v1232_v3 = vcombine.low %v13385_v19, %v12979_v25  ;;  %v14010_v25 = vld [vmem:[%s16635_s1 + $0x380] sm:$0xff]  ;;  %v10245_v41 = vcombine.low %v10020_v58, %v12976_v23 }
 0x10d   : > { %5014 = vmatprep.mubr.f32.mxu0 %v4770_v56  ;;  %v11549_v56 = vpack.c.bf16 %v10151_v29, %v10150_v43  ;;  %v10028_v43 = vld [vmem:[%s12698_s17 + $0x28] sm:$0x3]  ;;  %v14020_v9 = vcombine.low %v4316_v22, %v4330_v6  ;;  %v11555_v60 = vpack.c.bf16 %v10155_v46, %v10154_v10  ;;  %v1954_v22 = vrot.slane %v1945_v35, %v12719_v37  ;;  %v668_v46 = vld [vmem:[%s12698_s17 + $0x9a] sm:$0xff] }
 0x10e   : > { %v10058_v29 = vld [vmem:[%s12698_s17 + $0x29] sm:$0x3]  ;;  %v2801_v48 = vcombine.high %v13929_v12, %v13932_v40  ;;  %v4365_v6 = vrot.slane %v13991_v5, %v12719_v37  ;;  %v16791_v5 = vld [vmem:[#allocation17_spill] sm:$0xff] }
 0x10f   : > { %11550 = vmatpush1.bf16.msra.mxu1 %v11549_v56  ;;  %v1929_v16 = vcombine.low %v10028_v43, %v10058_v29  ;;  %v11675_v56 = vpack.c.bf16 %v13959_v26, %v13954_v36  ;;  %v14015_v19 = vld [vmem:[%s16635_s1 + $0x388] sm:$0xff]  ;;  %v10157_v43 = vld [vmem:[%s16635_s1 + $0x278] sm:$0xff]  ;;  %v1910_v29 = vrot.slane %v1895_v55, %v12719_v37  ;;  %v16805_v36 = vld [vmem:[#allocation24_spill] sm:$0xff] }
 0x110   : > { %5015 = vmatmul.mubr.f32.gmra.mrb[44].mxu0 %v13814_v13  ;;  %v13976_v13 = vld [vmem:[%s16635_s1 + $0x378] sm:$0xff]  ;;  %11551 = vmatprep.subr.bf16.mxu1 %v16752_v17 }
 0x111   : > { %11174 = vmatprep.mubr.msk.f32.mxu0 %vm12383_vm0, %v16755_v20  ;;  %3688 = vmatprep.mubr.f32.mxu1 %v2801_v48  ;;  %v16787_v48 = vpack.c.bf16 %v13780_v18, %v13775_v42  ;;  %v11678_v50 = vpack.c.bf16 %v13976_v13, %v13971_v45  ;;  %v667_v42 = vld [vmem:[%s12698_s17 + $0x92] sm:$0xff]  ;;  %v1284_v18 = vcombine.low %v13406_v33, %v10021_v1 }
 0x112   : > { %v1903_v33 = vrot.slane %v1894_v11, %v12719_v37  ;;  %v10247_v1 = vcombine.high %v12976_v23, %v1232_v3  ;;  %v1308_v58 = vrot.slane %v667_v42, %v12719_v37  ;;  %v14055_v23 = vld [vmem:[%s16635_s1 + $0x398] sm:$0xff]  ;;  %v1287_v55 = vcombine.high %v667_v42, %v667_v42  ;;  %v16789_v11 = vld [vmem:[#allocation19_spill] sm:$0xff] }
 0x113   : > { %11553 = vmatpush1.bf16.msra.mxu1 %v11552_v32  ;;  %v10253_v35 = vcombine.high %v13007_v4, %v1284_v18  ;;  %v1977_v10 = vcombine.high %v1954_v22, %v16789_v11  ;;  %v2012_v3 = vcombine.high %v12770_v63, %v16791_v5  ;;  %v14069_v42 = vrot.slane %v1910_v29, %v12719_v37  ;;  %v14357_v45 = vld [vmem:[%s12698_s17 + $0x38] sm:$0xff]  ;;  %v14375_v32 = vld [vmem:[%s16635_s1 + $0x3f0] sm:$0xff] }
 0x114   : > { %11175 = vmatmul.mubr.f32.vlgmr.msra.gmra.mrb[0].mxu0 %v13822_v24  ;;  %v14003_v24 = vrot.slane %v1171_v39, %v12719_v37  ;;  %11554 = vmatprep.subr.bf16.mxu1 %v16752_v17  ;;  %v1936_v39 = vrot.slane %v1929_v16, %v12719_v37  ;;  %v16788_v16 = vpack.c.bf16 %v13807_v21, %v13802_v52  ;;  %v16790_v21 = vld [vmem:[#allocation15_spill] sm:$0xff]  ;;  %v14360_v13 = vld [vmem:[%s12698_s17 + $0x39] sm:$0xff] }
 0x115   : > { %11658 = vmatpush1.bf16.msra.mxu0 %v16787_v48  ;;  %11177 = vmatprep.mubr.msk.f32.mxu0 %vm12383_vm0, %v16755_v20  ;;  %v11558_v52 = vpack.c.bf16 %v10157_v43, %v10156_v7  ;;  %v1979_v4 = vcombine.high %v12743_v53, %v16790_v21  ;;  %v14066_v48 = vrot.slane %v1903_v33, %v12719_v37 }
 0x116   : > { %11659 = vmatprep.subr.bf16.mxu0 %v16752_v17  ;;  %v10174_v18 = vcombine.low %v1936_v39, %v1954_v22  ;;  %v4386_v7 = vrot.slane %v10245_v41, %v12719_v37  ;;  %v4400_v43 = vrot.slane %v10247_v1, %v12719_v37  ;;  %v16792_v29 = vpack.c.bf16 %v13854_v30, %v13849_v2  ;;  %v14089_v39 = vld [vmem:[%s16635_s1 + $0x3a0] sm:$0xff]  ;;  %v14094_v22 = vld [vmem:[%s16635_s1 + $0x3a8] sm:$0xff] }
 0x117   : > { %11556 = vmatpush1.bf16.msra.mxu1 %v11555_v60  ;;  %v10176_v60 = vcombine.low %v1977_v10, %v12743_v53  ;;  %v4456_v53 = vrot.slane %v10253_v35, %v12719_v37  ;;  %v1343_v41 = vrot.slane %v668_v46, %v12719_v37  ;;  %v10022_v1 = vld.sshfl [vmem:[%s12698_s17 + $0xa2] sm:$0x3 pattern:$0x76325410]  ;;  %v14099_v2 = vld [vmem:[%s12698_s17 + $0x48] sm:$0xff]  ;;  %v10178_v35 = vcombine.low %v1979_v4, %v12770_v63 }
 0x118   : > { %11178 = vmatmul.mubr.f32.gmra.mrb[2].mxu0 %v13917_v61  ;;  %v14050_v61 = vld [vmem:[%s16635_s1 + $0x390] sm:$0xff]  ;;  %11557 = vmatprep.subr.bf16.mxu1 %v16752_v17  ;;  %v1322_v11 = vcombine.high %v668_v46, %v668_v46  ;;  %v2836_v10 = vcombine.high %v14066_v48, %v14069_v42  ;;  %v14111_v21 = vrot.slane %v10174_v18, %v12719_v37 }
 0x119   : > { %11180 = vmatprep.mubr.msk.f32.mxu0 %vm12383_vm0, %v16755_v20  ;;  %11661 = vmatpush1.bf16.msra.mxu0 %v16788_v16  ;;  %v4470_v16 = vrot.slane %v1308_v58, %v12719_v37  ;;  %v14102_v30 = vld [vmem:[%s12698_s17 + $0x49] sm:$0xff]  ;;  %v2800_v58 = vcombine.low %v13929_v12, %v13932_v40  ;;  %v14114_v5 = vrot.slane %v10176_v60, %v12719_v37  ;;  %v14346_v40 = vld [vmem:[%s16635_s1 + $0x3e0] sm:$0xff] }
 0x11a   : > { %11662 = vmatprep.subr.bf16.mxu0 %v16752_v17  ;;  %v14119_v63 = vcombine.low %v14003_v24, %v4365_v6  ;;  %v14121_v12 = vcombine.low %v4386_v7, %v4400_v43  ;;  %v10255_v46 = vcombine.low %v10022_v1, %v13075_v44  ;;  %v14136_v24 = vld [vmem:[%s16635_s1 + $0x3b0] sm:$0xff]  ;;  %v14141_v44 = vld [vmem:[%s16635_s1 + $0x3b8] sm:$0xff]  ;;  %v14144_v6 = vld [vmem:[%s12698_s17 + $0xc2] sm:$0xff]  ;;  %v2835_v18 = vcombine.low %v14066_v48, %v14069_v42 }
 0x11b   : > { %11559 = vmatpush1.bf16.msra.mxu1 %v11558_v52  ;;  %v16793_v52 = vpack.c.bf16 %v13885_v14, %v13880_v27  ;;  %v5468_v27 = vcombine.low %v14099_v2, %v14102_v30  ;;  %v14150_v14 = vld [vmem:[%s12698_s17 + $0x50] sm:$0xff]  ;;  %v14158_v60 = vrot.slane %v10178_v35, %v12719_v37  ;;  %v14163_v43 = vcombine.low %v4456_v53, %v4470_v16 }
 0x11c   : > { %11181 = vmatmul.mubr.f32.gmra.mrb[4].mxu0 %v13919_v59  ;;  %v1315_v59 = vrot.slane %v1287_v55, %v12719_v37  ;;  %v10180_v55 = vcombine.low %v2012_v3, %v12773_v0  ;;  %11920 = vmatprep.subr.bf16.mxu1 %v16752_v17  ;;  %v14153_v3 = vld [vmem:[%s12698_s17 + $0x51] sm:$0xff]  ;;  %v14174_v48 = vrot.slane %v10255_v46, %v12719_v37  ;;  %v14186_v35 = vld [vmem:[%s12698_s17 + $0xc9] sm:$0xff]  ;;  %v14210_v46 = vld [vmem:[%s12698_s17 + $0xc0] sm:$0xff] }
 0x11d   : > { %11183 = vmatprep.mubr.msk.f32.mxu0 %vm12383_vm0, %v16755_v20  ;;  %11664 = vmatpush1.bf16.msra.mxu0 %v16792_v29  ;;  %v14166_v29 = vrot.slane %v1322_v11, %v12719_v37  ;;  %v1459_v16 = vcombine.high %v14144_v6, %v14144_v6  ;;  %v5469_v53 = vcombine.high %v14099_v2, %v14102_v30  ;;  %v16796_v2 = vld [vmem:[#allocation21_spill] sm:$0xff] }
 0x11e   : > { %11665 = vmatprep.subr.bf16.mxu0 %v16752_v17  ;;  %v4491_v4 = vrot.slane %v1315_v59, %v12719_v37  ;;  %3689 = vmatmul.mubr.f32.vlgmr.msra.gmra.mrb[0].mxu1 %v2800_v58  ;;  %v14161_v7 = vrot.slane %v10180_v55, %v12719_v37  ;;  %v2871_v59 = vcombine.high %v14111_v21, %v14114_v5  ;;  %v14183_v58 = vld [vmem:[%s12698_s17 + $0xc8] sm:$0xff] }
 0x11f   : > { %3693 = vmatprep.mubr.f32.mxu1 %v2836_v10  ;;  %v14197_v55 = vrot.slane %v5468_v27, %v12719_v37  ;;  %v5503_v11 = vcombine.low %v14150_v14, %v14153_v3  ;;  %v16809_v33 = vpack.c.bf16 %v14015_v19, %v14010_v25  ;;  %v10283_v25 = vld [vmem:[%s12698_s17 + $0x78] sm:$0xff] }
 0x120   : > { %11184 = vmatmul.mubr.f32.gmra.mrb[6].mxu0 %v13401_v28  ;;  %v4505_v28 = vrot.slane %v1343_v41, %v12719_v37  ;;  %v16794_v41 = vld [vmem:[#allocation18_spill] sm:$0xff] }
 0x121   : > { %11186 = vmatprep.mubr.msk.f32.mxu0 %vm12383_vm0, %v16755_v20  ;;  %11667 = vmatpush1.bf16.msra.mxu0 %v16793_v52  ;;  %v2014_v1 = vcombine.high %v12773_v0, %v16794_v41  ;;  %v16795_v0 = vpack.c.bf16 %v13898_v34, %v13893_v31  ;;  %v2870_v31 = vcombine.low %v14111_v21, %v14114_v5  ;;  %v14213_v52 = vld [vmem:[%s12698_s17 + $0xc1] sm:$0xff]  ;;  %v10313_v19 = vld [vmem:[%s12698_s17 + $0x79] sm:$0xff] }
 0x122   : > { %11668 = vmatprep.subr.bf16.mxu0 %v16752_v17  ;;  %v14203_v10 = vcombine.low %v4491_v4, %v4505_v28  ;;  %3694 = vmatmul.mubr.f32.gmra.mrb[2].mxu1 %v2835_v18  ;;  %v2906_v34 = vcombine.high %v14158_v60, %v14161_v7  ;;  %v14220_v4 = vrot.slane %v14197_v55, %v12719_v37 }
 0x123   : > { %v10182_v30 = vcombine.low %v2014_v1, %v16796_v2  ;;  %3698 = vmatprep.mubr.f32.mxu1 %v2871_v59  ;;  %v5899_v28 = vcombine.high %v14210_v46, %v14213_v52  ;;  %v5933_v21 = vcombine.low %v14183_v58, %v14186_v35  ;;  %v1480_v5 = vrot.slane %v14144_v6, %v12719_v37  ;;  %v10034_v1 = vld [vmem:[%s12698_s17 + $0x58] sm:$0x3] }
 0x124   : > { %11187 = vmatmul.mubr.f32.gmra.mrb[8].mxu0 %v13936_v49  ;;  %v14194_v49 = vld [vmem:[%s12698_s17 + $0xca] sm:$0xff]  ;;  %v14230_v18 = vrot.slane %v1459_v16, %v12719_v37  ;;  %v14235_v41 = vrot.slane %v5469_v53, %v12719_v37  ;;  %v5504_v6 = vcombine.high %v14150_v14, %v14153_v3  ;;  %v14247_v16 = vrot.slane %v5503_v11, %v12719_v37 }
 0x125   : > { %11189 = vmatprep.mubr.msk.f32.mxu0 %vm12383_vm0, %v16755_v20  ;;  %11670 = vmatpush1.bf16.msra.mxu0 %v16795_v0  ;;  %v14216_v27 = vrot.slane %v10182_v30, %v12719_v37  ;;  %v1494_v59 = vcombine.high %v14194_v49, %v14194_v49  ;;  %v10064_v0 = vld [vmem:[%s12698_s17 + $0x59] sm:$0x3]  ;;  %v2905_v53 = vcombine.low %v14158_v60, %v14161_v7  ;;  %v12335_v60 = vld [vmem:[%s12698_s17 + $0x60] sm:$0xff] }
 0x126   : > { %11671 = vmatprep.subr.bf16.mxu0 %v16752_v17  ;;  %16797 = vst [vmem:[#allocation14_spill] sm:$0xff] %v14235_v41  ;;  %16799 = vst [vmem:[#allocation19_spill] sm:$0xff] %v14247_v16  ;;  %3699 = vmatmul.mubr.f32.gmra.mrb[4].mxu1 %v2870_v31  ;;  %v14254_v2 = vrot.slane %v14235_v41, %v12719_v37  ;;  %v14257_v30 = vrot.slane %v5899_v28, %v12719_v37  ;;  %v12336_v7 = vld [vmem:[%s12698_s17 + $0x61] sm:$0xff] }
 0x127   : > { %3703 = vmatprep.mubr.f32.mxu1 %v2906_v34  ;;  %v14266_v14 = vrot.slane %v14247_v16, %v12719_v37  ;;  %v2101_v3 = vcombine.low %v10034_v1, %v10064_v0  ;;  %v2117_v11 = vcombine.low %v12335_v60, %v12336_v7  ;;  %v1515_v31 = vrot.slane %v14194_v49, %v12719_v37  ;;  %v16806_v1 = vld [vmem:[#allocation23_spill] sm:$0xff] }
 0x128   : > { %11190 = vmatmul.mubr.f32.gmra.mrb[10].mxu0 %v13947_v51  ;;  %v16798_v51 = vpack.c.bf16 %v13912_v62, %v13907_v38  ;;  %v14260_v38 = vrot.slane %v5933_v21, %v12719_v37  ;;  %v2941_v62 = vcombine.high %v14216_v27, %v14220_v4  ;;  %v1522_v28 = vrot.slane %v1494_v59, %v12719_v37 }
 0x129   : > { %11192 = vmatprep.mubr.msk.f32.mxu0 %vm12383_vm0, %v16755_v20  ;;  %v14276_v34 = vrot.slane %v14257_v30, %v12719_v37  ;;  %v2940_v49 = vcombine.low %v14216_v27, %v14220_v4  ;;  %v2108_v59 = vrot.slane %v2101_v3, %v12719_v37  ;;  %v2126_v26 = vrot.slane %v2117_v11, %v12719_v37  ;;  %v14304_v27 = vld [vmem:[%s16635_s1 + $0x3c0] sm:$0xff]  ;;  %v14309_v4 = vld [vmem:[%s16635_s1 + $0x3c8] sm:$0xff]  ;;  %v14325_v3 = vld [vmem:[%s16635_s1 + $0x3d8] sm:$0xff] }
 0x12a   : > { %11673 = vmatpush1.bf16.msra.mxu0 %v16798_v51  ;;  %v14280_v21 = vrot.slane %v14260_v38, %v12719_v37  ;;  %3704 = vmatmul.mubr.f32.gmra.mrb[6].mxu1 %v2905_v53  ;;  %v4631_v0 = vrot.slane %v1480_v5, %v12719_v37  ;;  %v4645_v51 = vrot.slane %v14230_v18, %v12719_v37  ;;  %v16803_v53 = vld [vmem:[#allocation42_spill] sm:$0xff]  ;;  %v10274_v5 = vld [vmem:[%s12698_s17 + $0x30] sm:$0xff] }
 0x12b   : > { %11674 = vmatprep.subr.bf16.mxu0 %v16752_v17  ;;  %16800 = vst [vmem:[#allocation15_spill] sm:$0xff] %v14276_v34  ;;  %3708 = vmatprep.mubr.f32.mxu1 %v2941_v62  ;;  %v10304_v18 = vld [vmem:[%s12698_s17 + $0x31] sm:$0xff]  ;;  %v10184_v60 = vcombine.low %v2108_v59, %v2126_v26  ;;  %v16804_v62 = vld [vmem:[#allocation22_spill] sm:$0xff]  ;;  %v2151_v42 = vcombine.high %v16806_v1, %v16805_v36  ;;  %v14354_v36 = vld [vmem:[%s16635_s1 + $0x3e8] sm:$0xff] }
 0x12c   : > { %11193 = vmatmul.mubr.f32.gmra.mrb[12].mxu0 %v13964_v15  ;;  %16801 = vst [vmem:[#allocation17_spill] sm:$0xff] %v14280_v21  ;;  %v14288_v15 = vrot.slane %v5504_v6, %v12719_v37  ;;  %v14317_v6 = vld [vmem:[%s16635_s1 + $0x3d0] sm:$0xff]  ;;  %v2149_v11 = vcombine.high %v2126_v26, %v16804_v62  ;;  %v4680_v59 = vrot.slane %v1522_v28, %v12719_v37  ;;  %v16807_v28 = vld [vmem:[#allocation25_spill] sm:$0xff] }
 0x12d   : > { %11195 = vmatprep.mubr.msk.f32.mxu0 %vm12383_vm0, %v16755_v20  ;;  %v2975_v26 = vcombine.low %v14254_v2, %v14266_v14  ;;  %v10188_v62 = vcombine.low %v2151_v42, %v16807_v28  ;;  %v5382_v42 = vcombine.low %v10274_v5, %v10304_v18 }
 0x12e   : > { %11676 = vmatpush1.bf16.msra.mxu0 %v11675_v56  ;;  %16802 = vst [vmem:[#allocation18_spill] sm:$0xff] %v14288_v15  ;;  %v4526_v56 = vrot.slane %v14166_v29, %v12719_v37  ;;  %v2976_v29 = vcombine.high %v14254_v2, %v14266_v14  ;;  %v14331_v7 = vrot.slane %v14288_v15, %v12719_v37 }
 0x12f   : > { %11677 = vmatprep.subr.bf16.mxu0 %v16752_v17  ;;  %3709 = vmatmul.mubr.f32.gmra.mrb[8].mxu1 %v2940_v49  ;;  %v14380_v49 = vld [vmem:[%s16635_s1 + $0x3f8] sm:$0xff]  ;;  %v14391_v14 = vcombine.low %v4631_v0, %v4645_v51  ;;  %v5391_v51 = vrot.slane %v5382_v42, %v12719_v37  ;;  %v10314_v0 = vld [vmem:[%s12698_s17 + $0x81] sm:$0xff] }
 0x130   : > { %11196 = vmatmul.mubr.f32.gmra.mrb[14].mxu0 %v16803_v53  ;;  %v4666_v53 = vrot.slane %v1515_v31, %v12719_v37  ;;  %v10186_v31 = vcombine.low %v2149_v11, %v16806_v1  ;;  %v14366_v2 = vcombine.low %v4526_v56, %v14174_v48  ;;  %3713 = vmatprep.mubr.f32.mxu1 %v2976_v29  ;;  %v16808_v48 = vld [vmem:[#allocation43_spill] sm:$0xff]  ;;  %v16812_v29 = vld [vmem:[#allocation28_spill] sm:$0xff] }
 0x131   : > { %11198 = vmatprep.mubr.msk.f32.mxu0 %vm12383_vm0, %v16755_v20  ;;  %v5383_v1 = vcombine.high %v10274_v5, %v10304_v18  ;;  %v3037_v11 = vrot.slane %v10188_v62, %v12719_v37  ;;  %v5417_v5 = vcombine.low %v14357_v45, %v14360_v13  ;;  %v14409_v62 = vld [vmem:[%s12698_s17 + $0x40] sm:$0x3]  ;;  %v14446_v34 = vrot.slane %v5391_v51, %v12719_v37  ;;  %v10298_v51 = vld [vmem:[%s12698_s17 + $0xf0] sm:$0xff] }
 0x132   : > { %11679 = vmatpush1.bf16.msra.mxu0 %v11678_v50  ;;  %v3002_v50 = vrot.slane %v10184_v60, %v12719_v37  ;;  %v3023_v60 = vrot.slane %v10186_v31, %v12719_v37  ;;  %v14398_v18 = vcombine.low %v4666_v53, %v4680_v59  ;;  %v16810_v59 = vld [vmem:[#allocation8_spill] sm:$0xff]  ;;  %v16811_v31 = vld [vmem:[#allocation26_spill] sm:$0xff] }
 0x133   : > { %11680 = vmatprep.subr.bf16.mxu0 %v16752_v17  ;;  %3714 = vmatmul.mubr.f32.gmra.mrb[10].mxu1 %v2975_v26  ;;  %v5418_v26 = vcombine.high %v14357_v45, %v14360_v13  ;;  %v2184_v42 = vcombine.high %v16807_v28, %v16811_v31  ;;  %v14433_v45 = vld [vmem:[%s16635_s1 + $0x400] sm:$0xff]  ;;  %v14438_v13 = vld [vmem:[%s16635_s1 + $0x408] sm:$0xff]  ;;  %v5426_v28 = vrot.slane %v5417_v5, %v12719_v37 }
 0x134   : > { %11199 = vmatmul.mubr.f32.gmra.mrb[16].mxu0 %v16808_v48  ;;  %v3011_v56 = vcombine.high %v14331_v7, %v3002_v50  ;;  %v3046_v53 = vcombine.high %v3023_v60, %v3037_v11  ;;  %11928 = vmatpush3.bf16.msra.mxu1 %v16810_v59  ;;  %v5398_v48 = vrot.slane %v5383_v1, %v12719_v37  ;;  %v10337_v31 = vld [vmem:[%s12698_s17 + $0x4a] sm:$0xff]  ;;  %v16815_v59 = vld [vmem:[#allocation29_spill] sm:$0xff] }
 0x135   : > { %11201 = vmatprep.mubr.msk.f32.mxu0 %vm12383_vm0, %v16755_v20  ;;  %v5640_v1 = vcombine.low %v10283_v25, %v10313_v19  ;;  %11921 = vmatprep.subr.bf16.mxu1 %v16752_v17 }
 0x136   : > { %11682 = vmatpush1.bf16.msra.mxu0 %v16809_v33  ;;  %v3010_v33 = vcombine.low %v14331_v7, %v3002_v50  ;;  %3718 = vmatprep.mubr.f32.mxu1 %v3011_v56  ;;  %v14417_v7 = vld [vmem:[%s12698_s17 + $0x41] sm:$0x3]  ;;  %v16813_v56 = vld [vmem:[#allocation27_spill] sm:$0xff] }
 0x137   : > { %11683 = vmatprep.subr.bf16.mxu0 %v16752_v17  ;;  %v10284_v50 = vld [vmem:[%s12698_s17 + $0x80] sm:$0xff]  ;;  %v2186_v21 = vcombine.high %v16813_v56, %v16812_v29  ;;  %v5641_v29 = vcombine.high %v10283_v25, %v10313_v19  ;;  %v5452_v54 = vcombine.low %v14409_v62, %v14417_v7  ;;  %v14452_v25 = vrot.slane %v5398_v48, %v12719_v37  ;;  %v10328_v62 = vld [vmem:[%s12698_s17 + $0xf1] sm:$0xff] }
 0x138   : > { %11202 = vmatmul.mubr.f32.gmra.mrb[18].mxu0 %v14020_v9  ;;  %v16814_v9 = vpack.c.bf16 %v14055_v23, %v14050_v61  ;;  %3719 = vmatmul.mubr.f32.gmra.mrb[12].mxu1 %v3010_v33  ;;  %v3045_v61 = vcombine.low %v3023_v60, %v3037_v11  ;;  %v10190_v23 = vcombine.low %v2184_v42, %v16813_v56 }
 0x139   : > { %11204 = vmatprep.mubr.msk.f32.mxu0 %vm12383_vm0, %v16755_v20  ;;  %v5675_v5 = vcombine.low %v10284_v50, %v10314_v0  ;;  %v5676_v57 = vcombine.high %v10284_v50, %v10314_v0  ;;  %3723 = vmatprep.mubr.f32.mxu1 %v3046_v53  ;;  %v16816_v19 = vpack.c.bf16 %v14094_v22, %v14089_v39 }
 0x13a   : > { %11685 = vmatpush1.bf16.msra.mxu0 %v16814_v9  ;;  %v10192_v9 = vcombine.low %v2186_v21, %v16815_v59  ;;  %v3058_v21 = vrot.slane %v10190_v23, %v12719_v37  ;;  %v5433_v33 = vrot.slane %v5418_v26, %v12719_v37  ;;  %v14468_v0 = vrot.slane %v5640_v1, %v12719_v37 }
 0x13b   : > { %11686 = vmatprep.subr.bf16.mxu0 %v16752_v17  ;;  %v5470_v53 = vcombine.high %v10337_v31, %v10337_v31  ;;  %v14474_v48 = vrot.slane %v5641_v29, %v12719_v37  ;;  %v14477_v39 = vrot.slane %v5675_v5, %v12719_v37  ;;  %v14480_v22 = vrot.slane %v5676_v57, %v12719_v37 }
 0x13c   : > { %11205 = vmatmul.mubr.f32.gmra.mrb[20].mxu0 %v14119_v63  ;;  %v3072_v11 = vrot.slane %v10192_v9, %v12719_v37  ;;  %v14465_v63 = vrot.slane %v10337_v31, %v12719_v37  ;;  %3724 = vmatmul.mubr.f32.gmra.mrb[14].mxu1 %v3045_v61  ;;  %v3093_v50 = vrot.slane %v14468_v0, %v12719_v37 }
 0x13d   : > { %11207 = vmatprep.mubr.msk.f32.mxu0 %vm12383_vm0, %v16755_v20  ;;  %16818 = vst [vmem:[#allocation42_spill] sm:$0xff] %v14474_v48  ;;  %v3107_v42 = vrot.slane %v14474_v48, %v12719_v37  ;;  %v6070_v56 = vcombine.low %v10298_v51, %v10328_v62  ;;  %v6071_v1 = vcombine.high %v10298_v51, %v10328_v62  ;;  %v10338_v51 = vld [vmem:[%s12698_s17 + $0x52] sm:$0xff] }
 0x13e   : > { %11688 = vmatpush1.bf16.msra.mxu0 %v16816_v19  ;;  %16817 = vst [vmem:[#allocation21_spill] sm:$0xff] %v14465_v63  ;;  %v3081_v7 = vcombine.high %v3058_v21, %v3072_v11  ;;  %v3080_v26 = vcombine.low %v3058_v21, %v3072_v11  ;;  %v16819_v57 = vpack.c.bf16 %v14141_v44, %v14136_v24  ;;  %v10040_v44 = vld [vmem:[%s12698_s17 + $0x88] sm:$0x3]  ;;  %v16820_v11 = vld [vmem:[#allocation9_spill] sm:$0xff]  ;;  %v16821_v19 = vld [vmem:[#allocation44_spill] sm:$0xff] }
 0x13f   : > { %11689 = vmatprep.subr.bf16.mxu0 %v16752_v17  ;;  %v14494_v29 = vrot.slane %v5426_v28, %v12719_v37  ;;  %v3142_v31 = vrot.slane %v14480_v22, %v12719_v37  ;;  %v3116_v61 = vcombine.high %v3093_v50, %v3107_v42  ;;  %v14502_v23 = vrot.slane %v6070_v56, %v12719_v37  ;;  %v10070_v28 = vld [vmem:[%s12698_s17 + $0x89] sm:$0x3]  ;;  %v10279_v56 = vld [vmem:[%s12698_s17 + $0x58] sm:$0x3] }
 0x140   : > { %11208 = vmatmul.mubr.f32.gmra.mrb[22].mxu0 %v14121_v12  ;;  %3728 = vmatprep.mubr.f32.mxu1 %v3081_v7  ;;  %v3128_v12 = vrot.slane %v14477_v39, %v12719_v37  ;;  %v14505_v24 = vrot.slane %v6071_v1, %v12719_v37  ;;  %v5459_v59 = vrot.slane %v5452_v54, %v12719_v37  ;;  %v10309_v1 = vld [vmem:[%s12698_s17 + $0x59] sm:$0x3] }
 0x141   : > { %11210 = vmatprep.mubr.msk.f32.mxu0 %vm12383_vm0, %v16755_v20  ;;  %3729 = vmatmul.mubr.f32.gmra.mrb[16].mxu1 %v3080_v26  ;;  %v5500_v9 = vcombine.high %v14197_v55, %v14465_v63  ;;  %v3115_v5 = vcombine.low %v3093_v50, %v3107_v42  ;;  %v14516_v62 = vrot.slane %v5470_v53, %v12719_v37 }
 0x142   : > { %11691 = vmatpush1.bf16.msra.mxu0 %v16819_v57  ;;  %v3151_v21 = vcombine.high %v3128_v12, %v3142_v31  ;;  %11929 = vmatpush3.bf16.msra.mxu1 %v16820_v11  ;;  %v14520_v7 = vrot.slane %v14502_v23, %v12719_v37  ;;  %v14524_v54 = vrot.slane %v14505_v24, %v12719_v37  ;;  %v14544_v11 = vld [vmem:[%s12698_s17 + $0x60] sm:$0xff] }
 0x143   : > { %11692 = vmatprep.subr.bf16.mxu0 %v16752_v17  ;;  %16822 = vst [vmem:[#allocation22_spill] sm:$0xff] %v14516_v62  ;;  %3733 = vmatprep.mubr.f32.mxu1 %v3116_v61  ;;  %v16825_v26 = vpack.c.bf16 %v14309_v4, %v14304_v27  ;;  %v14532_v53 = vrot.slane %v5433_v33, %v12719_v37  ;;  %v16831_v61 = vld [vmem:[#allocation30_spill] sm:$0xff] }
 0x144   : > { %11211 = vmatmul.mubr.f32.gmra.mrb[24].mxu0 %v16821_v19  ;;  %16823 = vst [vmem:[#allocation24_spill] sm:$0xff] %v14520_v7  ;;  %16824 = vst [vmem:[#allocation23_spill] sm:$0xff] %v14524_v54  ;;  %v5505_v50 = vcombine.high %v10338_v51, %v10338_v51  ;;  %v2273_v42 = vcombine.low %v10040_v44, %v10070_v28  ;;  %v3150_v27 = vcombine.low %v3128_v12, %v3142_v31  ;;  %v14547_v19 = vld [vmem:[%s12698_s17 + $0x61] sm:$0xff]  ;;  %v12337_v28 = vld [vmem:[%s12698_s17 + $0x90] sm:$0xff] }
 0x145   : > { %11213 = vmatprep.mubr.msk.f32.mxu0 %vm12383_vm0, %v16755_v20  ;;  %3734 = vmatmul.mubr.f32.gmra.mrb[18].mxu1 %v3115_v5  ;;  %v10422_v4 = vcombine.low %v5459_v59, %v14197_v55  ;;  %v10424_v33 = vcombine.low %v5500_v9, %v14235_v41  ;;  %v5502_v12 = vcombine.high %v14235_v41, %v14516_v62  ;;  %v14621_v55 = vld [vmem:[%s12698_s17 + $0x68] sm:$0xff] }
 0x146   : > { %11694 = vmatpush1.bf16.msra.mxu0 %v16825_v26  ;;  %3738 = vmatprep.mubr.f32.mxu1 %v3151_v21  ;;  %v2280_v44 = vrot.slane %v2273_v42, %v12719_v37  ;;  %v12338_v26 = vld [vmem:[%s12698_s17 + $0x91] sm:$0xff]  ;;  %v14560_v31 = vrot.slane %v10338_v51, %v12719_v37  ;;  %v16827_v59 = vpack.c.bf16 %v14325_v3, %v14317_v6  ;;  %v10326_v41 = vld [vmem:[%s12698_s17 + $0xe1] sm:$0xff] }
 0x147   : > { %11695 = vmatprep.subr.bf16.mxu0 %v16752_v17  ;;  %v2289_v60 = vcombine.low %v12337_v28, %v12338_v26  ;;  %v5538_v9 = vcombine.low %v10279_v56, %v10309_v1  ;;  %v14574_v42 = vrot.slane %v5505_v50, %v12719_v37  ;;  %v5554_v6 = vcombine.low %v14544_v11, %v14547_v19  ;;  %v10289_v26 = vld [vmem:[%s12698_s17 + $0xa8] sm:$0xff]  ;;  %v16833_v51 = vld [vmem:[#allocation33_spill] sm:$0xff] }
 0x148   : > { %11214 = vmatmul.mubr.f32.gmra.mrb[26].mxu0 %v14163_v43  ;;  %16826 = vst [vmem:[#allocation25_spill] sm:$0xff] %v14560_v31  ;;  %v14579_v3 = vrot.slane %v10422_v4, %v12719_v37  ;;  %v14582_v56 = vrot.slane %v10424_v33, %v12719_v37  ;;  %11922 = vmatprep.subr.bf16.mxu1 %v16752_v17  ;;  %v16830_v4 = vld [vmem:[#allocation31_spill] sm:$0xff] }
 0x149   : > { %11216 = vmatprep.mubr.msk.f32.mxu0 %vm12383_vm0, %v16755_v20  ;;  %v2298_v21 = vrot.slane %v2289_v60, %v12719_v37  ;;  %16828 = vst [vmem:[#allocation43_spill] sm:$0xff] %v14574_v42  ;;  %3739 = vmatmul.mubr.f32.gmra.mrb[20].mxu1 %v3150_v27  ;;  %v16829_v60 = vld [vmem:[#allocation32_spill] sm:$0xff]  ;;  %v5535_v50 = vcombine.high %v14247_v16, %v14560_v31  ;;  %v16832_v33 = vld [vmem:[#allocation35_spill] sm:$0xff]  ;;  %v16837_v31 = vld [vmem:[#allocation10_spill] sm:$0xff] }
 0x14a   : > { %11697 = vmatpush1.bf16.msra.mxu0 %v16827_v59  ;;  %v10426_v27 = vcombine.low %v5502_v12, %v14247_v16  ;;  %v10319_v59 = vld [vmem:[%s12698_s17 + $0xa9] sm:$0xff]  ;;  %v2323_v57 = vcombine.high %v16831_v61, %v16830_v4  ;;  %v5563_v5 = vrot.slane %v5554_v6, %v12719_v37  ;;  %11930 = vmatpush3.bf16.msra.mxu1 %v16837_v31 }
 0x14b   : > { %11698 = vmatprep.subr.bf16.mxu0 %v16752_v17  ;;  %v2321_v1 = vcombine.high %v2298_v21, %v16829_v60  ;;  %v10194_v28 = vcombine.low %v2280_v44, %v2298_v21  ;;  %v2356_v60 = vcombine.high %v16833_v51, %v16832_v33  ;;  %v14602_v44 = vrot.slane %v5538_v9, %v12719_v37  ;;  %v14605_v12 = vld [vmem:[%s12698_s17 + $0xb0] sm:$0xff] }
 0x14c   : > { %11217 = vmatmul.mubr.f32.gmra.mrb[28].mxu0 %v14203_v10  ;;  %v16834_v10 = vpack.c.bf16 %v14354_v36, %v14346_v40  ;;  %v14608_v21 = vld [vmem:[%s12698_s17 + $0xb1] sm:$0xff]  ;;  %v5537_v33 = vcombine.high %v14288_v15, %v14574_v42  ;;  %v10198_v40 = vcombine.low %v2323_v57, %v16833_v51  ;;  %v16836_v36 = vld [vmem:[#allocation34_spill] sm:$0xff]  ;;  %v14624_v16 = vld [vmem:[%s12698_s17 + $0x69] sm:$0xff]  ;;  %v10428_v6 = vcombine.low %v5535_v50, %v14288_v15 }
 0x14d   : > { %11219 = vmatprep.mubr.msk.f32.mxu0 %vm12383_vm0, %v16755_v20  ;;  %16835 = vst [vmem:[#allocation8_spill] sm:$0xff] %v14602_v44  ;;  %v10196_v4 = vcombine.low %v2321_v1, %v16831_v61  ;;  %v3163_v43 = vrot.slane %v10194_v28, %v12719_v37  ;;  %v10200_v9 = vcombine.low %v2356_v60, %v16836_v36  ;;  %v10079_v42 = vld [vmem:[%s12698_s17 + $0xd1] sm:$0x3] }
 0x14e   : > { %11700 = vmatpush1.bf16.msra.mxu0 %v16834_v10  ;;  %v5812_v61 = vcombine.low %v10289_v26, %v10319_v59  ;;  %v5813_v1 = vcombine.high %v10289_v26, %v10319_v59  ;;  %v5847_v57 = vcombine.low %v14605_v12, %v14608_v21  ;;  %v3198_v51 = vrot.slane %v10198_v40, %v12719_v37  ;;  %v16844_v10 = vld [vmem:[#allocation39_spill] sm:$0xff] }
 0x14f   : > { %11701 = vmatprep.subr.bf16.mxu0 %v16752_v17  ;;  %v3177_v28 = vrot.slane %v10196_v4, %v12719_v37  ;;  %v3212_v60 = vrot.slane %v10200_v9, %v12719_v37  ;;  %v16838_v26 = vpack.c.bf16 %v14380_v49, %v14375_v32  ;;  %v14640_v31 = vrot.slane %v10426_v27, %v12719_v37 }
 0x150   : > { %11220 = vmatmul.mubr.f32.gmra.mrb[30].mxu0 %v14366_v2  ;;  %v10430_v59 = vcombine.low %v5537_v33, %v14602_v44  ;;  %v5555_v4 = vcombine.high %v14544_v11, %v14547_v19  ;;  %v5589_v40 = vcombine.low %v14621_v55, %v14624_v16  ;;  %v14649_v32 = vrot.slane %v5563_v5, %v12719_v37  ;;  %v10282_v19 = vld [vmem:[%s12698_s17 + $0x70] sm:$0x3]  ;;  %v10046_v44 = vld [vmem:[%s12698_s17 + $0xb8] sm:$0x3] }
 0x151   : > { %11222 = vmatprep.mubr.msk.f32.mxu0 %vm12383_vm0, %v16755_v20  ;;  %v3186_v2 = vcombine.high %v3163_v43, %v3177_v28  ;;  %v3185_v50 = vcombine.low %v3163_v43, %v3177_v28  ;;  %v3221_v9 = vcombine.high %v3198_v51, %v3212_v60  ;;  %v14652_v49 = vrot.slane %v5812_v61, %v12719_v37  ;;  %v16840_v43 = vld [vmem:[#allocation36_spill] sm:$0xff] }
 0x152   : > { %11703 = vmatpush1.bf16.msra.mxu0 %v16838_v26  ;;  %v14655_v27 = vrot.slane %v5813_v1, %v12719_v37  ;;  %v2358_v33 = vcombine.high %v16836_v36, %v16840_v43  ;;  %v14661_v11 = vrot.slane %v10428_v6, %v12719_v37  ;;  %v10312_v28 = vld [vmem:[%s12698_s17 + $0x71] sm:$0x3]  ;;  %v14666_v5 = vrot.slane %v5847_v57, %v12719_v37  ;;  %v16842_v36 = vld [vmem:[#allocation37_spill] sm:$0xff] }
 0x153   : > { %11704 = vmatprep.subr.bf16.mxu0 %v16752_v17  ;;  %3743 = vmatprep.mubr.f32.mxu1 %v3186_v2  ;;  %v3220_v61 = vcombine.low %v3198_v51, %v3212_v60  ;;  %v14673_v1 = vld [vmem:[%s16635_s1 + $0x410] sm:$0xff]  ;;  %v3247_v57 = vrot.slane %v14652_v49, %v12719_v37  ;;  %v14686_v60 = vrot.slane %v10430_v59, %v12719_v37 }
 0x154   : > { %16839 = vst [vmem:[#allocation26_spill] sm:$0xff] %v14655_v27  ;;  %11223 = vmatmul.mubr.f32.gmra.mrb[32].mxu0 %v13600_v47  ;;  %16841 = vst [vmem:[#allocation28_spill] sm:$0xff] %v14666_v5  ;;  %3744 = vmatmul.mubr.f32.gmra.mrb[22].mxu1 %v3185_v50  ;;  %v14678_v47 = vld [vmem:[%s16635_s1 + $0x418] sm:$0xff]  ;;  %v10202_v6 = vcombine.low %v2358_v33, %v16842_v36  ;;  %v3268_v51 = vrot.slane %v14655_v27, %v12719_v37  ;;  %v16843_v36 = vld [vmem:[#allocation11_spill] sm:$0xff] }
 0x155   : > { %11225 = vmatprep.mubr.msk.f32.mxu0 %vm12383_vm0, %v16755_v20  ;;  %3748 = vmatprep.mubr.f32.mxu1 %v3221_v9  ;;  %v5570_v26 = vrot.slane %v5555_v4, %v12719_v37  ;;  %v5598_v2 = vrot.slane %v5589_v40, %v12719_v37  ;;  %v3282_v50 = vrot.slane %v14666_v5, %v12719_v37  ;;  %v16860_v5 = vld [vmem:[#allocation41_spill] sm:$0xff] }
 0x156   : > { %11923 = vmatprep.subr.bf16.mxu1 %v16752_v17  ;;  %v5590_v43 = vcombine.high %v14621_v55, %v14624_v16  ;;  %v5624_v33 = vcombine.low %v10282_v19, %v10312_v28  ;;  %v3233_v59 = vrot.slane %v10202_v6, %v12719_v37  ;;  %v5898_v9 = vcombine.low %v14210_v46, %v14213_v52  ;;  %v10076_v16 = vld [vmem:[%s12698_s17 + $0xb9] sm:$0x3] }
 0x157   : > { %11931 = vmatpush3.bf16.msra.mxu1 %v16843_v36  ;;  %v5848_v55 = vcombine.high %v14605_v12, %v14608_v21  ;;  %v3291_v28 = vcombine.high %v3268_v51, %v3282_v50  ;;  %v14717_v46 = vrot.slane %v5570_v26, %v12719_v37  ;;  %v14720_v52 = vrot.slane %v5598_v2, %v12719_v37  ;;  %v14733_v26 = vld [vmem:[%s12698_s17 + $0x82] sm:$0xff] }
 0x158   : > { %11226 = vmatmul.mubr.f32.gmra.mrb[34].mxu0 %v16844_v10  ;;  %3749 = vmatmul.mubr.f32.gmra.mrb[24].mxu1 %v3220_v61  ;;  %v3256_v10 = vcombine.high %v3233_v59, %v3247_v57  ;;  %v3255_v19 = vcombine.low %v3233_v59, %v3247_v57  ;;  %v10343_v61 = vld [vmem:[%s12698_s17 + $0x7a] sm:$0xff]  ;;  %v14727_v21 = vrot.slane %v5590_v43, %v12719_v37 }
 0x159   : > { %11228 = vmatprep.mubr.msk.f32.mxu0 %vm12383_vm0, %v16755_v20  ;;  %11924 = vmatprep.subr.bf16.mxu1 %v16752_v17  ;;  %v14730_v57 = vrot.slane %v5624_v33, %v12719_v37  ;;  %v2445_v2 = vcombine.low %v10046_v44, %v10076_v16  ;;  %v14737_v59 = vrot.slane %v5898_v9, %v12719_v37  ;;  %v10295_v44 = vld [vmem:[%s12698_s17 + $0xd8] sm:$0xff] }
 0x15a   : > { %3753 = vmatprep.mubr.f32.mxu1 %v3256_v10  ;;  %v3290_v36 = vcombine.low %v3268_v51, %v3282_v50  ;;  %v16846_v43 = vcombine.high %v13795_v8, %v13795_v8  ;;  %v5642_v33 = vcombine.high %v10343_v61, %v10343_v61  ;;  %v14748_v10 = vrot.slane %v5848_v55, %v12719_v37  ;;  %v10108_v50 = vld [vmem:[%s12698_s17 + $0xca] sm:$0xff] }
 0x15b   : > { %16845 = vst [vmem:[#allocation27_spill] sm:$0xff] %v14737_v59  ;;  %v2452_v51 = vrot.slane %v2445_v2, %v12719_v37  ;;  %v14755_v9 = vrot.slane %v10343_v61, %v12719_v37  ;;  %v5934_v16 = vcombine.high %v14183_v58, %v14186_v35  ;;  %v10285_v58 = vld [vmem:[%s12698_s17 + $0x88] sm:$0x3]  ;;  %v14792_v62 = vrot.slane %v10108_v50, %v12719_v37 }
 0x15c   : > { %11229 = vmatmul.mubr.f32.gmra.mrb[36].mxu0 %v14391_v14  ;;  %3754 = vmatmul.mubr.f32.gmra.mrb[26].mxu1 %v3255_v19  ;;  %v14743_v12 = vrot.slane %v16846_v43, %v12719_v37  ;;  %16847 = vst [vmem:[#allocation29_spill] sm:$0xff] %v14748_v10  ;;  %v10325_v14 = vld [vmem:[%s12698_s17 + $0xd9] sm:$0xff]  ;;  %v16850_v43 = vld [vmem:[#allocation12_spill] sm:$0xff]  ;;  %v3303_v61 = vrot.slane %v14748_v10, %v12719_v37  ;;  %v10315_v35 = vld [vmem:[%s12698_s17 + $0x89] sm:$0x3] }
 0x15d   : > { %11231 = vmatprep.mubr.msk.f32.mxu0 %vm12383_vm0, %v16755_v20  ;;  %3758 = vmatprep.mubr.f32.mxu1 %v3291_v28  ;;  %16848 = vst [vmem:[#allocation9_spill] sm:$0xff] %v14755_v9  ;;  %v16849_v19 = vld [vmem:[#allocation38_spill] sm:$0xff]  ;;  %v10432_v28 = vcombine.low %v14730_v57, %v14468_v0  ;;  %v10204_v2 = vcombine.low %v2452_v51, %v14737_v59  ;;  %v16859_v10 = vld [vmem:[#allocation16_spill] sm:$0xff] }
 0x15e   : > { %v2493_v55 = vcombine.high %v14737_v59, %v16849_v19  ;;  %11932 = vmatpush3.bf16.msra.mxu1 %v16850_v43  ;;  %v2495_v6 = vcombine.high %v14257_v30, %v14743_v12  ;;  %v5984_v43 = vcombine.low %v10295_v44, %v10325_v14  ;;  %v2498_v51 = vcombine.high %v10108_v50, %v10108_v50  ;;  %v10113_v59 = vld [vmem:[%s12698_s17 + $0xf2] sm:$0xff] }
 0x15f   : > { %11925 = vmatprep.subr.bf16.mxu1 %v16752_v17  ;;  %v14779_v4 = vrot.slane %v5642_v33, %v12719_v37  ;;  %v5985_v40 = vcombine.high %v10295_v44, %v10325_v14  ;;  %v3317_v8 = vrot.slane %v10204_v2, %v12719_v37  ;;  %v14786_v63 = vrot.slane %v5934_v16, %v12719_v37  ;;  %v16852_v44 = vld [vmem:[#allocation13_spill] sm:$0xff]  ;;  %v16853_v16 = vld [vmem:[#allocation40_spill] sm:$0xff] }
 0x160   : > { %11232 = vmatmul.mubr.f32.gmra.mrb[38].mxu0 %v14398_v18  ;;  %3759 = vmatmul.mubr.f32.gmra.mrb[28].mxu1 %v3290_v36  ;;  %v10206_v57 = vcombine.low %v2493_v55, %v14257_v30  ;;  %v10208_v15 = vcombine.low %v2495_v6, %v14260_v38  ;;  %v10049_v18 = vld [vmem:[%s12698_s17 + $0xd0] sm:$0x3]  ;;  %v10296_v36 = vld [vmem:[%s12698_s17 + $0xe0] sm:$0xff]  ;;  %v14795_v33 = vrot.slane %v2498_v51, %v12719_v37 }
 0x161   : > { %11234 = vmatprep.mubr.msk.f32.mxu0 %vm12383_vm0, %v16755_v20  ;;  %16851 = vst [vmem:[#allocation44_spill] sm:$0xff] %v14779_v4  ;;  %v5710_v14 = vcombine.low %v10285_v58, %v10315_v35  ;;  %v3326_v2 = vcombine.high %v3303_v61, %v3317_v8  ;;  %v3325_v6 = vcombine.low %v3303_v61, %v3317_v8 }
 0x162   : > { %v3338_v55 = vrot.slane %v10206_v57, %v12719_v37  ;;  %11933 = vmatpush3.bf16.msra.mxu1 %v16852_v44  ;;  %v3352_v54 = vrot.slane %v10208_v15, %v12719_v37  ;;  %v14802_v7 = vrot.slane %v5984_v43, %v12719_v37  ;;  %v2528_v50 = vcombine.high %v14260_v38, %v14792_v62  ;;  %v14822_v44 = vld [vmem:[%s12698_s17 + $0xf8] sm:$0xff] }
 0x163   : > { %11926 = vmatprep.subr.bf16.mxu1 %v16752_v17  ;;  %v2530_v57 = vcombine.high %v14786_v63, %v14795_v33  ;;  %v2531_v51 = vcombine.low %v10049_v18, %v10079_v42  ;;  %v14811_v15 = vrot.slane %v5985_v40, %v12719_v37  ;;  %v6019_v8 = vcombine.low %v10296_v36, %v10326_v41 }
 0x164   : > { %11235 = vmatmul.mubr.f32.gmra.mrb[40].mxu0 %v16853_v16  ;;  %16854 = vst [vmem:[#allocation32_spill] sm:$0xff] %v14802_v7  ;;  %3763 = vmatprep.mubr.f32.mxu1 %v3326_v2  ;;  %v3361_v61 = vcombine.high %v3338_v55, %v3352_v54  ;;  %v6020_v58 = vcombine.high %v10296_v36, %v10326_v41  ;;  %v16856_v36 = vld [vmem:[#allocation45_spill] sm:$0xff] }
 0x165   : > { %11237 = vmatprep.mubr.msk.f32.mxu0 %vm12383_vm0, %v16755_v20  ;;  %16855 = vst [vmem:[#allocation31_spill] sm:$0xff] %v14811_v15  ;;  %3764 = vmatmul.mubr.f32.gmra.mrb[30].mxu1 %v3325_v6  ;;  %v3360_v35 = vcombine.low %v3338_v55, %v3352_v54  ;;  %v14814_v43 = vrot.slane %v2531_v51, %v12719_v37  ;;  %v10082_v51 = vld [vmem:[%s12698_s17 + $0xe9] sm:$0x3]  ;;  %v14864_v55 = vld [vmem:[%s16635_s1 + $0x420] sm:$0xff] }
 0x166   : > { %v10210_v42 = vcombine.low %v2528_v50, %v14786_v63  ;;  %v5672_v40 = vcombine.high %v14468_v0, %v14755_v9  ;;  %3768 = vmatprep.mubr.f32.mxu1 %v3361_v61  ;;  %v14826_v41 = vrot.slane %v14802_v7, %v12719_v37  ;;  %v14830_v54 = vrot.slane %v14811_v15, %v12719_v37  ;;  %v10329_v0 = vld [vmem:[%s12698_s17 + $0xf9] sm:$0xff]  ;;  %v10052_v50 = vld [vmem:[%s12698_s17 + $0xe8] sm:$0x3] }
 0x167   : > { %v14837_v2 = vrot.slane %v14727_v21, %v12719_v37  ;;  %v10212_v6 = vcombine.low %v2530_v57, %v14814_v43  ;;  %v14847_v61 = vrot.slane %v10432_v28, %v12719_v37  ;;  %v14853_v21 = vrot.slane %v14733_v26, %v12719_v37  ;;  %v14869_v28 = vld [vmem:[%s16635_s1 + $0x428] sm:$0xff]  ;;  %11934 = vmatpush3.bf16.msra.mxu1 %v16859_v10 }
 0x168   : > { %11238 = vmatmul.mubr.f32.gmra.mrb[42].mxu0 %v16856_v36  ;;  %v3373_v16 = vrot.slane %v10210_v42, %v12719_v37  ;;  %v5674_v36 = vcombine.high %v14474_v48, %v14779_v4  ;;  %v16857_v57 = vcombine.high %v14733_v26, %v14733_v26  ;;  %v14872_v18 = vrot.slane %v5710_v14, %v12719_v37 }
 0x169   : > { %11240 = vmatprep.mubr.msk.f32.mxu0 %vm12383_vm0, %v16755_v20  ;;  %v14875_v4 = vrot.slane %v6019_v8, %v12719_v37  ;;  %v14878_v26 = vrot.slane %v6020_v58, %v12719_v37  ;;  %3769 = vmatmul.mubr.f32.gmra.mrb[32].mxu1 %v3360_v35  ;;  %v10434_v9 = vcombine.low %v5672_v40, %v14474_v48 }
 0x16a   : > { %v14859_v42 = vrot.slane %v16857_v57, %v12719_v37  ;;  %v3387_v57 = vrot.slane %v10212_v6, %v12719_v37  ;;  %v6105_v15 = vcombine.low %v14822_v44, %v10329_v0  ;;  %v3431_v7 = vcombine.high %v14826_v41, %v14830_v54  ;;  %v10114_v6 = vld [vmem:[%s12698_s17 + $0xfa] sm:$0xff]  ;;  %11927 = vmatprep.subr.bf16.mxu1 %v16752_v17 }
 0x16b   : > { %v2617_v14 = vcombine.low %v10052_v50, %v10082_v51  ;;  %v16861_v8 = vrot.slane %v16860_v5, %v12719_v37  ;;  %v3443_v35 = vrot.slane %v14875_v4, %v12719_v37  ;;  %v3457_v40 = vrot.slane %v14878_v26, %v12719_v37 }
 0x16c   : > { %16858 = vst [vmem:[#allocation30_spill] sm:$0xff] %v14859_v42  ;;  %v3396_v58 = vcombine.high %v3373_v16, %v3387_v57  ;;  %v3395_v27 = vcombine.low %v3373_v16, %v3387_v57  ;;  %v16862_v48 = vcombine.high %v14446_v34, %v14452_v25  ;;  %v10436_v50 = vcombine.low %v5674_v36, %v14477_v39 }
 0x16d   : > { %11241 = vmatmul.mubr.f32.gmra.mrb[44].mxu0 %v16861_v8  ;;  %v5707_v16 = vcombine.high %v14477_v39, %v14853_v21  ;;  %v5709_v51 = vcombine.high %v14480_v22, %v14859_v42  ;;  %v6106_v57 = vcombine.high %v14822_v44, %v10329_v0  ;;  %v2624_v8 = vrot.slane %v2617_v14, %v12719_v37 }
 0x16e   : > { %7211 = vmatprep.mubr.f32.mxu0 %v16862_v48  ;;  %3773 = vmatprep.mubr.f32.mxu1 %v3396_v58  ;;  %v14910_v48 = vrot.slane %v10113_v59, %v12719_v37  ;;  %v14913_v10 = vrot.slane %v6105_v15, %v12719_v37  ;;  %v3430_v36 = vcombine.low %v14826_v41, %v14830_v54 }
 0x16f   : > { %3774 = vmatmul.mubr.f32.gmra.mrb[34].mxu1 %v3395_v27  ;;  %v2635_v5 = vcombine.high %v10113_v59, %v10113_v59  ;;  %v14918_v42 = vrot.slane %v10114_v6, %v12719_v37  ;;  %v16863_v44 = vcombine.low %v14446_v34, %v14452_v25  ;;  %v3466_v0 = vcombine.high %v3443_v35, %v3457_v40 }
 0x170   : > { %3778 = vmatprep.mubr.f32.mxu1 %v3431_v7  ;;  %v2665_v15 = vcombine.high %v14502_v23, %v14910_v48  ;;  %v10214_v14 = vcombine.low %v2624_v8, %v14502_v23  ;;  %v16864_v27 = vpack.c.bf16 %v14438_v13, %v14433_v45  ;;  %v16865_v59 = vcombine.high %v14494_v29, %v14532_v53  ;;  %v10286_v7 = vld [vmem:[%s12698_s17 + $0x90] sm:$0xff] }
 0x171   : > { %7212 = vmatmul.mubr.f32.vlgmr.msra.gmra.mrb[0].mxu0 %v16863_v44  ;;  %v14933_v41 = vrot.slane %v10434_v9, %v12719_v37  ;;  %v10438_v34 = vcombine.low %v5707_v16, %v14480_v22  ;;  %v14937_v25 = vrot.slane %v2635_v5, %v12719_v37  ;;  %v10316_v23 = vld [vmem:[%s12698_s17 + $0x91] sm:$0xff]  ;;  %v14943_v45 = vrot.slane %v6106_v57, %v12719_v37 }
 0x172   : > { %11706 = vmatpush3.bf16.msra.mxu0 %v16864_v27  ;;  %7216 = vmatprep.mubr.f32.mxu0 %v16865_v59  ;;  %v10216_v13 = vcombine.low %v2665_v15, %v14505_v24  ;;  %v3478_v54 = vrot.slane %v10214_v14, %v12719_v37  ;;  %v2700_v9 = vcombine.high %v14913_v10, %v14918_v42  ;;  %v10055_v27 = vld [vmem:[%s12698_s17 + $0x100] sm:$0x3] }
 0x173   : > { %11707 = vmatprep.subr.bf16.mxu0 %v16752_v17  ;;  %v14950_v58 = vrot.slane %v10436_v50, %v12719_v37  ;;  %3779 = vmatmul.mubr.f32.gmra.mrb[36].mxu1 %v3430_v36  ;;  %v3465_v5 = vcombine.low %v3443_v35, %v3457_v40  ;;  %v2667_v16 = vcombine.high %v14505_v24, %v14937_v25  ;;  %v10085_v50 = vld [vmem:[%s12698_s17 + $0x101] sm:$0x3]  ;;  %v10413_v36 = vld [vmem:[%s16635_s1 + $0x438] sm:$0xff] }
 0x174   : > { %v2670_v8 = vcombine.high %v10114_v6, %v10114_v6  ;;  %v16866_v57 = vcombine.low %v14494_v29, %v14532_v53  ;;  %v10440_v44 = vcombine.low %v5709_v51, %v14872_v18  ;;  %3783 = vmatprep.mubr.f32.mxu1 %v3466_v0  ;;  %v3492_v15 = vrot.slane %v10216_v13, %v12719_v37  ;;  %v10412_v51 = vld [vmem:[%s16635_s1 + $0x430] sm:$0xff] }
 0x175   : > { %v10220_v14 = vcombine.low %v2700_v9, %v14943_v45  ;;  %v16867_v35 = vcombine.high %v14579_v3, %v14582_v56  ;;  %v16868_v40 = vpack.c.bf16 %v14678_v47, %v14673_v1  ;;  %v5726_v6 = vcombine.low %v10286_v7, %v10316_v23 }
 0x176   : > { %7217 = vmatmul.mubr.f32.gmra.mrb[2].mxu0 %v16866_v57  ;;  %v5727_v29 = vcombine.high %v10286_v7, %v10316_v23  ;;  %v10218_v53 = vcombine.low %v2667_v16, %v14913_v10  ;;  %v2494_v0 = vcombine.low %v14257_v30, %v14743_v12  ;;  %v3501_v59 = vcombine.high %v3478_v54, %v3492_v15 }
 0x177   : > { %7221 = vmatprep.mubr.f32.mxu0 %v16867_v35  ;;  %11709 = vmatpush3.bf16.msra.mxu0 %v16868_v40  ;;  %v3527_v1 = vrot.slane %v10220_v14, %v12719_v37  ;;  %v14980_v47 = vrot.slane %v2670_v8, %v12719_v37  ;;  %v3500_v7 = vcombine.low %v3478_v54, %v3492_v15  ;;  %v10414_v15 = vld [vmem:[%s16635_s1 + $0x440] sm:$0xff]  ;;  %v16872_v14 = vld [vmem:[#allocation20_spill] sm:$0xff] }
 0x178   : > { %11710 = vmatprep.subr.bf16.mxu0 %v16752_v17  ;;  %3784 = vmatmul.mubr.f32.gmra.mrb[38].mxu1 %v3465_v5  ;;  %v3513_v23 = vrot.slane %v10218_v53, %v12719_v37  ;;  %v2703_v13 = vcombine.low %v10055_v27, %v10085_v50  ;;  %v16869_v9 = vcombine.low %v14579_v3, %v14582_v56  ;;  %v10288_v50 = vld [vmem:[%s12698_s17 + $0xa0] sm:$0x3]  ;;  %v10349_v40 = vld [vmem:[%s12698_s17 + $0xaa] sm:$0xff] }
 0x179   : > { %v14988_v16 = vrot.slane %v10438_v34, %v12719_v37  ;;  %v14991_v30 = vrot.slane %v10440_v44, %v12719_v37  ;;  %3788 = vmatprep.mubr.f32.mxu1 %v3501_v59  ;;  %v2702_v54 = vcombine.high %v14943_v45, %v14980_v47  ;;  %v16870_v5 = vcombine.high %v14640_v31, %v14661_v11  ;;  %v10318_v35 = vld [vmem:[%s12698_s17 + $0xa1] sm:$0x3] }
 0x17a   : > { %7222 = vmatmul.mubr.f32.gmra.mrb[4].mxu0 %v16869_v9  ;;  %v16871_v3 = vpack.c.bf16 %v14869_v28, %v14864_v55  ;;  %v5735_v56 = vrot.slane %v5726_v6, %v12719_v37  ;;  %v11714_v34 = vpack.c.bf16 %v10413_v36, %v10412_v51  ;;  %v3536_v8 = vcombine.high %v3513_v23, %v3527_v1  ;;  %v10415_v55 = vld [vmem:[%s16635_s1 + $0x448] sm:$0xff] }
 0x17b   : > { %7226 = vmatprep.mubr.f32.mxu0 %v16870_v5  ;;  %v6533_v57 = vcombine.low %v14837_v2, %v14847_v61  ;;  %v6569_v44 = vcombine.high %v14933_v41, %v14950_v58  ;;  %v15014_v28 = vrot.slane %v2703_v13, %v12719_v37  ;;  %11935 = vmatpush3.bf16.msra.mxu1 %v16872_v14  ;;  %v10417_v5 = vld [vmem:[%s16635_s1 + $0x458] sm:$0xff] }
 0x17c   : > { %11712 = vmatpush3.bf16.msra.mxu0 %v16871_v3  ;;  %v5742_v27 = vrot.slane %v5727_v29, %v12719_v37  ;;  %3789 = vmatmul.mubr.f32.gmra.mrb[40].mxu1 %v3500_v7  ;;  %v3535_v6 = vcombine.low %v3513_v23, %v3527_v1  ;;  %v2527_v53 = vcombine.low %v14260_v38, %v14792_v62  ;;  %v15033_v1 = vld.sshfl [vmem:[%s12698_s17 + $0xd2] sm:$0x3 pattern:$0x76325410]  ;;  %v10355_v3 = vld [vmem:[%s12698_s17 + $0xda] sm:$0xff] }
 0x17d   : > { %11713 = vmatprep.subr.bf16.mxu0 %v16752_v17  ;;  %v10207_v51 = vcombine.high %v16849_v19, %v2494_v0  ;;  %v16873_v36 = vcombine.low %v14640_v31, %v14661_v11  ;;  %v6568_v59 = vcombine.low %v14933_v41, %v14950_v58  ;;  %v6604_v29 = vcombine.high %v14988_v16, %v14991_v30  ;;  %v10287_v31 = vld [vmem:[%s12698_s17 + $0x98] sm:$0xff] }
 0x17e   : > { %3793 = vmatprep.mubr.f32.mxu1 %v3536_v8  ;;  %v10222_v7 = vcombine.low %v2702_v54, %v15014_v28  ;;  %v16874_v38 = vcombine.high %v14686_v60, %v14649_v32  ;;  %v15039_v19 = vrot.slane %v5735_v56, %v12719_v37  ;;  %v10317_v11 = vld [vmem:[%s12698_s17 + $0x99] sm:$0xff]  ;;  %v11717_v0 = vpack.c.bf16 %v10415_v55, %v10414_v15  ;;  %v10416_v54 = vld [vmem:[%s16635_s1 + $0x450] sm:$0xff] }
 0x17f   : > { %7227 = vmatmul.mubr.f32.gmra.mrb[6].mxu0 %v16873_v36  ;;  %v10209_v23 = vcombine.high %v14743_v12, %v2527_v53  ;;  %v5796_v13 = vcombine.low %v10288_v50, %v10318_v35  ;;  %v15045_v9 = vrot.slane %v10349_v40, %v12719_v37  ;;  %v2529_v12 = vcombine.low %v14786_v63, %v14795_v33 }
 0x180   : > { %7231 = vmatprep.mubr.f32.mxu0 %v16874_v38  ;;  %11715 = vmatpush3.bf16.msra.mxu0 %v11714_v34  ;;  %v3546_v56 = vrot.slane %v10222_v7, %v12719_v37  ;;  %v15059_v34 = vrot.slane %v5742_v27, %v12719_v37  ;;  %v3345_v8 = vrot.slane %v10207_v51, %v12719_v37  ;;  %v10356_v7 = vld [vmem:[%s12698_s17 + $0xe2] sm:$0xff] }
 0x181   : > { %11716 = vmatprep.subr.bf16.mxu0 %v16752_v17  ;;  %3794 = vmatmul.mubr.f32.gmra.mrb[42].mxu1 %v3535_v6  ;;  %v3359_v15 = vrot.slane %v10209_v23, %v12719_v37  ;;  %v2546_v55 = vcombine.low %v14814_v43, %v15033_v1  ;;  %v16875_v14 = vcombine.low %v14686_v60, %v14649_v32  ;;  %v10418_v60 = vld [vmem:[%s16635_s1 + $0x460] sm:$0xff] }
 0x182   : > { %v5761_v50 = vcombine.low %v10287_v31, %v10317_v11  ;;  %v5814_v35 = vcombine.high %v10349_v40, %v10349_v40  ;;  %v3554_v53 = vcombine.high %v3546_v56, %v3546_v56  ;;  %v10211_v36 = vcombine.high %v14792_v62, %v2529_v12  ;;  %v10419_v40 = vld [vmem:[%s16635_s1 + $0x468] sm:$0xff] }
 0x183   : > { %7232 = vmatmul.mubr.f32.gmra.mrb[8].mxu0 %v16875_v14  ;;  %v16876_v27 = vcombine.high %v14717_v46, %v14720_v52  ;;  %v11720_v6 = vpack.c.bf16 %v10417_v5, %v10416_v54  ;;  %v5986_v51 = vcombine.high %v10355_v3, %v10355_v3  ;;  %v10213_v38 = vcombine.high %v14795_v33, %v2546_v55 }
 0x184   : > { %11718 = vmatpush3.bf16.msra.mxu0 %v11717_v0  ;;  %v5762_v43 = vcombine.high %v10287_v31, %v10317_v11  ;;  %v5803_v23 = vrot.slane %v5796_v13, %v12719_v37  ;;  %v5844_v32 = vcombine.high %v14652_v49, %v15045_v9  ;;  %3798 = vmatprep.mubr.f32.mxu1 %v3554_v53 }
 0x185   : > { %7236 = vmatprep.mubr.f32.mxu0 %v16876_v27  ;;  %11719 = vmatprep.subr.bf16.mxu0 %v16752_v17  ;;  %v6603_v31 = vcombine.low %v14988_v16, %v14991_v30  ;;  %v3362_v11 = vcombine.low %v3345_v8, %v3359_v15  ;;  %v3380_v0 = vrot.slane %v10211_v36, %v12719_v37  ;;  %v10350_v8 = vld [vmem:[%s12698_s17 + $0xb2] sm:$0xff]  ;;  %v16879_v36 = vld [vmem:[#allocation26_spill] sm:$0xff] }
 0x186   : > { %3799 = vmatmul.mubr.f32.gmra.mrb[44].mxu1 %v3546_v56  ;;  %v3394_v13 = vrot.slane %v10213_v38, %v12719_v37  ;;  %v16877_v54 = vcombine.low %v14717_v46, %v14720_v52  ;;  %v6639_v5 = vcombine.high %v15039_v19, %v15059_v34  ;;  %v15094_v12 = vrot.slane %v5814_v35, %v12719_v37  ;;  %v15124_v38 = vld.sshfl [vmem:[%s12698_s17 + $0xea] sm:$0x3 pattern:$0x76325410] }
 0x187   : > { %v6021_v55 = vcombine.high %v10356_v7, %v10356_v7  ;;  %11121 = vmatprep.mubr.msk.f32.mxu1 %vm12383_vm0, %v16755_v20  ;;  %v16878_v56 = vcombine.high %v14837_v2, %v14847_v61  ;;  %v15103_v46 = vrot.slane %v10355_v3, %v12719_v37  ;;  %v15106_v52 = vrot.slane %v5986_v51, %v12719_v37  ;;  %v10421_v3 = vld [vmem:[%s16635_s1 + $0x478] sm:$0xff] }
 0x188   : > { %7237 = vmatmul.mubr.f32.gmra.mrb[10].mxu0 %v16877_v54  ;;  %v11723_v15 = vpack.c.bf16 %v10419_v40, %v10418_v60  ;;  %v5770_v14 = vrot.slane %v5761_v50, %v12719_v37  ;;  %v5777_v35 = vrot.slane %v5762_v43, %v12719_v37  ;;  %v10442_v53 = vcombine.low %v5803_v23, %v14652_v49  ;;  %v10321_v40 = vld [vmem:[%s12698_s17 + $0xb9] sm:$0x3] }
 0x189   : > { %7241 = vmatprep.mubr.f32.mxu0 %v16878_v56  ;;  %11721 = vmatpush3.bf16.msra.mxu0 %v11720_v6  ;;  %v10444_v27 = vcombine.low %v5844_v32, %v16879_v36  ;;  %v10420_v6 = vld [vmem:[%s16635_s1 + $0x470] sm:$0xff]  ;;  %v3397_v51 = vcombine.low %v3380_v0, %v3394_v13  ;;  %v3415_v50 = vrot.slane %v15103_v46, %v12719_v37 }
 0x18a   : > { %11722 = vmatprep.subr.bf16.mxu0 %v16752_v17  ;;  %11122 = vmatmul.mubr.f32.vlgmr.msra.gmra.mrb[32].mxu1 %v3362_v11  ;;  %v3429_v49 = vrot.slane %v15106_v52, %v12719_v37  ;;  %v2666_v43 = vcombine.low %v14505_v24, %v14937_v25  ;;  %v15132_v23 = vrot.slane %v10350_v8, %v12719_v37 }
 0x18b   : > { %v15135_v32 = vrot.slane %v10356_v7, %v12719_v37  ;;  %v15138_v60 = vrot.slane %v6021_v55, %v12719_v37  ;;  %11124 = vmatprep.mubr.msk.f32.mxu1 %vm12383_vm0, %v16755_v20  ;;  %v5846_v24 = vcombine.high %v16879_v36, %v15094_v12  ;;  %v5849_v2 = vcombine.high %v10350_v8, %v10350_v8 }
 0x18c   : > { %7242 = vmatmul.mubr.f32.gmra.mrb[12].mxu0 %v6533_v57  ;;  %v11726_v61 = vpack.c.bf16 %v10421_v3, %v10420_v6  ;;  %v10291_v57 = vld [vmem:[%s12698_s17 + $0xb8] sm:$0x3]  ;;  %v10215_v0 = vcombine.low %v15124_v38, %v14910_v48  ;;  %v6651_v13 = vrot.slane %v5770_v14, %v12719_v37  ;;  %v3432_v54 = vcombine.low %v3415_v50, %v3429_v49 }
 0x18d   : > { %7246 = vmatprep.mubr.f32.mxu0 %v6569_v44  ;;  %11724 = vmatpush3.bf16.msra.mxu0 %v11723_v15  ;;  %v3450_v7 = vrot.slane %v15135_v32, %v12719_v37  ;;  %v3464_v11 = vrot.slane %v15138_v60, %v12719_v37  ;;  %v10217_v44 = vcombine.high %v14910_v48, %v2666_v43  ;;  %v16880_v15 = vld [vmem:[#allocation28_spill] sm:$0xff]  ;;  %v16881_v43 = vld [vmem:[#allocation29_spill] sm:$0xff] }
 0x18e   : > { %11725 = vmatprep.subr.bf16.mxu0 %v16752_v17  ;;  %11125 = vmatmul.mubr.f32.gmra.mrb[34].mxu1 %v3397_v51  ;;  %v2699_v55 = vcombine.low %v14913_v10, %v14918_v42  ;;  %v2701_v17 = vcombine.low %v14943_v45, %v14980_v47  ;;  %v6665_v56 = vrot.slane %v5777_v35, %v12719_v37 }
 0x18f   : > { %v15167_v8 = vrot.slane %v10442_v53, %v12719_v37  ;;  %v5879_v14 = vcombine.high %v16880_v15, %v15132_v23  ;;  %11127 = vmatprep.mubr.msk.f32.mxu1 %vm12383_vm0, %v16755_v20  ;;  %v6700_v6 = vrot.slane %v10444_v27, %v12719_v37  ;;  %v15178_v41 = vrot.slane %v5849_v2, %v12719_v37  ;;  %v15198_v2 = vld.sshfl [vmem:[%s12698_s17 + $0x102] sm:$0x3 pattern:$0x76325410] }
 0x190   : > { %7247 = vmatmul.mubr.f32.gmra.mrb[14].mxu0 %v6568_v59  ;;  %v5882_v58 = vcombine.low %v10291_v57, %v10321_v40  ;;  %v10446_v59 = vcombine.low %v5846_v24, %v16880_v15  ;;  %v3467_v35 = vcombine.low %v3450_v7, %v3464_v11  ;;  %v3485_v53 = vrot.slane %v10215_v0, %v12719_v37  ;;  %v10294_v40 = vld [vmem:[%s12698_s17 + $0xd0] sm:$0x3] }
 0x191   : > { %7251 = vmatprep.mubr.f32.mxu0 %v6604_v29  ;;  %11727 = vmatpush3.bf16.msra.mxu0 %v11726_v61  ;;  %v3499_v3 = vrot.slane %v10217_v44, %v12719_v37  ;;  %v10219_v51 = vcombine.high %v14937_v25, %v2699_v55  ;;  %v10221_v29 = vcombine.high %v14918_v42, %v2701_v17  ;;  %v10324_v7 = vld [vmem:[%s12698_s17 + $0xd1] sm:$0x3] }
 0x192   : > { %11128 = vmatmul.mubr.f32.gmra.mrb[36].mxu1 %v3432_v54  ;;  %v10453_v27 = vcombine.low %v15033_v1, %v15103_v46  ;;  %v6833_v50 = vrot.slane %v14795_v33, %v12719_v37  ;;  %v6638_v49 = vcombine.low %v15039_v19, %v15059_v34  ;;  %v10448_v24 = vcombine.low %v5879_v14, %v16881_v43 }
 0x193   : > { %11130 = vmatprep.mubr.msk.f32.mxu1 %vm12383_vm0, %v16755_v20  ;;  %v6674_v1 = vcombine.high %v6651_v13, %v6665_v56  ;;  %v5881_v33 = vcombine.high %v16881_v43, %v15178_v41  ;;  %v15206_v16 = vrot.slane %v5882_v58, %v12719_v37  ;;  %v6709_v61 = vcombine.high %v15167_v8, %v6700_v6 }
 0x194   : > { %7252 = vmatmul.mubr.f32.gmra.mrb[16].mxu0 %v6603_v31  ;;  %v6847_v30 = vrot.slane %v10453_v27, %v12719_v37  ;;  %v6673_v31 = vcombine.low %v6651_v13, %v6665_v56  ;;  %v6721_v57 = vrot.slane %v10446_v59, %v12719_v37  ;;  %v3502_v11 = vcombine.low %v3485_v53, %v3499_v3  ;;  %v10327_v53 = vld [vmem:[%s12698_s17 + $0xe9] sm:$0x3] }
 0x195   : > { %7256 = vmatprep.mubr.f32.mxu0 %v6639_v5  ;;  %v3520_v19 = vrot.slane %v10219_v51, %v12719_v37  ;;  %v3534_v34 = vrot.slane %v10221_v29, %v12719_v37  ;;  %v2718_v5 = vcombine.low %v15014_v28, %v15198_v2  ;;  %v6735_v44 = vrot.slane %v10448_v24, %v12719_v37  ;;  %v16882_v51 = vld [vmem:[#allocation27_spill] sm:$0xff] }
 0x196   : > { %11131 = vmatmul.mubr.f32.gmra.mrb[38].mxu1 %v3467_v35  ;;  %v15217_v0 = vcombine.low %v6833_v50, %v6847_v30  ;;  %v6938_v13 = vrot.slane %v14910_v48, %v12719_v37  ;;  %v6952_v54 = vrot.slane %v14937_v25, %v12719_v37  ;;  %v10450_v55 = vcombine.low %v5881_v33, %v15206_v16  ;;  %v10297_v35 = vld [vmem:[%s12698_s17 + $0xe8] sm:$0x3] }
 0x197   : > { %11133 = vmatprep.mubr.msk.f32.mxu1 %vm12383_vm0, %v16755_v20  ;;  %v5968_v28 = vcombine.low %v10294_v40, %v10324_v7  ;;  %v6973_v17 = vrot.slane %v14918_v42, %v12719_v37  ;;  %v6987_v56 = vrot.slane %v14980_v47, %v12719_v37  ;;  %v3537_v58 = vcombine.low %v3520_v19, %v3534_v34  ;;  %v16884_v33 = vld [vmem:[#allocation31_spill] sm:$0xff] }
 0x198   : > { %7257 = vmatmul.mubr.f32.gmra.mrb[18].mxu0 %v6638_v49  ;;  %v15231_v14 = vcombine.low %v6938_v13, %v6952_v54  ;;  %v10223_v59 = vcombine.high %v14980_v47, %v2718_v5  ;;  %v6708_v25 = vcombine.low %v15167_v8, %v6700_v6  ;;  %v6744_v42 = vcombine.high %v6721_v57, %v6735_v44  ;;  %v16883_v49 = vld [vmem:[#allocation32_spill] sm:$0xff]  ;;  %v10301_v5 = vld [vmem:[%s12698_s17 + $0x108] sm:$0xff] }
 0x199   : > { %7261 = vmatprep.mubr.f32.mxu0 %v6674_v1  ;;  %v15234_v48 = vcombine.low %v6973_v17, %v6987_v56  ;;  %v6756_v3 = vrot.slane %v10450_v55, %v12719_v37  ;;  %v6770_v29 = vrot.slane %v16882_v51, %v12719_v37  ;;  %v5975_v27 = vrot.slane %v5968_v28, %v12719_v37  ;;  %v10300_v55 = vld [vmem:[%s12698_s17 + $0x100] sm:$0x3]  ;;  %v16886_v56 = vld [vmem:[#allocation17_spill] sm:$0xff] }
 0x19a   : > { %11134 = vmatmul.mubr.f32.gmra.mrb[40].mxu1 %v3502_v11  ;;  %v6054_v47 = vcombine.low %v10297_v35, %v10327_v53  ;;  %v3553_v50 = vrot.slane %v10223_v59, %v12719_v37  ;;  %v6743_v8 = vcombine.low %v6721_v57, %v6735_v44  ;;  %v6016_v1 = vcombine.high %v16883_v49, %v15103_v46  ;;  %v10331_v44 = vld [vmem:[%s12698_s17 + $0x109] sm:$0xff]  ;;  %v10330_v28 = vld [vmem:[%s12698_s17 + $0x101] sm:$0x3] }
 0x19b   : > { %11136 = vmatprep.mubr.msk.f32.mxu1 %vm12383_vm0, %v16755_v20  ;;  %v6779_v6 = vcombine.high %v6756_v3, %v6770_v29  ;;  %v10452_v24 = vcombine.low %v5975_v27, %v16883_v49  ;;  %v6018_v30 = vcombine.high %v16884_v33, %v15106_v52  ;;  %v6778_v40 = vcombine.low %v6756_v3, %v6770_v29  ;;  %v10361_v53 = vld [vmem:[%s12698_s17 + $0x10a] sm:$0xff] }
 0x19c   : > { %7262 = vmatmul.mubr.f32.gmra.mrb[20].mxu0 %v6673_v31  ;;  %v6051_v31 = vcombine.high %v14875_v4, %v15135_v32  ;;  %v15258_v57 = vrot.slane %v6054_v47, %v12719_v37  ;;  %v6826_v7 = vrot.slane %v14786_v63, %v12719_v37  ;;  %v10454_v19 = vcombine.low %v6016_v1, %v16884_v33  ;;  %v16885_v63 = vld [vmem:[#allocation15_spill] sm:$0xff]  ;;  %v10332_v3 = vld [vmem:[%s12698_s17 + $0x111] sm:$0xff] }
 0x19d   : > { %7266 = vmatprep.mubr.f32.mxu0 %v6709_v61  ;;  %v6053_v61 = vcombine.high %v14878_v26, %v15138_v60  ;;  %v6840_v11 = vrot.slane %v10452_v24, %v12719_v37  ;;  %v10456_v34 = vcombine.low %v6018_v30, %v14875_v4  ;;  %v6156_v17 = vcombine.low %v10301_v5, %v10331_v44 }
 0x19e   : > { %11137 = vmatmul.mubr.f32.gmra.mrb[42].mxu1 %v3537_v58  ;;  %v10458_v13 = vcombine.low %v6051_v31, %v14878_v26  ;;  %v16887_v58 = vcombine.high %v16885_v63, %v16886_v56  ;;  %v6140_v47 = vcombine.low %v10300_v55, %v10330_v28  ;;  %v15286_v49 = vrot.slane %v10361_v53, %v12719_v37  ;;  %v10362_v31 = vld [vmem:[%s12698_s17 + $0x112] sm:$0xff] }
 0x19f   : > { %11139 = vmatprep.mubr.msk.f32.mxu1 %vm12383_vm0, %v16755_v20  ;;  %v10460_v54 = vcombine.low %v6053_v61, %v15258_v57  ;;  %v6849_v59 = vcombine.high %v6826_v7, %v6840_v11  ;;  %v6875_v35 = vrot.slane %v10456_v34, %v12719_v37  ;;  %v6848_v51 = vcombine.low %v6826_v7, %v6840_v11  ;;  %v10303_v55 = vld [vmem:[%s12698_s17 + $0x118] sm:$0x3] }
 0x1a0   : > { %7267 = vmatmul.mubr.f32.gmra.mrb[22].mxu0 %v6708_v25  ;;  %v6861_v25 = vrot.slane %v10454_v19, %v12719_v37  ;;  %v6896_v29 = vrot.slane %v10458_v13, %v12719_v37  ;;  %v6158_v24 = vcombine.high %v10361_v53, %v10361_v53  ;;  %v6147_v7 = vrot.slane %v6140_v47, %v12719_v37  ;;  %v10333_v28 = vld [vmem:[%s12698_s17 + $0x119] sm:$0x3] }
 0x1a1   : > { %7271 = vmatprep.mubr.f32.mxu0 %v6744_v42  ;;  %v10302_v42 = vld [vmem:[%s12698_s17 + $0x110] sm:$0xff]  ;;  %v6910_v27 = vrot.slane %v10460_v54, %v12719_v37  ;;  %v15301_v13 = vrot.slane %v10362_v31, %v12719_v37  ;;  %v6193_v54 = vcombine.high %v10362_v31, %v10362_v31 }
 0x1a2   : > { %11140 = vmatmul.mubr.f32.gmra.mrb[44].mxu1 %v3553_v50  ;;  %v16888_v50 = vcombine.low %v16885_v63, %v16886_v56  ;;  %v6884_v1 = vcombine.high %v6861_v25, %v6875_v35  ;;  %v6191_v30 = vcombine.low %v10302_v42, %v10332_v3  ;;  %v6883_v61 = vcombine.low %v6861_v25, %v6875_v35  ;;  %v10334_v31 = vld [vmem:[%s12698_s17 + $0x32] sm:$0xff] }
 0x1a3   : > { %v15295_v34 = vrot.slane %v6158_v24, %v12719_v37  ;;  %v6966_v63 = vrot.slane %v14913_v10, %v12719_v37  ;;  %v6980_v56 = vrot.slane %v14943_v45, %v12719_v37  ;;  %v15318_v10 = vrot.slane %v6193_v54, %v12719_v37 }
 0x1a4   : > { %7272 = vmatmul.mubr.f32.gmra.mrb[24].mxu0 %v6743_v8  ;;  %v6157_v8 = vcombine.high %v10301_v5, %v10331_v44  ;;  %v6192_v5 = vcombine.high %v10302_v42, %v10332_v3  ;;  %v15298_v44 = vrot.slane %v6191_v30, %v12719_v37  ;;  %v6226_v42 = vcombine.low %v10303_v55, %v10333_v28 }
 0x1a5   : > { %7276 = vmatprep.mubr.f32.mxu0 %v6779_v6  ;;  %v6165_v6 = vrot.slane %v6156_v17, %v12719_v37  ;;  %v6918_v17 = vcombine.low %v6896_v29, %v6910_v27  ;;  %v6989_v45 = vcombine.high %v6966_v63, %v6980_v56  ;;  %v6988_v30 = vcombine.low %v6966_v63, %v6980_v56 }
 0x1a6   : > { %v15291_v11 = vrot.slane %v6157_v8, %v12719_v37  ;;  %v15313_v35 = vrot.slane %v6192_v5, %v12719_v37  ;;  %v6223_v53 = vcombine.high %v15298_v44, %v15301_v13  ;;  %v15330_v24 = vrot.slane %v6226_v42, %v12719_v37 }
 0x1a7   : > { %v6188_v19 = vcombine.high %v6165_v6, %v15286_v49  ;;  %v5384_v5 = vcombine.high %v10334_v31, %v10334_v31  ;;  %v5405_v63 = vrot.slane %v10334_v31, %v12719_v37 }
 0x1a8   : > { %7277 = vmatmul.mubr.f32.gmra.mrb[26].mxu0 %v6778_v40  ;;  %v6919_v40 = vcombine.high %v6896_v29, %v6910_v27  ;;  %v6190_v25 = vcombine.high %v15291_v11, %v15295_v34  ;;  %v16889_v29 = vld [vmem:[#allocation24_spill] sm:$0xff]  ;;  %v16890_v27 = vld [vmem:[#allocation23_spill] sm:$0xff]  ;;  %v10468_v8 = vcombine.low %v6223_v53, %v15313_v35 }
 0x1a9   : > { %7281 = vmatprep.mubr.f32.mxu0 %v16887_v58  ;;  %v10462_v58 = vcombine.low %v6147_v7, %v6165_v6  ;;  %v16891_v47 = vcombine.high %v16889_v29, %v16890_v27  ;;  %v6225_v6 = vcombine.high %v15313_v35, %v15318_v10  ;;  %v5412_v56 = vrot.slane %v5384_v5, %v12719_v37  ;;  %v16899_v5 = vld [vmem:[#allocation18_spill] sm:$0xff] }
 0x1aa   : > { %v7050_v7 = vrot.slane %v10468_v8, %v12719_v37  ;;  %v6308_v53 = vrot.slane %v5405_v63, %v12719_v37  ;;  %v16895_v8 = vld [vmem:[#allocation21_spill] sm:$0xff] }
 0x1ab   : > { %v7001_v3 = vrot.slane %v10462_v58, %v12719_v37  ;;  %v6322_v42 = vrot.slane %v5412_v56, %v12719_v37 }
 0x1ac   : > { %7282 = vmatmul.mubr.f32.gmra.mrb[28].mxu0 %v16888_v50  ;;  %v10466_v50 = vcombine.low %v6190_v25, %v15298_v44 }
 0x1ad   : > { %7286 = vmatprep.mubr.f32.mxu0 %v6849_v59  ;;  %v10464_v59 = vcombine.low %v6188_v19, %v15291_v11  ;;  %v10470_v19 = vcombine.low %v6225_v6, %v15330_v24 }
 0x1af   : > { %v7069_v28 = vrot.slane %v10470_v19, %v12719_v37  ;;  %v16898_v19 = vld [vmem:[#allocation43_spill] sm:$0xff] }
 0x1b0   : > { %7287 = vmatmul.mubr.f32.gmra.mrb[30].mxu0 %v6848_v51  ;;  %v7015_v51 = vrot.slane %v10464_v59, %v12719_v37 }
 0x1b1   : > { %7291 = vmatprep.mubr.f32.mxu0 %v6884_v1  ;;  %v16892_v1 = vcombine.low %v16889_v29, %v16890_v27  ;;  %v7077_v25 = vcombine.high %v7069_v28, %v7069_v28 }
 0x1b2   : > { %v7023_v54 = vcombine.low %v7001_v3, %v7015_v51 }
 0x1b4   : > { %7292 = vmatmul.mubr.f32.gmra.mrb[32].mxu0 %v6883_v61  ;;  %v7024_v61 = vcombine.high %v7001_v3, %v7015_v51  ;;  %v16894_v3 = vld [vmem:[#allocation14_spill] sm:$0xff] }
 0x1b5   : > { %7296 = vmatprep.mubr.f32.mxu0 %v6919_v40  ;;  %v7036_v40 = vrot.slane %v10466_v50, %v12719_v37  ;;  %v6325_v50 = vcombine.low %v6308_v53, %v6322_v42  ;;  %v10340_v53 = vld [vmem:[%s12698_s17 + $0x62] sm:$0xff] }
 0x1b7   : > { %v7059_v55 = vcombine.high %v7036_v40, %v7050_v7  ;;  %v7058_v58 = vcombine.low %v7036_v40, %v7050_v7  ;;  %v16897_v40 = vld [vmem:[#allocation19_spill] sm:$0xff] }
 0x1b8   : > { %7297 = vmatmul.mubr.f32.gmra.mrb[34].mxu0 %v6918_v17  ;;  %v10335_v17 = vld [vmem:[%s12698_s17 + $0x3a] sm:$0xff] }
 0x1b9   : > { %7301 = vmatprep.mubr.f32.mxu0 %v16891_v47  ;;  %v5419_v59 = vcombine.high %v10335_v17, %v10335_v17  ;;  %v5440_v29 = vrot.slane %v10335_v17, %v12719_v37  ;;  %v10364_v47 = vld.sshfl [vmem:[%s12698_s17 + $0x42] sm:$0x3 pattern:$0x76325410] }
 0x1ba   : > { %v10423_v6 = vcombine.low %v10364_v47, %v16895_v8  ;;  %v10341_v47 = vld [vmem:[%s12698_s17 + $0x6a] sm:$0xff] }
 0x1bb   : > { %v5447_v27 = vrot.slane %v5419_v59, %v12719_v37  ;;  %v16900_v59 = vld [vmem:[#allocation8_spill] sm:$0xff] }
 0x1bc   : > { %7302 = vmatmul.mubr.f32.gmra.mrb[36].mxu0 %v16892_v1  ;;  %v6378_v17 = vrot.slane %v10423_v6, %v12719_v37  ;;  %v5591_v6 = vcombine.high %v10341_v47, %v10341_v47 }
 0x1bd   : > { %7306 = vmatprep.mubr.f32.mxu0 %v6989_v45  ;;  %v16893_v45 = vld [vmem:[#allocation22_spill] sm:$0xff]  ;;  %v6357_v31 = vrot.slane %v5447_v27, %v12719_v37  ;;  %v5577_v27 = vrot.slane %v10340_v53, %v12719_v37 }
 0x1be   : > { %v5501_v51 = vcombine.low %v16894_v3, %v16893_v45  ;;  %v5556_v3 = vcombine.high %v10340_v53, %v10340_v53 }
 0x1c0   : > { %7307 = vmatmul.mubr.f32.gmra.mrb[38].mxu0 %v6988_v30  ;;  %v10425_v1 = vcombine.high %v16895_v8, %v5501_v51  ;;  %v6343_v30 = vrot.slane %v5440_v29, %v12719_v37  ;;  %v5612_v8 = vrot.slane %v10341_v47, %v12719_v37 }
 0x1c1   : > { %7311 = vmatprep.mubr.f32.mxu0 %v7024_v61  ;;  %v16896_v61 = vld [vmem:[#allocation25_spill] sm:$0xff] }
 0x1c2   : > { %v5534_v7 = vcombine.low %v16897_v40, %v16896_v61  ;;  %v6392_v63 = vrot.slane %v10425_v1, %v12719_v37 }
 0x1c4   : > { %7312 = vmatmul.mubr.f32.gmra.mrb[40].mxu0 %v7023_v54  ;;  %v5536_v54 = vcombine.low %v16899_v5, %v16898_v19  ;;  %v10427_v56 = vcombine.high %v16893_v45, %v5534_v7  ;;  %v6395_v42 = vcombine.low %v6378_v17, %v6392_v63  ;;  %v6497_v7 = vrot.slane %v5612_v8, %v12719_v37  ;;  %v16901_v5 = vld [vmem:[#allocation9_spill] sm:$0xff]  ;;  %v16902_v17 = vld [vmem:[#allocation44_spill] sm:$0xff]  ;;  %v16903_v63 = vld [vmem:[#allocation42_spill] sm:$0xff] }
 0x1c5   : > { %7316 = vmatprep.mubr.f32.mxu0 %v7059_v55  ;;  %v10365_v55 = vld.sshfl [vmem:[%s12698_s17 + $0x5a] sm:$0x3 pattern:$0x76325410] }
 0x1c6   : > { %v6413_v51 = vrot.slane %v10427_v56, %v12719_v37  ;;  %v5706_v56 = vcombine.low %v14477_v39, %v14853_v21 }
 0x1c8   : > { %7317 = vmatmul.mubr.f32.gmra.mrb[42].mxu0 %v7058_v58  ;;  %v10429_v58 = vcombine.high %v16896_v61, %v5536_v54  ;;  %v10366_v61 = vld.sshfl [vmem:[%s12698_s17 + $0x72] sm:$0x3 pattern:$0x76325410] }
 0x1c9   : > { %7321 = vmatprep.mubr.f32.mxu0 %v7077_v25  ;;  %v5553_v25 = vcombine.low %v16900_v59, %v10365_v55  ;;  %v10433_v54 = vcombine.low %v10366_v61, %v16901_v5 }
 0x1ca   : > { %v6427_v29 = vrot.slane %v10429_v58, %v12719_v37  ;;  %v10367_v58 = vld.sshfl [vmem:[%s12698_s17 + $0x8a] sm:$0x3 pattern:$0x76325410] }
 0x1cb   : > { %v10431_v45 = vcombine.high %v16898_v19, %v5553_v25  ;;  %v5619_v19 = vrot.slane %v5591_v6, %v12719_v37  ;;  %v6532_v53 = vrot.slane %v10433_v54, %v12719_v37  ;;  %v5725_v39 = vcombine.low %v14872_v18, %v10367_v58 }
 0x1cc   : > { %7322 = vmatmul.mubr.f32.gmra.mrb[44].mxu0 %v7069_v28  ;;  %v6360_v28 = vcombine.low %v6343_v30, %v6357_v31  ;;  %v6430_v1 = vcombine.low %v6413_v51, %v6427_v29  ;;  %v6462_v31 = vrot.slane %v5577_v27, %v12719_v37  ;;  %v16904_v51 = vld [vmem:[#allocation30_spill] sm:$0xff]  ;;  %v10346_v27 = vld [vmem:[%s12698_s17 + $0x92] sm:$0xff] }
 0x1cd   : > { %11275 = vmatprep.mubr.msk.f32.mxu0 %vm12383_vm0, %v16755_v20  ;;  %v6448_v30 = vrot.slane %v10431_v45, %v12719_v37  ;;  %v6518_v25 = vrot.slane %v5619_v19, %v12719_v37  ;;  %v5708_v29 = vcombine.low %v14480_v22, %v16904_v51  ;;  %v5728_v47 = vcombine.high %v10346_v27, %v10346_v27  ;;  %v10347_v22 = vld [vmem:[%s12698_s17 + $0x9a] sm:$0xff] }
 0x1ce   : > { %v5749_v18 = vrot.slane %v10346_v27, %v12719_v37  ;;  %v10352_v27 = vld [vmem:[%s12698_s17 + $0xc2] sm:$0xff] }
 0x1cf   : > { %v6465_v55 = vcombine.low %v6448_v30, %v6462_v31  ;;  %v6535_v45 = vcombine.low %v6518_v25, %v6532_v53  ;;  %v10439_v6 = vcombine.high %v14853_v21, %v5708_v29  ;;  %v5756_v30 = vrot.slane %v5728_v47, %v12719_v37 }
 0x1d0   : > { %11276 = vmatmul.mubr.f32.vlgmr.msra.gmra.mrb[0].mxu0 %v6325_v50  ;;  %v5584_v50 = vrot.slane %v5556_v3, %v12719_v37  ;;  %v10437_v3 = vcombine.high %v16902_v17, %v5706_v56  ;;  %v6623_v21 = vrot.slane %v5749_v18, %v12719_v37  ;;  %v5878_v25 = vcombine.low %v16880_v15, %v15132_v23 }
 0x1d1   : > { %11278 = vmatprep.mubr.msk.f32.mxu0 %vm12383_vm0, %v16755_v20  ;;  %v6588_v61 = vrot.slane %v10439_v6, %v12719_v37  ;;  %v6637_v19 = vrot.slane %v5756_v30, %v12719_v37  ;;  %v5880_v53 = vcombine.low %v16881_v43, %v15178_v41  ;;  %v5900_v6 = vcombine.high %v10352_v27, %v10352_v27 }
 0x1d2   : > { %v6483_v40 = vrot.slane %v5584_v50, %v12719_v37  ;;  %v6567_v8 = vrot.slane %v10437_v3, %v12719_v37  ;;  %v10447_v29 = vcombine.high %v15094_v12, %v5878_v25  ;;  %v6189_v25 = vcombine.low %v15291_v11, %v15295_v34 }
 0x1d3   : > { %v5928_v18 = vrot.slane %v5900_v6, %v12719_v37 }
 0x1d4   : > { %11279 = vmatmul.mubr.f32.gmra.mrb[2].mxu0 %v6360_v28  ;;  %v5673_v28 = vcombine.low %v16903_v63, %v16902_v17  ;;  %v6500_v59 = vcombine.low %v6483_v40, %v6497_v7  ;;  %v5763_v7 = vcombine.high %v10347_v22, %v10347_v22  ;;  %v10368_v63 = vld.sshfl [vmem:[%s12698_s17 + $0xa2] sm:$0x3 pattern:$0x76325410]  ;;  %v6728_v47 = vrot.slane %v10447_v29, %v12719_v37 }
 0x1d5   : > { %11281 = vmatprep.mubr.msk.f32.mxu0 %vm12383_vm0, %v16755_v20  ;;  %v10443_v56 = vcombine.low %v10368_v63, %v15045_v9 }
 0x1d6   : > { %v5791_v17 = vrot.slane %v5763_v7, %v12719_v37  ;;  %v6812_v7 = vrot.slane %v14792_v62, %v12719_v37  ;;  %v6069_v62 = vcombine.low %v15258_v57, %v15124_v38 }
 0x1d7   : > { %v6693_v3 = vrot.slane %v10443_v56, %v12719_v37 }
 0x1d8   : > { %11282 = vmatmul.mubr.f32.gmra.mrb[4].mxu0 %v6395_v42  ;;  %v10435_v42 = vcombine.high %v16901_v5, %v5673_v28  ;;  %v5845_v5 = vcombine.low %v16879_v36, %v15094_v12  ;;  %v6640_v28 = vcombine.low %v6623_v21, %v6637_v19  ;;  %v6050_v21 = vcombine.low %v14875_v4, %v15135_v32 }
 0x1d9   : > { %11284 = vmatprep.mubr.msk.f32.mxu0 %vm12383_vm0, %v16755_v20 }
 0x1da   : > { %v6553_v50 = vrot.slane %v10435_v42, %v12719_v37  ;;  %v10445_v58 = vcombine.high %v15045_v9, %v5845_v5  ;;  %v10369_v42 = vld.sshfl [vmem:[%s12698_s17 + $0xba] sm:$0x3 pattern:$0x76325410] }
 0x1db   : > { %v5897_v15 = vcombine.low %v15206_v16, %v10369_v42  ;;  %v10463_v42 = vcombine.low %v15198_v2, %v15286_v49 }
 0x1dc   : > { %11285 = vmatmul.mubr.f32.gmra.mrb[6].mxu0 %v6430_v1  ;;  %v10441_v1 = vcombine.high %v16904_v51, %v5725_v39  ;;  %v6570_v31 = vcombine.low %v6553_v50, %v6567_v8  ;;  %v6707_v51 = vrot.slane %v10445_v58, %v12719_v37  ;;  %v10449_v39 = vcombine.high %v15132_v23, %v5880_v53 }
 0x1dd   : > { %11287 = vmatprep.mubr.msk.f32.mxu0 %vm12383_vm0, %v16755_v20  ;;  %v10451_v8 = vcombine.high %v15178_v41, %v5897_v15 }
 0x1de   : > { %v6602_v40 = vrot.slane %v10441_v1, %v12719_v37  ;;  %v6710_v43 = vcombine.low %v6693_v3, %v6707_v51  ;;  %v6742_v50 = vrot.slane %v10449_v39, %v12719_v37  ;;  %v10465_v3 = vcombine.high %v15286_v49, %v6189_v25 }
 0x1df   : > { %v6763_v1 = vrot.slane %v10451_v8, %v12719_v37  ;;  %v6222_v51 = vcombine.low %v15298_v44, %v15301_v13  ;;  %v7008_v39 = vrot.slane %v10463_v42, %v12719_v37  ;;  %v10373_v44 = vld.sshfl [vmem:[%s12698_s17 + $0x11a] sm:$0x3 pattern:$0x76325410] }
 0x1e0   : > { %11288 = vmatmul.mubr.f32.gmra.mrb[8].mxu0 %v6465_v55  ;;  %v6605_v54 = vcombine.low %v6588_v61, %v6602_v40  ;;  %v5784_v55 = vrot.slane %v10347_v22, %v12719_v37  ;;  %v6745_v16 = vcombine.low %v6728_v47, %v6742_v50  ;;  %v6798_v40 = vrot.slane %v5928_v18, %v12719_v37 }
 0x1e1   : > { %11290 = vmatprep.mubr.msk.f32.mxu0 %vm12383_vm0, %v16755_v20  ;;  %v7022_v2 = vrot.slane %v10465_v3, %v12719_v37  ;;  %v10467_v49 = vcombine.high %v15295_v34, %v6222_v51 }
 0x1e2   : > { %v6658_v36 = vrot.slane %v5784_v55, %v12719_v37  ;;  %v10457_v55 = vcombine.high %v15106_v52, %v6050_v21 }
 0x1e3   : > { %v7043_v15 = vrot.slane %v10467_v49, %v12719_v37 }
 0x1e4   : > { %11291 = vmatmul.mubr.f32.gmra.mrb[10].mxu0 %v6500_v59  ;;  %v6672_v59 = vrot.slane %v5791_v17, %v12719_v37  ;;  %v6052_v17 = vcombine.low %v14878_v26, %v15138_v60 }
 0x1e5   : > { %11293 = vmatprep.mubr.msk.f32.mxu0 %vm12383_vm0, %v16755_v20 }
 0x1e6   : > { %v6675_v9 = vcombine.low %v6658_v36, %v6672_v59  ;;  %v10459_v56 = vcombine.high %v15135_v32, %v6052_v17 }
 0x1e8   : > { %11294 = vmatmul.mubr.f32.gmra.mrb[12].mxu0 %v6535_v45  ;;  %v5921_v45 = vrot.slane %v10352_v27, %v12719_v37  ;;  %v6903_v58 = vrot.slane %v10459_v56, %v12719_v37 }
 0x1e9   : > { %11296 = vmatprep.mubr.msk.f32.mxu0 %vm12383_vm0, %v16755_v20 }
 0x1ea   : > { %v6777_v22 = vrot.slane %v5921_v45, %v12719_v37 }
 0x1ec   : > { %11297 = vmatmul.mubr.f32.gmra.mrb[14].mxu0 %v6570_v31  ;;  %v6017_v31 = vcombine.low %v16884_v33, %v15106_v52  ;;  %v6780_v61 = vcombine.low %v6763_v1, %v6777_v22  ;;  %v6815_v33 = vcombine.low %v6798_v40, %v6812_v7  ;;  %v10461_v52 = vcombine.high %v15138_v60, %v6069_v62 }
 0x1ed   : > { %11299 = vmatprep.mubr.msk.f32.mxu0 %vm12383_vm0, %v16755_v20 }
 0x1ee   : > { %v6917_v36 = vrot.slane %v10461_v52, %v12719_v37 }
 0x1f0   : > { %11300 = vmatmul.mubr.f32.gmra.mrb[16].mxu0 %v6605_v54  ;;  %v10455_v54 = vcombine.high %v15103_v46, %v6017_v31  ;;  %v6882_v46 = vrot.slane %v10457_v55, %v12719_v37  ;;  %v6920_v60 = vcombine.low %v6903_v58, %v6917_v36  ;;  %v15566_v58 = vld [vmem:[%s16636_s2] ss:$0 sm:$0xff] }
 0x1f1   : > { %11302 = vmatprep.mubr.msk.f32.mxu0 %vm12383_vm0, %v16755_v20  ;;  %v15451_v12 = vpop.f32.mrb[0].mxu1 }
 0x1f2   : > { %v3692_v23 = vpop.f32.mrb[1].mxu1 }
 0x1f4   : > { %11303 = vmatmul.mubr.f32.gmra.mrb[18].mxu0 %v6640_v28  ;;  %v6868_v28 = vrot.slane %v10455_v54, %v12719_v37 }
 0x1f5   : > { %11305 = vmatprep.mubr.msk.f32.mxu0 %vm12383_vm0, %v16755_v20  ;;  %v15458_v30 = vpop.f32.mrb[2].mxu1 }
 0x1f6   : > { %v3697_v41 = vpop.f32.mrb[3].mxu1  ;;  %v6885_v57 = vcombine.low %v6868_v28, %v6882_v46 }
 0x1f8   : > { %11306 = vmatmul.mubr.f32.gmra.mrb[20].mxu0 %v6675_v9  ;;  %v6224_v9 = vcombine.low %v15313_v35, %v15318_v10  ;;  %v7025_v35 = vcombine.low %v7008_v39, %v7022_v2 }
 0x1f9   : > { %11308 = vmatprep.mubr.msk.f32.mxu0 %vm12383_vm0, %v16755_v20  ;;  %v15469_v19 = vpop.f32.mrb[4].mxu1 }
 0x1fa   : > { %v3702_v5 = vpop.f32.mrb[5].mxu1  ;;  %v10469_v27 = vcombine.high %v15301_v13, %v6224_v9 }
 0x1fc   : > { %11309 = vmatmul.mubr.f32.gmra.mrb[22].mxu0 %v6710_v43  ;;  %v7057_v43 = vrot.slane %v10469_v27, %v12719_v37 }
 0x1fd   : > { %11311 = vmatprep.mubr.msk.f32.mxu0 %vm12383_vm0, %v16755_v20  ;;  %v15479_v4 = vpop.f32.mrb[6].mxu1 }
 0x1fe   : > { %v3707_v63 = vpop.f32.mrb[7].mxu1  ;;  %v7060_v34 = vcombine.low %v7043_v15, %v7057_v43 }
 0x200   : > { %11312 = vmatmul.mubr.f32.gmra.mrb[24].mxu0 %v6745_v16 }
 0x201   : > { %11314 = vmatprep.mubr.msk.f32.mxu0 %vm12383_vm0, %v16755_v20 }
 0x202   : > { %v15487_v26 = vpop.f32.mrb[8].mxu1 }
 0x203   : > { %v3712_v38 = vpop.f32.mrb[9].mxu1 }
 0x204   : > { %11315 = vmatmul.mubr.f32.gmra.mrb[26].mxu0 %v6780_v61 }
 0x205   : > { %11317 = vmatprep.mubr.msk.f32.mxu0 %vm12383_vm0, %v16755_v20 }
 0x206   : > { %v15494_v59 = vpop.f32.mrb[10].mxu1 }
 0x207   : > { %v3717_v32 = vpop.f32.mrb[11].mxu1 }
 0x208   : > { %11318 = vmatmul.mubr.f32.gmra.mrb[28].mxu0 %v6815_v33 }
 0x209   : > { %11320 = vmatprep.mubr.msk.f32.mxu0 %vm12383_vm0, %v16755_v20 }
 0x20c   : > { %11321 = vmatmul.mubr.f32.gmra.mrb[30].mxu0 %v15217_v0  ;;  %v15500_v0 = vpop.f32.mrb[12].mxu1 }
 0x20d   : > { %11323 = vmatprep.mubr.msk.f32.mxu0 %vm12383_vm0, %v16755_v20  ;;  %v3722_v53 = vpop.f32.mrb[13].mxu1 }
 0x20f   : > { %v15511_v11 = vpop.f32.mrb[14].mxu1 }
 0x210   : > { %11324 = vmatmul.mubr.f32.gmra.mrb[32].mxu0 %v6885_v57  ;;  %v3727_v29 = vpop.f32.mrb[15].mxu1 }
 0x211   : > { %11326 = vmatprep.mubr.msk.f32.mxu0 %vm12383_vm0, %v16755_v20 }
 0x214   : > { %11327 = vmatmul.mubr.f32.gmra.mrb[34].mxu0 %v6920_v60  ;;  %v15533_v45 = vpop.f32.mrb[16].mxu1  ;;  %v15572_v60 = vld [vmem:[%s16637_s3] ss:$0 sm:$0xff] }
 0x215   : > { %11329 = vmatprep.mubr.msk.f32.mxu0 %vm12383_vm0, %v16755_v20  ;;  %v3732_v47 = vpop.f32.mrb[17].mxu1 }
 0x218   : > { %11330 = vmatmul.mubr.f32.gmra.mrb[36].mxu0 %v15231_v14  ;;  %v6241_v14 = vcombine.low %v15330_v24, %v10373_v44  ;;  %v15535_v24 = vpop.f32.mrb[18].mxu1 }
 0x219   : > { %11332 = vmatprep.mubr.msk.f32.mxu0 %vm12383_vm0, %v16755_v20  ;;  %v3737_v50 = vpop.f32.mrb[19].mxu1 }
 0x21a   : > { %v10471_v13 = vcombine.high %v15318_v10, %v6241_v14 }
 0x21c   : > { %11333 = vmatmul.mubr.f32.gmra.mrb[38].mxu0 %v15234_v48  ;;  %v7076_v48 = vrot.slane %v10471_v13, %v12719_v37  ;;  %v15537_v8 = vpop.f32.mrb[20].mxu1 }
 0x21d   : > { %11335 = vmatprep.mubr.msk.f32.mxu0 %vm12383_vm0, %v16755_v20  ;;  %v3742_v6 = vpop.f32.mrb[21].mxu1 }
 0x220   : > { %11336 = vmatmul.mubr.f32.gmra.mrb[40].mxu0 %v7025_v35 }
 0x221   : > { %11338 = vmatprep.mubr.msk.f32.mxu0 %vm12383_vm0, %v16755_v20 }
 0x224   : > { %11339 = vmatmul.mubr.f32.gmra.mrb[42].mxu0 %v7060_v34 }
 0x225   : > { %11341 = vmatprep.mubr.msk.f32.mxu0 %vm12383_vm0, %v16755_v20 }
 0x227   : > { %v15539_v10 = vpop.f32.mrb[22].mxu1 }
 0x228   : > { %11342 = vmatmul.mubr.f32.gmra.mrb[44].mxu0 %v7076_v48  ;;  %v3747_v23 = vpop.f32.mrb[23].mxu1 }
 0x22b   : > { %v15541_v16 = vpop.f32.mrb[24].mxu1 }
 0x22c   : > { %v3752_v1 = vpop.f32.mrb[25].mxu1 }
 0x22f   : > { %v15543_v22 = vpop.f32.mrb[26].mxu1 }
 0x230   : > { %v3757_v18 = vpop.f32.mrb[27].mxu1 }
 0x233   : > { %v15545_v41 = vpop.f32.mrb[28].mxu1 }
 0x234   : > { %v3762_v31 = vpop.f32.mrb[29].mxu1 }
 0x238   : > { %v15547_v61 = vpop.f32.mrb[30].mxu1 }
 0x239   : > { %v3767_v40 = vpop.f32.mrb[31].mxu1 }
 0x25d   : > { %v15549_v7 = vpop.f32.mrb[32].mxu1 }
 0x25e   : > { %v11123_v21 = vpop.f32.mrb[33].mxu1 }
 0x261   : > { %v15551_v5 = vpop.f32.mrb[34].mxu1 }
 0x262   : > { %v11126_v54 = vpop.f32.mrb[35].mxu1 }
 0x265   : > { %v15553_v33 = vpop.f32.mrb[36].mxu1 }
 0x266   : > { %v11129_v55 = vpop.f32.mrb[37].mxu1 }
 0x269   : > { %v15555_v17 = vpop.f32.mrb[38].mxu1 }
 0x26a   : > { %v11132_v62 = vpop.f32.mrb[39].mxu1 }
 0x26d   : > { %v15557_v63 = vpop.f32.mrb[40].mxu1 }
 0x26e   : > { %v11135_v28 = vpop.f32.mrb[41].mxu1 }
 0x271   : > { %v15559_v46 = vpop.f32.mrb[42].mxu1 }
 0x272   : > { %v11138_v56 = vpop.f32.mrb[43].mxu1 }
 0x275   : > { %v15561_v52 = vpop.f32.mrb[44].mxu1 }
 0x276   : > { %v11141_v38 = vpop.f32.mrb[45].mxu1 }
 0x2a3   : > { %v7393_v57 = vpop.f32.mrb[0].mxu0 }
 0x2a4   : > { %v11952_v36 = vadd.f32 %v7393_v57, %v15451_v12  ;;  %v11277_v32 = vpop.f32.mrb[1].mxu0 }
 0x2a6   : > { %v7537_v25 = vmul.f32 %v11952_v36, %v15566_v58 }
 0x2a7   : > { %v7398_v53 = vpop.f32.mrb[2].mxu0 }
 0x2a8   : > { %v7567_v42 = vadd.f32 %v15572_v60, %v7537_v25  ;;  %v11953_v3 = vadd.f32 %v7398_v53, %v15458_v30  ;;  %v11280_v51 = vpop.f32.mrb[3].mxu0 }
 0x2aa   : > { %v7590_v9 = vmax.f32 %v7567_v42, 0.0  ;;  %v7538_v29 = vmul.f32 %v11953_v3, %v15566_v58 }
 0x2ab   : > { %v7403_v39 = vpop.f32.mrb[4].mxu0 }
 0x2ac   : > { %v7636_v2 = vcombine.high %v7590_v9, %v7590_v9  ;;  %v7643_v12 = vrot.slane %v7590_v9, %v12719_v37  ;;  %v7568_v49 = vadd.f32 %v15572_v60, %v7538_v29  ;;  %v11954_v27 = vadd.f32 %v7403_v39, %v15469_v19  ;;  %v11283_v44 = vpop.f32.mrb[5].mxu0 }
 0x2ae   : > { %v7650_v35 = vrot.slane %v7636_v2, %v12719_v37  ;;  %v7651_v15 = vcombine.high %v7643_v12, %v7643_v12  ;;  %v7591_v43 = vmax.f32 %v7568_v49, 0.0  ;;  %v7539_v14 = vmul.f32 %v11954_v27, %v15566_v58 }
 0x2af   : > { %v7408_v30 = vpop.f32.mrb[6].mxu0 }
 0x2b0   : > { %v7652_v34 = vcombine.high %v7650_v35, %v7650_v35  ;;  %v8018_v13 = vcombine.low %v7643_v12, %v7651_v15  ;;  %v7653_v48 = vcombine.high %v7591_v43, %v7591_v43  ;;  %v7660_v47 = vrot.slane %v7591_v43, %v12719_v37  ;;  %v11286_v50 = vpop.f32.mrb[7].mxu0 }
 0x2b1   : > { %v7569_v6 = vadd.f32 %v15572_v60, %v7539_v14  ;;  %v11955_v23 = vadd.f32 %v7408_v30, %v15479_v4 }
 0x2b2   : > { %v8019_v1 = vcombine.low %v7650_v35, %v7652_v34  ;;  %v7667_v19 = vrot.slane %v7653_v48, %v12719_v37  ;;  %v7668_v18 = vcombine.high %v7660_v47, %v7660_v47  ;;  %v8026_v31 = vrot.slane %v8018_v13, %v12719_v37 }
 0x2b3   : > { %v7592_v40 = vmax.f32 %v7569_v6, 0.0  ;;  %v7540_v21 = vmul.f32 %v11955_v23, %v15566_v58  ;;  %v7413_v54 = vpop.f32.mrb[8].mxu0 }
 0x2b4   : > { %v8033_v55 = vrot.slane %v8019_v1, %v12719_v37  ;;  %v7669_v62 = vcombine.high %v7667_v19, %v7667_v19  ;;  %v8035_v28 = vcombine.low %v7660_v47, %v7668_v18  ;;  %v11956_v56 = vadd.f32 %v7413_v54, %v15487_v26  ;;  %v11289_v38 = vpop.f32.mrb[9].mxu0 }
 0x2b5   : > { %v7670_v57 = vcombine.high %v7592_v40, %v7592_v40  ;;  %v7677_v4 = vrot.slane %v7592_v40, %v12719_v37  ;;  %v7570_v36 = vadd.f32 %v15572_v60, %v7540_v21 }
 0x2b6   : > { %v8034_v32 = vcombine.low %v8026_v31, %v8033_v55  ;;  %v8036_v25 = vcombine.low %v7667_v19, %v7669_v62  ;;  %v7541_v53 = vmul.f32 %v11956_v56, %v15566_v58  ;;  %v8043_v29 = vrot.slane %v8035_v28, %v12719_v37 }
 0x2b7   : > { %v7684_v42 = vrot.slane %v7670_v57, %v12719_v37  ;;  %v7685_v3 = vcombine.high %v7677_v4, %v7677_v4  ;;  %10474 = vst.sshfl [vmem:[#allocation3 + $0x10] sm:$0x3 pattern:$0x76325410] %v7677_v4  ;;  %v7593_v51 = vmax.f32 %v7570_v36, 0.0  ;;  %v7418_v9 = vpop.f32.mrb[10].mxu0 }
 0x2b8   : > { %8458 = vst [vmem:[#allocation3] sm:$0xff] %v8034_v32  ;;  %v8050_v26 = vrot.slane %v8036_v25, %v12719_v37  ;;  %8498 = vst [vmem:[#allocation3 + $0x11] sm:$0x1] %v16755_v20  ;;  %v7571_v39 = vadd.f32 %v15572_v60, %v7541_v53  ;;  %v11957_v2 = vadd.f32 %v7418_v9, %v15494_v59  ;;  %v11292_v12 = vpop.f32.mrb[11].mxu0 }
 0x2b9   : > { %8488 = vst [vmem:[#allocation3] sm:$0x1] %v16755_v20  ;;  %v8059_v49 = vcombine.low %v7685_v3, %v7684_v42  ;;  %v7686_v27 = vcombine.high %v7684_v42, %v7684_v42  ;;  %v7687_v44 = vcombine.high %v7593_v51, %v7593_v51  ;;  %v7694_v35 = vrot.slane %v7593_v51, %v12719_v37 }
 0x2ba   : > { %v8051_v15 = vcombine.low %v8043_v29, %v8050_v26  ;;  %v7594_v43 = vmax.f32 %v7571_v39, 0.0  ;;  %v7542_v14 = vmul.f32 %v11957_v2, %v15566_v58 }
 0x2bb   : > { %v7701_v30 = vrot.slane %v7687_v44, %v12719_v37  ;;  %v7702_v34 = vcombine.high %v7694_v35, %v7694_v35  ;;  %v8060_v13 = vcombine.low %v7686_v27, %v7694_v35  ;;  %v7423_v48 = vpop.f32.mrb[12].mxu0  ;;  %v8067_v1 = vrot.slane %v8059_v49, %v12719_v37 }
 0x2bc   : > { %8459 = vst [vmem:[#allocation3 + $0x8] sm:$0xff] %v8051_v15  ;;  %v7704_v47 = vcombine.high %v7594_v43, %v7594_v43  ;;  %v7711_v59 = vrot.slane %v7594_v43, %v12719_v37  ;;  %v7572_v50 = vadd.f32 %v15572_v60, %v7542_v14  ;;  %v11958_v6 = vadd.f32 %v7423_v48, %v15500_v0  ;;  %v11295_v23 = vpop.f32.mrb[13].mxu0 }
 0x2bd   : > { %v8074_v19 = vrot.slane %v8060_v13, %v12719_v37  ;;  %v8076_v18 = vcombine.low %v7702_v34, %v7701_v30  ;;  %v7703_v31 = vcombine.high %v7701_v30, %v7701_v30 }
 0x2be   : > { %v7718_v40 = vrot.slane %v7704_v47, %v12719_v37  ;;  %v7719_v21 = vcombine.high %v7711_v59, %v7711_v59  ;;  %v7595_v54 = vmax.f32 %v7572_v50, 0.0  ;;  %v7543_v55 = vmul.f32 %v11958_v6, %v15566_v58 }
 0x2bf   : > { %v8075_v62 = vcombine.low %v8067_v1, %v8074_v19  ;;  %v8077_v28 = vcombine.low %v7703_v31, %v7711_v59  ;;  %v7428_v56 = vpop.f32.mrb[14].mxu0  ;;  %v8084_v32 = vrot.slane %v8076_v18, %v12719_v37 }
 0x2c0   : > { %v7720_v38 = vcombine.high %v7718_v40, %v7718_v40  ;;  %10475 = vst.sshfl [vmem:[#allocation3 + $0x28] sm:$0x3 pattern:$0x76325410] %v7719_v21  ;;  %v7721_v57 = vcombine.high %v7595_v54, %v7595_v54  ;;  %v7728_v0 = vrot.slane %v7595_v54, %v12719_v37  ;;  %v7573_v4 = vadd.f32 %v15572_v60, %v7543_v55  ;;  %v11298_v36 = vpop.f32.mrb[15].mxu0 }
 0x2c1   : > { %8461 = vst [vmem:[#allocation3 + $0x18] sm:$0xff] %v8075_v62  ;;  %v8091_v25 = vrot.slane %v8077_v28, %v12719_v37  ;;  %8499 = vst [vmem:[#allocation3 + $0x29] sm:$0x1] %v16755_v20  ;;  %v11959_v53 = vadd.f32 %v7428_v56, %v15511_v11 }
 0x2c2   : > { %8489 = vst [vmem:[#allocation3 + $0x18] sm:$0x1] %v16755_v20  ;;  %v8100_v42 = vcombine.low %v7718_v40, %v7720_v38  ;;  %v7735_v3 = vrot.slane %v7721_v57, %v12719_v37  ;;  %v7736_v51 = vcombine.high %v7728_v0, %v7728_v0  ;;  %v7596_v9 = vmax.f32 %v7573_v4, 0.0 }
 0x2c3   : > { %v8092_v29 = vcombine.low %v8084_v32, %v8091_v25  ;;  %v7544_v26 = vmul.f32 %v11959_v53, %v15566_v58  ;;  %v7433_v39 = vpop.f32.mrb[16].mxu0 }
 0x2c4   : > { %v7737_v2 = vcombine.high %v7735_v3, %v7735_v3  ;;  %v8101_v12 = vcombine.low %v7728_v0, %v7736_v51  ;;  %v7738_v49 = vcombine.high %v7596_v9, %v7596_v9  ;;  %v11301_v27 = vpop.f32.mrb[17].mxu0  ;;  %v7745_v44 = vrot.slane %v7596_v9, %v12719_v37 }
 0x2c5   : > { %8462 = vst [vmem:[#allocation3 + $0x20] sm:$0xff] %v8092_v29  ;;  %v7574_v11 = vadd.f32 %v15572_v60, %v7544_v26  ;;  %v11960_v35 = vadd.f32 %v7433_v39, %v15533_v45  ;;  %v8108_v15 = vrot.slane %v8100_v42, %v12719_v37 }
 0x2c6   : > { %v8115_v43 = vrot.slane %v8101_v12, %v12719_v37  ;;  %v8117_v14 = vcombine.low %v7735_v3, %v7737_v2  ;;  %v7752_v30 = vrot.slane %v7738_v49, %v12719_v37  ;;  %v7753_v34 = vcombine.high %v7745_v44, %v7745_v44 }
 0x2c7   : > { %v7597_v13 = vmax.f32 %v7574_v11, 0.0  ;;  %v7545_v48 = vmul.f32 %v11960_v35, %v15566_v58  ;;  %v7438_v47 = vpop.f32.mrb[18].mxu0 }
 0x2c8   : > { %v8116_v59 = vcombine.low %v8108_v15, %v8115_v43  ;;  %10476 = vst.sshfl [vmem:[#allocation3 + $0x40] sm:$0x3 pattern:$0x76325410] %v7752_v30  ;;  %v7754_v50 = vcombine.high %v7752_v30, %v7752_v30  ;;  %v11961_v6 = vadd.f32 %v7438_v47, %v15535_v24  ;;  %v11304_v23 = vpop.f32.mrb[19].mxu0  ;;  %v8118_v1 = vcombine.low %v7745_v44, %v7753_v34 }
 0x2c9   : > { %8500 = vst [vmem:[#allocation3 + $0x41] sm:$0x1] %v16755_v20  ;;  %v7755_v45 = vcombine.high %v7597_v13, %v7597_v13  ;;  %v7762_v19 = vrot.slane %v7597_v13, %v12719_v37  ;;  %v7575_v18 = vadd.f32 %v15572_v60, %v7545_v48  ;;  %v8125_v31 = vrot.slane %v8117_v14, %v12719_v37 }
 0x2ca   : > { %8464 = vst [vmem:[#allocation3 + $0x30] sm:$0xff] %v8116_v59  ;;  %v7546_v40 = vmul.f32 %v11961_v6, %v15566_v58  ;;  %v8132_v21 = vrot.slane %v8118_v1, %v12719_v37 }
 0x2cb   : > { %8490 = vst [vmem:[#allocation3 + $0x30] sm:$0x1] %v16755_v20  ;;  %v7769_v24 = vrot.slane %v7755_v45, %v12719_v37  ;;  %v7770_v54 = vcombine.high %v7762_v19, %v7762_v19  ;;  %v8141_v55 = vcombine.low %v7754_v50, %v7762_v19  ;;  %v7443_v62 = vpop.f32.mrb[20].mxu0  ;;  %v7598_v28 = vmax.f32 %v7575_v18, 0.0 }
 0x2cc   : > { %v7576_v56 = vadd.f32 %v15572_v60, %v7546_v40  ;;  %v11962_v38 = vadd.f32 %v7443_v62, %v15537_v8  ;;  %v11307_v57 = vpop.f32.mrb[21].mxu0  ;;  %v8133_v0 = vcombine.low %v8125_v31, %v8132_v21 }
 0x2cd   : > { %v8142_v4 = vcombine.low %v7770_v54, %v7769_v24  ;;  %v7771_v36 = vcombine.high %v7769_v24, %v7769_v24  ;;  %v7772_v32 = vcombine.high %v7598_v28, %v7598_v28  ;;  %v7779_v25 = vrot.slane %v7598_v28, %v12719_v37 }
 0x2ce   : > { %v7599_v53 = vmax.f32 %v7576_v56, 0.0  ;;  %v7547_v42 = vmul.f32 %v11962_v38, %v15566_v58  ;;  %8465 = vst [vmem:[#allocation3 + $0x38] sm:$0xff] %v8133_v0  ;;  %v8149_v3 = vrot.slane %v8141_v55, %v12719_v37 }
 0x2cf   : > { %v8156_v51 = vrot.slane %v8142_v4, %v12719_v37  ;;  %v7448_v9 = vpop.f32.mrb[22].mxu0  ;;  %v7786_v29 = vrot.slane %v7772_v32, %v12719_v37  ;;  %v7787_v26 = vcombine.high %v7779_v25, %v7779_v25  ;;  %v8158_v8 = vcombine.low %v7771_v36, %v7779_v25 }
 0x2d0   : > { %v7789_v39 = vcombine.high %v7599_v53, %v7599_v53  ;;  %v11310_v2 = vpop.f32.mrb[23].mxu0  ;;  %v7796_v49 = vrot.slane %v7599_v53, %v12719_v37  ;;  %v7577_v27 = vadd.f32 %v15572_v60, %v7547_v42  ;;  %v11963_v44 = vadd.f32 %v7448_v9, %v15539_v10 }
 0x2d1   : > { %v8157_v12 = vcombine.low %v8149_v3, %v8156_v51  ;;  %v7788_v11 = vcombine.high %v7786_v29, %v7786_v29  ;;  %v8159_v35 = vcombine.low %v7787_v26, %v7786_v29  ;;  %v8166_v13 = vrot.slane %v8158_v8, %v12719_v37 }
 0x2d2   : > { %v7803_v15 = vrot.slane %v7789_v39, %v12719_v37  ;;  %v7804_v43 = vcombine.high %v7796_v49, %v7796_v49  ;;  %v7600_v14 = vmax.f32 %v7577_v27, 0.0  ;;  %v7548_v30 = vmul.f32 %v11963_v44, %v15566_v58 }
 0x2d3   : > { %8467 = vst [vmem:[#allocation3 + $0x48] sm:$0xff] %v8157_v12  ;;  %v7453_v34 = vpop.f32.mrb[24].mxu0  ;;  %v8173_v48 = vrot.slane %v8159_v35, %v12719_v37  ;;  %10477 = vst.sshfl [vmem:[#allocation3 + $0x58] sm:$0x3 pattern:$0x76325410] %v7788_v11 }
 0x2d4   : > { %8491 = vst [vmem:[#allocation3 + $0x48] sm:$0x1] %v16755_v20  ;;  %v7805_v47 = vcombine.high %v7803_v15, %v7803_v15  ;;  %v11964_v10 = vadd.f32 %v7453_v34, %v15541_v16  ;;  %v11313_v59 = vpop.f32.mrb[25].mxu0  ;;  %8501 = vst [vmem:[#allocation3 + $0x59] sm:$0x1] %v16755_v20  ;;  %v8182_v50 = vcombine.low %v7796_v49, %v7804_v43 }
 0x2d5   : > { %v7806_v6 = vcombine.high %v7600_v14, %v7600_v14  ;;  %v7813_v23 = vrot.slane %v7600_v14, %v12719_v37  ;;  %v7578_v1 = vadd.f32 %v15572_v60, %v7548_v30  ;;  %v8174_v45 = vcombine.low %v8166_v13, %v8173_v48 }
 0x2d6   : > { %v8183_v19 = vcombine.low %v7803_v15, %v7805_v47  ;;  %v7549_v18 = vmul.f32 %v11964_v10, %v15566_v58  ;;  %v8190_v16 = vrot.slane %v8182_v50, %v12719_v37 }
 0x2d7   : > { %v7820_v31 = vrot.slane %v7806_v6, %v12719_v37  ;;  %v7821_v40 = vcombine.high %v7813_v23, %v7813_v23  ;;  %v7601_v21 = vmax.f32 %v7578_v1, 0.0  ;;  %v7458_v24 = vpop.f32.mrb[26].mxu0  ;;  %8468 = vst [vmem:[#allocation3 + $0x50] sm:$0xff] %v8174_v45 }
 0x2d8   : > { %v8197_v54 = vrot.slane %v8183_v19, %v12719_v37  ;;  %v7579_v55 = vadd.f32 %v15572_v60, %v7549_v18  ;;  %v11965_v62 = vadd.f32 %v7458_v24, %v15543_v22  ;;  %v11316_v28 = vpop.f32.mrb[27].mxu0 }
 0x2d9   : > { %v7822_v56 = vcombine.high %v7820_v31, %v7820_v31  ;;  %v8199_v38 = vcombine.low %v7813_v23, %v7821_v40  ;;  %v7823_v57 = vcombine.high %v7601_v21, %v7601_v21  ;;  %v7830_v0 = vrot.slane %v7601_v21, %v12719_v37 }
 0x2da   : > { %v8198_v4 = vcombine.low %v8190_v16, %v8197_v54  ;;  %v7602_v36 = vmax.f32 %v7579_v55, 0.0  ;;  %v7550_v32 = vmul.f32 %v11965_v62, %v15566_v58 }
 0x2db   : > { %v8200_v25 = vcombine.low %v7820_v31, %v7822_v56  ;;  %v7837_v53 = vrot.slane %v7823_v57, %v12719_v37  ;;  %v7838_v42 = vcombine.high %v7830_v0, %v7830_v0  ;;  %10478 = vst.sshfl [vmem:[#allocation3 + $0x70] sm:$0x3 pattern:$0x76325410] %v7830_v0  ;;  %v7463_v3 = vpop.f32.mrb[28].mxu0  ;;  %v8207_v8 = vrot.slane %v8199_v38, %v12719_v37 }
 0x2dc   : > { %8470 = vst [vmem:[#allocation3 + $0x60] sm:$0xff] %v8198_v4  ;;  %8502 = vst [vmem:[#allocation3 + $0x71] sm:$0x1] %v16755_v20  ;;  %v7840_v22 = vcombine.high %v7602_v36, %v7602_v36  ;;  %v7847_v51 = vrot.slane %v7602_v36, %v12719_v37  ;;  %v7580_v9 = vadd.f32 %v15572_v60, %v7550_v32  ;;  %v11319_v26 = vpop.f32.mrb[29].mxu0 }
 0x2dd   : > { %v11966_v29 = vadd.f32 %v7463_v3, %v15545_v41  ;;  %8492 = vst [vmem:[#allocation3 + $0x60] sm:$0x1] %v16755_v20  ;;  %v8214_v39 = vrot.slane %v8200_v25, %v12719_v37  ;;  %v8223_v2 = vcombine.low %v7838_v42, %v7837_v53  ;;  %v7839_v12 = vcombine.high %v7837_v53, %v7837_v53 }
 0x2de   : > { %v7854_v49 = vrot.slane %v7840_v22, %v12719_v37  ;;  %v7855_v27 = vcombine.high %v7847_v51, %v7847_v51  ;;  %v7603_v44 = vmax.f32 %v7580_v9, 0.0 }
 0x2df   : > { %v7551_v11 = vmul.f32 %v11966_v29, %v15566_v58  ;;  %v8215_v35 = vcombine.low %v8207_v8, %v8214_v39  ;;  %v8224_v15 = vcombine.low %v7839_v12, %v7847_v51  ;;  %v7468_v43 = vpop.f32.mrb[30].mxu0  ;;  %v8231_v48 = vrot.slane %v8223_v2, %v12719_v37 }
 0x2e0   : > { %v8240_v14 = vcombine.low %v7855_v27, %v7854_v49  ;;  %v7856_v41 = vcombine.high %v7854_v49, %v7854_v49  ;;  %v7857_v30 = vcombine.high %v7603_v44, %v7603_v44  ;;  %v7864_v34 = vrot.slane %v7603_v44, %v12719_v37  ;;  %v11322_v13 = vpop.f32.mrb[31].mxu0 }
 0x2e1   : > { %8471 = vst [vmem:[#allocation3 + $0x68] sm:$0xff] %v8215_v35  ;;  %v8238_v47 = vrot.slane %v8224_v15, %v12719_v37  ;;  %v7581_v10 = vadd.f32 %v15572_v60, %v7551_v11  ;;  %v11967_v59 = vadd.f32 %v7468_v43, %v15547_v61 }
 0x2e2   : > { %v7871_v50 = vrot.slane %v7857_v30, %v12719_v37  ;;  %v7872_v6 = vcombine.high %v7864_v34, %v7864_v34  ;;  %v8241_v23 = vcombine.low %v7856_v41, %v7864_v34  ;;  %v8248_v31 = vrot.slane %v8240_v14, %v12719_v37 }
 0x2e3   : > { %v8239_v1 = vcombine.low %v8231_v48, %v8238_v47  ;;  %v7604_v45 = vmax.f32 %v7581_v10, 0.0  ;;  %v7552_v19 = vmul.f32 %v11967_v59, %v15566_v58  ;;  %v7473_v18 = vpop.f32.mrb[32].mxu0 }
 0x2e4   : > { %v7873_v40 = vcombine.high %v7871_v50, %v7871_v50  ;;  %v8255_v21 = vrot.slane %v8241_v23, %v12719_v37  ;;  %10479 = vst.sshfl [vmem:[#allocation3 + $0x88] sm:$0x3 pattern:$0x76325410] %v7872_v6  ;;  %v11968_v24 = vadd.f32 %v7473_v18, %v15549_v7  ;;  %v11325_v16 = vpop.f32.mrb[33].mxu0 }
 0x2e5   : > { %8473 = vst [vmem:[#allocation3 + $0x78] sm:$0xff] %v8239_v1  ;;  %8503 = vst [vmem:[#allocation3 + $0x89] sm:$0x1] %v16755_v20  ;;  %v7874_v61 = vcombine.high %v7604_v45, %v7604_v45  ;;  %v7881_v54 = vrot.slane %v7604_v45, %v12719_v37  ;;  %v7582_v55 = vadd.f32 %v15572_v60, %v7552_v19 }
 0x2e6   : > { %8493 = vst [vmem:[#allocation3 + $0x78] sm:$0x1] %v16755_v20  ;;  %v8256_v62 = vcombine.low %v8248_v31, %v8255_v21  ;;  %v8264_v28 = vcombine.low %v7871_v50, %v7873_v40  ;;  %v7553_v56 = vmul.f32 %v11968_v24, %v15566_v58 }
 0x2e7   : > { %v7888_v38 = vrot.slane %v7874_v61, %v12719_v37  ;;  %v7889_v57 = vcombine.high %v7881_v54, %v7881_v54  ;;  %v7605_v0 = vmax.f32 %v7582_v55, 0.0  ;;  %v7478_v7 = vpop.f32.mrb[34].mxu0 }
 0x2e8   : > { %8474 = vst [vmem:[#allocation3 + $0x80] sm:$0xff] %v8256_v62  ;;  %v7583_v4 = vadd.f32 %v15572_v60, %v7553_v56  ;;  %v11969_v36 = vadd.f32 %v7478_v7, %v15551_v5  ;;  %v11328_v32 = vpop.f32.mrb[35].mxu0  ;;  %v8272_v22 = vrot.slane %v8264_v28, %v12719_v37 }
 0x2e9   : > { %v7890_v25 = vcombine.high %v7888_v38, %v7888_v38  ;;  %v8265_v53 = vcombine.low %v7881_v54, %v7889_v57  ;;  %v7891_v42 = vcombine.high %v7605_v0, %v7605_v0  ;;  %v7898_v3 = vrot.slane %v7605_v0, %v12719_v37 }
 0x2ea   : > { %v7606_v51 = vmax.f32 %v7583_v4, 0.0  ;;  %v7554_v9 = vmul.f32 %v11969_v36, %v15566_v58 }
 0x2eb   : > { %v8279_v29 = vrot.slane %v8265_v53, %v12719_v37  ;;  %v8281_v26 = vcombine.low %v7888_v38, %v7890_v25  ;;  %v7905_v8 = vrot.slane %v7891_v42, %v12719_v37  ;;  %v7906_v39 = vcombine.high %v7898_v3, %v7898_v3  ;;  %v7483_v2 = vpop.f32.mrb[36].mxu0 }
 0x2ec   : > { %v7908_v12 = vcombine.high %v7606_v51, %v7606_v51  ;;  %v7915_v5 = vrot.slane %v7606_v51, %v12719_v37  ;;  %v7584_v49 = vadd.f32 %v15572_v60, %v7554_v9  ;;  %v11970_v27 = vadd.f32 %v7483_v2, %v15553_v33  ;;  %v11331_v44 = vpop.f32.mrb[37].mxu0 }
 0x2ed   : > { %v8280_v11 = vcombine.low %v8272_v22, %v8279_v29  ;;  %v8282_v35 = vcombine.low %v7898_v3, %v7906_v39  ;;  %10480 = vst.sshfl [vmem:[#allocation3 + $0xa0] sm:$0x3 pattern:$0x76325410] %v7905_v8  ;;  %v7907_v15 = vcombine.high %v7905_v8, %v7905_v8  ;;  %v8289_v34 = vrot.slane %v8281_v26, %v12719_v37 }
 0x2ee   : > { %8504 = vst [vmem:[#allocation3 + $0xa1] sm:$0x1] %v16755_v20  ;;  %v7922_v43 = vrot.slane %v7908_v12, %v12719_v37  ;;  %v7923_v14 = vcombine.high %v7915_v5, %v7915_v5  ;;  %v7607_v41 = vmax.f32 %v7584_v49, 0.0  ;;  %v7555_v30 = vmul.f32 %v11970_v27, %v15566_v58 }
 0x2ef   : > { %8476 = vst [vmem:[#allocation3 + $0x90] sm:$0xff] %v8280_v11  ;;  %v8296_v13 = vrot.slane %v8282_v35, %v12719_v37  ;;  %v8305_v48 = vcombine.low %v7907_v15, %v7915_v5  ;;  %v7488_v33 = vpop.f32.mrb[38].mxu0 }
 0x2f0   : > { %8494 = vst [vmem:[#allocation3 + $0x90] sm:$0x1] %v16755_v20  ;;  %v8306_v47 = vcombine.low %v7923_v14, %v7922_v43  ;;  %v7924_v10 = vcombine.high %v7922_v43, %v7922_v43  ;;  %v7925_v59 = vcombine.high %v7607_v41, %v7607_v41  ;;  %v7932_v50 = vrot.slane %v7607_v41, %v12719_v37  ;;  %v11334_v6 = vpop.f32.mrb[39].mxu0 }
 0x2f1   : > { %v8297_v23 = vcombine.low %v8289_v34, %v8296_v13  ;;  %v8313_v1 = vrot.slane %v8305_v48, %v12719_v37  ;;  %v7585_v45 = vadd.f32 %v15572_v60, %v7555_v30  ;;  %v11971_v19 = vadd.f32 %v7488_v33, %v15555_v17 }
 0x2f2   : > { %v8320_v18 = vrot.slane %v8306_v47, %v12719_v37  ;;  %v7939_v31 = vrot.slane %v7925_v59, %v12719_v37  ;;  %v7940_v40 = vcombine.high %v7932_v50, %v7932_v50  ;;  %v8322_v21 = vcombine.low %v7924_v10, %v7932_v50 }
 0x2f3   : > { %8477 = vst [vmem:[#allocation3 + $0x98] sm:$0xff] %v8297_v23  ;;  %v7608_v24 = vmax.f32 %v7585_v45, 0.0  ;;  %v7556_v16 = vmul.f32 %v11971_v19, %v15566_v58  ;;  %v7493_v61 = vpop.f32.mrb[40].mxu0 }
 0x2f4   : > { %v8321_v54 = vcombine.low %v8313_v1, %v8320_v18  ;;  %v7941_v55 = vcombine.high %v7939_v31, %v7939_v31  ;;  %v8323_v62 = vcombine.low %v7940_v40, %v7939_v31  ;;  %v11337_v28 = vpop.f32.mrb[41].mxu0  ;;  %v11972_v57 = vadd.f32 %v7493_v61, %v15557_v63 }
 0x2f5   : > { %v7942_v56 = vcombine.high %v7608_v24, %v7608_v24  ;;  %v7949_v38 = vrot.slane %v7608_v24, %v12719_v37  ;;  %v7586_v17 = vadd.f32 %v15572_v60, %v7556_v16  ;;  %v8330_v0 = vrot.slane %v8322_v21, %v12719_v37 }
 0x2f6   : > { %8479 = vst [vmem:[#allocation3 + $0xa8] sm:$0xff] %v8321_v54  ;;  %v8337_v7 = vrot.slane %v8323_v62, %v12719_v37  ;;  %10481 = vst.sshfl [vmem:[#allocation3 + $0xb8] sm:$0x3 pattern:$0x76325410] %v7941_v55  ;;  %v7557_v25 = vmul.f32 %v11972_v57, %v15566_v58 }
 0x2f7   : > { %8495 = vst [vmem:[#allocation3 + $0xa8] sm:$0x1] %v16755_v20  ;;  %8505 = vst [vmem:[#allocation3 + $0xb9] sm:$0x1] %v16755_v20  ;;  %v7956_v4 = vrot.slane %v7942_v56, %v12719_v37  ;;  %v7957_v36 = vcombine.high %v7949_v38, %v7949_v38  ;;  %v7609_v32 = vmax.f32 %v7586_v17, 0.0  ;;  %v7498_v53 = vpop.f32.mrb[42].mxu0 }
 0x2f8   : > { %v8338_v42 = vcombine.low %v8330_v0, %v8337_v7  ;;  %v11973_v63 = vadd.f32 %v7498_v53, %v15559_v46  ;;  %v11340_v3 = vpop.f32.mrb[43].mxu0  ;;  %v7587_v26 = vadd.f32 %v15572_v60, %v7557_v25 }
 0x2f9   : > { %v7958_v22 = vcombine.high %v7956_v4, %v7956_v4  ;;  %v8346_v51 = vcombine.low %v7949_v38, %v7957_v36  ;;  %v7959_v9 = vcombine.high %v7609_v32, %v7609_v32  ;;  %v7966_v29 = vrot.slane %v7609_v32, %v12719_v37 }
 0x2fa   : > { %8480 = vst [vmem:[#allocation3 + $0xb0] sm:$0xff] %v8338_v42  ;;  %v7558_v8 = vmul.f32 %v11973_v63, %v15566_v58  ;;  %v7610_v49 = vmax.f32 %v7587_v26, 0.0  ;;  %v12386_v38 = vmov (!%p9927_p9), 0.0  }
 0x2fb   : > { %v8347_v39 = vcombine.low %v7956_v4, %v7958_v22  ;;  %v7973_v2 = vrot.slane %v7959_v9, %v12719_v37  ;;  %v7974_v12 = vcombine.high %v7966_v29, %v7966_v29  ;;  %v7503_v5 = vpop.f32.mrb[44].mxu0  ;;  %v8354_v11 = vrot.slane %v8346_v51, %v12719_v37  ;;  %8511 = vst [vmem:[#allocation3] sm:$0xff] (!%p9927_p9), %v12386_v38 }
 0x2fc   : > { %v7588_v27 = vadd.f32 %v15572_v60, %v7558_v8  ;;  %v11974_v46 = vadd.f32 %v7503_v5, %v15561_v52  ;;  %v11343_v44 = vpop.f32.mrb[45].mxu0  ;;  %v7976_v14 = vcombine.high %v7610_v49, %v7610_v49  ;;  %v7983_v41 = vrot.slane %v7610_v49, %v12719_v37  ;;  %8512 = vst [vmem:[#allocation3 + $0x8] sm:$0xff] (!%p9927_p9), %v12386_v38 }
 0x2fd   : > { %v8361_v35 = vrot.slane %v8347_v39, %v12719_v37  ;;  %v7975_v15 = vcombine.high %v7973_v2, %v7973_v2  ;;  %v8363_v43 = vcombine.low %v7966_v29, %v7974_v12  ;;  %8513 = vst [vmem:[#allocation3 + $0x10] sm:$0x3] (!%p9927_p9), %v12386_v38 }
 0x2fe   : > { %v7611_v30 = vmax.f32 %v7588_v27, 0.0  ;;  %v7559_v34 = vmul.f32 %v11974_v46, %v15566_v58  ;;  %v7990_v33 = vrot.slane %v7976_v14, %v12719_v37  ;;  %v7991_v47 = vcombine.high %v7983_v41, %v7983_v41  ;;  %10482 = vst.sshfl [vmem:[#allocation3 + $0xd0] sm:$0x3 pattern:$0x76325410] %v7983_v41 }
 0x2ff   : > { %v8362_v13 = vcombine.low %v8354_v11, %v8361_v35  ;;  %v8364_v48 = vcombine.low %v7973_v2, %v7975_v15  ;;  %v8371_v59 = vrot.slane %v8363_v43, %v12719_v37  ;;  %8506 = vst [vmem:[#allocation3 + $0xd1] sm:$0x1] %v16755_v20 }
 0x300   : > { %v7993_v52 = vcombine.high %v7611_v30, %v7611_v30  ;;  %v8000_v10 = vrot.slane %v7611_v30, %v12719_v37  ;;  %v7589_v6 = vadd.f32 %v15572_v60, %v7559_v34  ;;  %v8387_v58 = vcombine.low %v7991_v47, %v7990_v33 }
 0x301   : > { %8482 = vst [vmem:[#allocation3 + $0xc0] sm:$0xff] %v8362_v13  ;;  %v8378_v50 = vrot.slane %v8364_v48, %v12719_v37  ;;  %v7992_v23 = vcombine.high %v7990_v33, %v7990_v33 }
 0x302   : > { %8496 = vst [vmem:[#allocation3 + $0xc0] sm:$0x1] %v16755_v20  ;;  %v8007_v1 = vrot.slane %v7993_v52, %v12719_v37  ;;  %v8008_v45 = vcombine.high %v8000_v10, %v8000_v10  ;;  %v7612_v18 = vmax.f32 %v7589_v6, 0.0  ;;  %v8395_v16 = vrot.slane %v8387_v58, %v12719_v37 }
 0x303   : > { %v8379_v19 = vcombine.low %v8371_v59, %v8378_v50  ;;  %v8388_v31 = vcombine.low %v7992_v23, %v8000_v10 }
 0x304   : > { %v8009_v40 = vcombine.high %v8007_v1, %v8007_v1  ;;  %v8404_v21 = vcombine.low %v8008_v45, %v8007_v1  ;;  %v8016_v24 = vrot.slane %v7612_v18, %v12719_v37 }
 0x305   : > { %8483 = vst [vmem:[#allocation3 + $0xc8] sm:$0xff] %v8379_v19  ;;  %v8402_v61 = vrot.slane %v8388_v31, %v12719_v37 }
 0x306   : > { %v8017_v60 = vcombine.high %v8016_v24, %v8016_v24  ;;  %v8405_v54 = vcombine.low %v8009_v40, %v8016_v24  ;;  %v8412_v62 = vrot.slane %v8404_v21, %v12719_v37  ;;  %8510 = sbr.rel (%p9927_p9) target bundleno = 781 (0x30d), region = 130 }
 0x307   : > { %v8403_v55 = vcombine.low %v8395_v16, %v8402_v61 }
 0x308   : > { %v8419_v28 = vrot.slane %v8405_v54, %v12719_v37  ;;  %10483 = vst.sshfl [vmem:[#allocation3 + $0xe8] sm:$0x3 pattern:$0x76325410] %v8017_v60 }
 0x309   : > { %8485 = vst [vmem:[#allocation3 + $0xd8] sm:$0xff] %v8403_v55  ;;  %8507 = vst [vmem:[#allocation3 + $0xe9] sm:$0x1] %v16755_v20 }
 0x30a   : > { %8497 = vst [vmem:[#allocation3 + $0xd8] sm:$0x1] %v16755_v20  ;;  %v8420_v56 = vcombine.low %v8412_v62, %v8419_v28 }
 0x30c   : > { %8486 = vst [vmem:[#allocation3 + $0xe0] sm:$0xff] %v8420_v56 }
 0x30d PF: > { %p10485_p11 = scmp.ne.s32.totalorder %s12364_s24, 1 }
 0x30e   : > { %v12387_v37 = vmov (!%p10485_p11), 0.0  }
 0x30f   : > { %8517 = sbr.rel (%p10485_p11) target bundleno = 790 (0x316), region = 134  ;;  %8519 = vst [vmem:[#allocation3 + $0xd8] sm:$0xff] (!%p10485_p11), %v12387_v37  ;;  %8520 = vst [vmem:[#allocation3 + $0xe0] sm:$0xff] (!%p10485_p11), %v12387_v37 }
 0x310   : > { %8521 = vst [vmem:[#allocation3 + $0xe8] sm:$0x3] (!%p10485_p11), %v12387_v37 }
 0x316 PF: > { %v10502_v20 = vld [vmem:[%s16638_s4 + $0x200] sm:$0xff]  ;;  %v10503_v17 = vld [vmem:[%s16638_s4 + $0x208] sm:$0xff]  ;;  %v10504_v4 = vld [vmem:[%s16638_s4 + $0x210] sm:$0xff]  ;;  %vm9762_vm1 = vcmask 64512  }
 0x317   : > { %v10486_v57 = vld [vmem:[%s16638_s4 + $0x180] sm:$0xff]  ;;  %v11728_v0 = vpack.c.bf16 %v10503_v17, %v10502_v20  ;;  %v10487_v7 = vld [vmem:[%s16638_s4 + $0x188] sm:$0xff]  ;;  %v10505_v36 = vld [vmem:[%s16638_s4 + $0x218] sm:$0xff] }
 0x318   : > { %v11730_v32 = vpack.c.bf16 %v10487_v7, %v10486_v57  ;;  %v11732_v25 = vpack.c.bf16 %v10505_v36, %v10504_v4  ;;  %v10488_v53 = vld [vmem:[%s16638_s4 + $0x190] sm:$0xff]  ;;  %v10489_v42 = vld [vmem:[%s16638_s4 + $0x198] sm:$0xff]  ;;  %v10506_v63 = vld [vmem:[%s16638_s4 + $0x220] sm:$0xff] }
 0x319   : > { %11936 = vmatprep.subr.bf16.mxu1 %v11728_v0  ;;  %v10507_v3 = vld [vmem:[%s16638_s4 + $0x228] sm:$0xff]  ;;  %11729 = vmatprep.subr.bf16.mxu0 %v11728_v0  ;;  %v11734_v22 = vpack.c.bf16 %v10489_v42, %v10488_v53  ;;  %v10490_v9 = vld [vmem:[%s16638_s4 + $0x1a0] sm:$0xff]  ;;  %v10508_v26 = vld [vmem:[%s16638_s4 + $0x230] sm:$0xff] }
 0x31a   : > { %11944 = vmatpush3.bf16.msra.mxu1 %v11730_v32  ;;  %11731 = vmatpush3.bf16.msra.mxu0 %v11730_v32  ;;  %v11736_v51 = vpack.c.bf16 %v10507_v3, %v10506_v63  ;;  %v10491_v29 = vld [vmem:[%s16638_s4 + $0x1a8] sm:$0xff]  ;;  %v10509_v8 = vld [vmem:[%s16638_s4 + $0x238] sm:$0xff]  ;;  %v10492_v12 = vld [vmem:[%s16638_s4 + $0x1b0] sm:$0xff] }
 0x31b   : > { %11937 = vmatprep.subr.bf16.mxu1 %v11732_v25  ;;  %11733 = vmatprep.subr.bf16.mxu0 %v11732_v25  ;;  %v11738_v39 = vpack.c.bf16 %v10491_v29, %v10490_v9  ;;  %v11740_v2 = vpack.c.bf16 %v10509_v8, %v10508_v26  ;;  %v10493_v5 = vld [vmem:[%s16638_s4 + $0x1b8] sm:$0xff]  ;;  %v10510_v49 = vld [vmem:[%s16638_s4 + $0x240] sm:$0xff]  ;;  %v10511_v27 = vld [vmem:[%s16638_s4 + $0x248] sm:$0xff] }
 0x31c   : > { %v15804_v46 = vld [vmem:[#allocation3 + $0x21] sm:$0xff]  ;;  %v11742_v44 = vpack.c.bf16 %v10493_v5, %v10492_v12  ;;  %v11744_v11 = vpack.c.bf16 %v10511_v27, %v10510_v49  ;;  %v10512_v43 = vld [vmem:[%s16638_s4 + $0x250] sm:$0xff]  ;;  %v10513_v14 = vld [vmem:[%s16638_s4 + $0x258] sm:$0xff] }
 0x31d   : > { %8785 = vmatprep.mubr.f32.mxu1 %v15804_v46  ;;  %v10494_v35 = vld [vmem:[%s16638_s4 + $0x1c0] sm:$0xff]  ;;  %v10495_v15 = vld [vmem:[%s16638_s4 + $0x1c8] sm:$0xff]  ;;  %v11748_v30 = vpack.c.bf16 %v10513_v14, %v10512_v43  ;;  %v10496_v34 = vld [vmem:[%s16638_s4 + $0x1d0] sm:$0xff] }
 0x31e   : > { %11945 = vmatpush3.bf16.msra.mxu1 %v11734_v22  ;;  %11735 = vmatpush3.bf16.msra.mxu0 %v11734_v22  ;;  %v11746_v41 = vpack.c.bf16 %v10495_v15, %v10494_v35  ;;  %v10497_v13 = vld [vmem:[%s16638_s4 + $0x1d8] sm:$0xff]  ;;  %v10514_v48 = vld [vmem:[%s16638_s4 + $0x260] sm:$0xff]  ;;  %v10515_v33 = vld [vmem:[%s16638_s4 + $0x268] sm:$0xff] }
 0x31f   : > { %11938 = vmatprep.subr.bf16.mxu1 %v11736_v51  ;;  %11737 = vmatprep.subr.bf16.mxu0 %v11736_v51  ;;  %v11750_v47 = vpack.c.bf16 %v10497_v13, %v10496_v34  ;;  %v11752_v52 = vpack.c.bf16 %v10515_v33, %v10514_v48  ;;  %v10498_v10 = vld [vmem:[%s16638_s4 + $0x1e0] sm:$0xff]  ;;  %v10499_v59 = vld [vmem:[%s16638_s4 + $0x1e8] sm:$0xff]  ;;  %v10516_v50 = vld [vmem:[%s16638_s4 + $0x270] sm:$0xff] }
 0x320   : > { %v10517_v6 = vld [vmem:[%s16638_s4 + $0x278] sm:$0xff]  ;;  %v11754_v58 = vpack.c.bf16 %v10499_v59, %v10498_v10  ;;  %v10500_v1 = vld [vmem:[%s16638_s4 + $0x1f0] sm:$0xff]  ;;  %v10518_v19 = vld [vmem:[%s16638_s4 + $0x280] sm:$0xff] }
 0x321   : > { %v11756_v23 = vpack.c.bf16 %v10517_v6, %v10516_v50  ;;  %v10501_v45 = vld [vmem:[%s16638_s4 + $0x1f8] sm:$0xff]  ;;  %v10519_v18 = vld [vmem:[%s16638_s4 + $0x288] sm:$0xff]  ;;  %v10520_v21 = vld [vmem:[%s16638_s4 + $0x290] sm:$0xff] }
 0x322   : > { %11946 = vmatpush3.bf16.msra.mxu1 %v11738_v39  ;;  %11739 = vmatpush3.bf16.msra.mxu0 %v11738_v39  ;;  %v11758_v31 = vpack.c.bf16 %v10501_v45, %v10500_v1  ;;  %v11760_v40 = vpack.c.bf16 %v10519_v18, %v10518_v19  ;;  %v10521_v24 = vld [vmem:[%s16638_s4 + $0x298] sm:$0xff]  ;;  %v15861_v16 = vld [vmem:[#allocation3 + $0x20] sm:$0xff]  ;;  %v10523_v55 = vld [vmem:[%s16638_s4 + $0x2a8] sm:$0xff] }
 0x323   : > { %11939 = vmatprep.subr.bf16.mxu1 %v11740_v2  ;;  %11741 = vmatprep.subr.bf16.mxu0 %v11740_v2  ;;  %v15863_v61 = vld [vmem:[#allocation3 + $0x31] sm:$0xff]  ;;  %v11764_v60 = vpack.c.bf16 %v10521_v24, %v10520_v21  ;;  %v10522_v54 = vld [vmem:[%s16638_s4 + $0x2a0] sm:$0xff]  ;;  %v15887_v17 = vld [vmem:[#allocation3 + $0x49] sm:$0xff] }
 0x324   : > { %v15873_v62 = vld [vmem:[#allocation3 + $0x30] sm:$0xff]  ;;  %v15875_v28 = vld [vmem:[#allocation3 + $0x39] sm:$0xff]  ;;  %v11768_v56 = vpack.c.bf16 %v10523_v55, %v10522_v54  ;;  %v10527_v7 = vld [vmem:[%s16638_s4 + $0x2c8] sm:$0xff] }
 0x325   : > { %v10524_v38 = vld [vmem:[%s16638_s4 + $0x2b0] sm:$0xff]  ;;  %v10525_v37 = vld [vmem:[%s16638_s4 + $0x2b8] sm:$0xff]  ;;  %v10526_v0 = vld [vmem:[%s16638_s4 + $0x2c0] sm:$0xff] }
 0x326   : > { %11947 = vmatpush3.bf16.msra.mxu1 %v11742_v44  ;;  %11743 = vmatpush3.bf16.msra.mxu0 %v11742_v44  ;;  %v15885_v20 = vld [vmem:[#allocation3 + $0x38] sm:$0xff]  ;;  %v11772_v57 = vpack.c.bf16 %v10525_v37, %v10524_v38  ;;  %v15902_v32 = vld [vmem:[#allocation3 + $0x48] sm:$0xff]  ;;  %v11776_v53 = vpack.c.bf16 %v10527_v7, %v10526_v0  ;;  %v10528_v42 = vld [vmem:[%s16638_s4 + $0x2d0] sm:$0xff] }
 0x327   : > { %11940 = vmatprep.subr.bf16.mxu1 %v11744_v11  ;;  %11745 = vmatprep.subr.bf16.mxu0 %v11744_v11  ;;  %v15895_v4 = vld [vmem:[#allocation3 + $0x19] sm:$0xff]  ;;  %v15904_v25 = vld [vmem:[#allocation3 + $0x51] sm:$0xff]  ;;  %v15917_v22 = vld [vmem:[#allocation3 + $0x61] sm:$0xff] }
 0x328   : > { %v15897_v36 = vld [vmem:[#allocation3 + $0x18] sm:$0xff]  ;;  %8780 = vmatprep.mubr.f32.mxu0 %v15895_v4  ;;  %v15915_v3 = vld [vmem:[#allocation3 + $0x50] sm:$0xff]  ;;  %v10530_v9 = vld [vmem:[%s16638_s4 + $0x2e0] sm:$0xff] }
 0x329   : > { %v10529_v63 = vld [vmem:[%s16638_s4 + $0x2d8] sm:$0xff]  ;;  %v10531_v29 = vld [vmem:[%s16638_s4 + $0x2e8] sm:$0xff]  ;;  %v15927_v26 = vld [vmem:[#allocation3 + $0x60] sm:$0xff] }
 0x32a   : > { %11948 = vmatpush3.bf16.msra.mxu1 %v11746_v41  ;;  %11747 = vmatpush3.bf16.msra.mxu0 %v11746_v41  ;;  %v11780_v51 = vpack.c.bf16 %v10529_v63, %v10528_v42  ;;  %v15929_v8 = vld [vmem:[#allocation3 + $0x69] sm:$0xff]  ;;  %v11784_v39 = vpack.c.bf16 %v10531_v29, %v10530_v9  ;;  %v10533_v12 = vld [vmem:[%s16638_s4 + $0x2f8] sm:$0xff]  ;;  %v8586_v44 = vld [vmem:[%s16638_s4 + $0x80] sm:$0xff] }
 0x32b   : > { %11941 = vmatprep.subr.bf16.mxu1 %v11748_v30  ;;  %11749 = vmatprep.subr.bf16.mxu0 %v11748_v30  ;;  %v10532_v2 = vld [vmem:[%s16638_s4 + $0x2f0] sm:$0xff]  ;;  %v15939_v5 = vld [vmem:[#allocation3 + $0x68] sm:$0xff]  ;;  %v15941_v49 = vld [vmem:[#allocation3 + $0x79] sm:$0xff] }
 0x32c   : > { %v11788_v27 = vpack.c.bf16 %v10533_v12, %v10532_v2  ;;  %v8587_v11 = vld [vmem:[%s16638_s4 + $0x88] sm:$0xff]  ;;  %v15951_v35 = vld [vmem:[#allocation3 + $0x78] sm:$0xff]  ;;  %v15957_v14 = vld [vmem:[#allocation3 + $0x80] sm:$0xff] }
 0x32d   : > { %v15953_v15 = vld [vmem:[#allocation3 + $0x81] sm:$0xff]  ;;  %v11792_v43 = vpack.c.bf16 %v8587_v11, %v8586_v44  ;;  %v15959_v41 = vld [vmem:[#allocation3 + $0x91] sm:$0xff]  ;;  %v15965_v34 = vld [vmem:[#allocation3 + $0x99] sm:$0xff] }
 0x32e   : > { %11949 = vmatpush3.bf16.msra.mxu1 %v11750_v47  ;;  %11751 = vmatpush3.bf16.msra.mxu0 %v11750_v47  ;;  %v15963_v30 = vld [vmem:[#allocation3 + $0x90] sm:$0xff]  ;;  %v15969_v13 = vld [vmem:[#allocation3 + $0x98] sm:$0xff]  ;;  %v15975_v33 = vld [vmem:[#allocation3 + $0xa8] sm:$0xff] }
 0x32f   : > { %11942 = vmatprep.subr.bf16.mxu1 %v11752_v52  ;;  %11753 = vmatprep.subr.bf16.mxu0 %v11752_v52  ;;  %v15971_v48 = vld [vmem:[#allocation3 + $0xa9] sm:$0xff]  ;;  %v15977_v47 = vld [vmem:[#allocation3 + $0xb1] sm:$0xff]  ;;  %v15983_v10 = vld [vmem:[#allocation3 + $0xc1] sm:$0xff] }
 0x330   : > { %v15981_v52 = vld [vmem:[#allocation3 + $0xb0] sm:$0xff]  ;;  %v15987_v59 = vld [vmem:[#allocation3 + $0xc0] sm:$0xff]  ;;  %v15993_v6 = vld [vmem:[#allocation3 + $0xc8] sm:$0xff] }
 0x331   : > { %v15989_v50 = vld [vmem:[#allocation3 + $0xc9] sm:$0xff]  ;;  %v8589_v19 = vld [vmem:[%s16638_s4 + $0x98] sm:$0xff]  ;;  %v8590_v54 = vld [vmem:[%s16638_s4 + $0xa0] sm:$0xff] }
 0x332   : > { %11950 = vmatpush3.bf16.msra.mxu1 %v11754_v58  ;;  %11755 = vmatpush3.bf16.msra.mxu0 %v11754_v58  ;;  %v15995_v58 = vld [vmem:[#allocation3 + $0x1a] sm:$0xff]  ;;  %v8571_v1 = vld [vmem:[%s16638_s4 + $0x8] sm:$0xff]  ;;  %v8588_v45 = vld [vmem:[%s16638_s4 + $0x90] sm:$0xff] }
 0x333   : > { %11943 = vmatprep.subr.bf16.mxu1 %v11756_v23  ;;  %11757 = vmatprep.subr.bf16.mxu0 %v11756_v23  ;;  %v8570_v23 = vld [vmem:[%s16638_s4] sm:$0xff]  ;;  %v11796_v21 = vpack.c.bf16 %v8589_v19, %v8588_v45  ;;  %v8572_v24 = vld [vmem:[%s16638_s4 + $0x10] sm:$0xff]  ;;  %v8591_v55 = vld [vmem:[%s16638_s4 + $0xa8] sm:$0xff] }
 0x334   : > { %v16011_v18 = vld [vmem:[#allocation3 + $0x22] sm:$0xff]  ;;  %v16031_v37 = vld [vmem:[#allocation3 + $0x4a] sm:$0xff]  ;;  %v8593_v42 = vld [vmem:[%s16638_s4 + $0xb8] sm:$0xff] }
 0x335   : > { %v8574_v0 = vld [vmem:[%s16638_s4 + $0x20] sm:$0xff]  ;;  %v8575_v7 = vld [vmem:[%s16638_s4 + $0x28] sm:$0xff]  ;;  %v16047_v63 = vld [vmem:[#allocation3 + $0x52] sm:$0xff] }
 0x336   : > { %11951 = vmatpush3.bf16.msra.mxu1 %v11758_v31  ;;  %11759 = vmatpush3.bf16.msra.mxu0 %v11758_v31  ;;  %v11794_v31 = vpack.c.bf16 %v8571_v1, %v8570_v23  ;;  %v16049_v9 = vld [vmem:[#allocation3 + $0x62] sm:$0xff]  ;;  %v8577_v2 = vld [vmem:[%s16638_s4 + $0x38] sm:$0xff]  ;;  %v16065_v44 = vld [vmem:[#allocation3 + $0x6a] sm:$0xff] }
 0x337   : > { %11761 = vmatprep.subr.bf16.mxu1 %v11760_v40  ;;  %v8594_v12 = vld [vmem:[%s16638_s4 + $0xc0] sm:$0xff]  ;;  %v8579_v45 = vld [vmem:[%s16638_s4 + $0x48] sm:$0xff]  ;;  %v8596_v19 = vld [vmem:[%s16638_s4 + $0xd0] sm:$0xff] }
 0x338   : > { %v8578_v1 = vld [vmem:[%s16638_s4 + $0x40] sm:$0xff] }
 0x339   : > { %8786 = vmatmul.mubr.f32.vlgmr.msra.gmra.mrb[46].mxu1 %v15861_v16  ;;  %8781 = vmatmul.mubr.f32.vlgmr.msra.gmra.mrb[46].mxu0 %v15897_v36 }
 0x33a   : > { %11763 = vmatpush3.bf16.msra.mxu1 %v11760_v40  ;;  %8790 = vmatprep.mubr.f32.mxu1 %v15863_v61  ;;  %v16013_v40 = vld [vmem:[#allocation3 + $0x32] sm:$0xff] }
 0x33b   : > { %11765 = vmatprep.subr.bf16.mxu1 %v11764_v60 }
 0x33d   : > { %8791 = vmatmul.mubr.f32.gmra.mrb[48].mxu1 %v15873_v62 }
 0x33e   : > { %8795 = vmatprep.mubr.f32.mxu1 %v15875_v28  ;;  %11767 = vmatpush3.bf16.msra.mxu1 %v11764_v60  ;;  %v8573_v60 = vld [vmem:[%s16638_s4 + $0x18] sm:$0xff] }
 0x33f   : > { %11769 = vmatprep.subr.bf16.mxu1 %v11768_v56  ;;  %v11798_v38 = vpack.c.bf16 %v8573_v60, %v8572_v24  ;;  %v11810_v24 = vpack.c.bf16 %v8579_v45, %v8578_v1  ;;  %v16085_v60 = vld [vmem:[#allocation3 + $0x92] sm:$0xff] }
 0x340   : > { %v8584_v45 = vld [vmem:[%s16638_s4 + $0x70] sm:$0xff] }
 0x341   : > { %8796 = vmatmul.mubr.f32.gmra.mrb[50].mxu1 %v15885_v20 }
 0x342   : > { %8800 = vmatprep.mubr.f32.mxu1 %v15887_v17  ;;  %11771 = vmatpush3.bf16.msra.mxu1 %v11768_v56  ;;  %v16029_v56 = vld [vmem:[#allocation3 + $0x3a] sm:$0xff] }
 0x343   : > { %11773 = vmatprep.subr.bf16.mxu1 %v11772_v57 }
 0x345   : > { %8801 = vmatmul.mubr.f32.gmra.mrb[52].mxu1 %v15902_v32 }
 0x346   : > { %8805 = vmatprep.mubr.f32.mxu1 %v15904_v25  ;;  %11775 = vmatpush3.bf16.msra.mxu1 %v11772_v57  ;;  %v11800_v57 = vpack.c.bf16 %v8591_v55, %v8590_v54  ;;  %v8580_v55 = vld [vmem:[%s16638_s4 + $0x50] sm:$0xff] }
 0x347   : > { %11777 = vmatprep.subr.bf16.mxu1 %v11776_v53 }
 0x349   : > { %8806 = vmatmul.mubr.f32.gmra.mrb[54].mxu1 %v15915_v3 }
 0x34a   : > { %8810 = vmatprep.mubr.f32.mxu1 %v15917_v22  ;;  %11779 = vmatpush3.bf16.msra.mxu1 %v11776_v53  ;;  %v8592_v53 = vld [vmem:[%s16638_s4 + $0xb0] sm:$0xff] }
 0x34b   : > { %11781 = vmatprep.subr.bf16.mxu1 %v11780_v51  ;;  %v11804_v29 = vpack.c.bf16 %v8593_v42, %v8592_v53  ;;  %v16103_v42 = vld [vmem:[#allocation3 + $0xaa] sm:$0xff] }
 0x34d   : > { %8811 = vmatmul.mubr.f32.gmra.mrb[56].mxu1 %v15927_v26 }
 0x34e   : > { %8815 = vmatprep.mubr.f32.mxu1 %v15929_v8  ;;  %11783 = vmatpush3.bf16.msra.mxu1 %v11780_v51  ;;  %v11802_v51 = vpack.c.bf16 %v8575_v7, %v8574_v0  ;;  %v8599_v0 = vld [vmem:[%s16638_s4 + $0xe8] sm:$0xff]  ;;  %v16101_v7 = vld [vmem:[#allocation3 + $0x9a] sm:$0xff] }
 0x34f   : > { %11785 = vmatprep.subr.bf16.mxu1 %v11784_v39 }
 0x351   : > { %8816 = vmatmul.mubr.f32.gmra.mrb[58].mxu1 %v15939_v5 }
 0x352   : > { %8820 = vmatprep.mubr.f32.mxu1 %v15941_v49  ;;  %11787 = vmatpush3.bf16.msra.mxu1 %v11784_v39  ;;  %v8576_v39 = vld [vmem:[%s16638_s4 + $0x30] sm:$0xff] }
 0x353   : > { %11789 = vmatprep.subr.bf16.mxu1 %v11788_v27  ;;  %v11806_v11 = vpack.c.bf16 %v8577_v2, %v8576_v39  ;;  %v8583_v39 = vld [vmem:[%s16638_s4 + $0x68] sm:$0xff]  ;;  %v8600_v2 = vld [vmem:[%s16638_s4 + $0xf0] sm:$0xff] }
 0x355   : > { %8821 = vmatmul.mubr.f32.gmra.mrb[60].mxu1 %v15951_v35 }
 0x356   : > { %8825 = vmatprep.mubr.f32.mxu1 %v15953_v15  ;;  %11791 = vmatpush3.bf16.msra.mxu1 %v11788_v27  ;;  %v8595_v27 = vld [vmem:[%s16638_s4 + $0xc8] sm:$0xff] }
 0x357   : > { %11793 = vmatprep.subr.bf16.mxu1 %v11792_v43  ;;  %v16067_v43 = vld [vmem:[#allocation3 + $0x7a] sm:$0xff]  ;;  %v11808_v23 = vpack.c.bf16 %v8595_v27, %v8594_v12  ;;  %v16119_v27 = vld [vmem:[#allocation3 + $0xb2] sm:$0xff] }
 0x358   : > { %v8601_v12 = vld [vmem:[%s16638_s4 + $0xf8] sm:$0xff] }
 0x359   : > { %8826 = vmatmul.mubr.f32.gmra.mrb[62].mxu1 %v15957_v14  ;;  %v11820_v1 = vpack.c.bf16 %v8601_v12, %v8600_v2  ;;  %v8606_v2 = vld [vmem:[%s16638_s4 + $0x120] sm:$0xff]  ;;  %v8607_v12 = vld [vmem:[%s16638_s4 + $0x128] sm:$0xff] }
 0x35a   : > { %8830 = vmatprep.mubr.f32.mxu1 %v15959_v41 }
 0x35d   : > { %8831 = vmatmul.mubr.f32.gmra.mrb[64].mxu1 %v15963_v30 }
 0x35e   : > { %8835 = vmatprep.mubr.f32.mxu1 %v15965_v34 }
 0x361   : > { %8836 = vmatmul.mubr.f32.gmra.mrb[66].mxu1 %v15969_v13 }
 0x362   : > { %8840 = vmatprep.mubr.f32.mxu1 %v15971_v48 }
 0x365   : > { %8841 = vmatmul.mubr.f32.gmra.mrb[68].mxu1 %v15975_v33 }
 0x366   : > { %8845 = vmatprep.mubr.f32.mxu1 %v15977_v47 }
 0x369   : > { %8846 = vmatmul.mubr.f32.gmra.mrb[70].mxu1 %v15981_v52 }
 0x36a   : > { %8850 = vmatprep.mubr.f32.mxu1 %v15983_v10 }
 0x36d   : > { %8851 = vmatmul.mubr.f32.gmra.mrb[72].mxu1 %v15987_v59 }
 0x36e   : > { %8855 = vmatprep.mubr.f32.mxu1 %v15989_v50 }
 0x371   : > { %8856 = vmatmul.mubr.f32.gmra.mrb[74].mxu1 %v15993_v6 }
 0x372   : > { %11376 = vmatprep.mubr.f32.mxu1 %v15995_v58 }
 0x375   : > { %11377 = vmatmul.mubr.f32.vlgmr.msra.gmra.mrb[76].mxu1 %v16011_v18 }
 0x376   : > { %11795 = vmatpush3.bf16.msra.mxu1 %v11794_v31  ;;  %11379 = vmatprep.mubr.f32.mxu1 %v16013_v40  ;;  %v8597_v31 = vld [vmem:[%s16638_s4 + $0xd8] sm:$0xff] }
 0x377   : > { %11797 = vmatprep.subr.bf16.mxu1 %v11796_v21  ;;  %v16083_v21 = vld [vmem:[#allocation3 + $0x82] sm:$0xff]  ;;  %v11812_v54 = vpack.c.bf16 %v8597_v31, %v8596_v19  ;;  %v8585_v19 = vld [vmem:[%s16638_s4 + $0x78] sm:$0xff] }
 0x378   : > { %v8602_v31 = vld [vmem:[%s16638_s4 + $0x100] sm:$0xff] }
 0x379   : > { %11380 = vmatmul.mubr.f32.gmra.mrb[78].mxu1 %v16029_v56 }
 0x37a   : > { %11799 = vmatpush3.bf16.msra.mxu1 %v11798_v38  ;;  %11382 = vmatprep.mubr.f32.mxu1 %v16031_v37  ;;  %v8581_v38 = vld [vmem:[%s16638_s4 + $0x58] sm:$0xff] }
 0x37b   : > { %11801 = vmatprep.subr.bf16.mxu1 %v11800_v57  ;;  %v8598_v57 = vld [vmem:[%s16638_s4 + $0xe0] sm:$0xff]  ;;  %v11814_v53 = vpack.c.bf16 %v8581_v38, %v8580_v55  ;;  %v11822_v55 = vpack.c.bf16 %v8585_v19, %v8584_v45  ;;  %v8608_v45 = vld [vmem:[%s16638_s4 + $0x130] sm:$0xff]  ;;  %v8609_v19 = vld [vmem:[%s16638_s4 + $0x138] sm:$0xff] }
 0x37c   : > { %v8538_v38 = vld [vmem:[#allocation3 + $0x1] sm:$0xff] }
 0x37d   : > { %11383 = vmatmul.mubr.f32.gmra.mrb[80].mxu1 %v16047_v63 }
 0x37e   : > { %11803 = vmatpush3.bf16.msra.mxu1 %v11802_v51  ;;  %11385 = vmatprep.mubr.f32.mxu1 %v16049_v9  ;;  %v11816_v51 = vpack.c.bf16 %v8599_v0, %v8598_v57  ;;  %v8604_v0 = vld [vmem:[%s16638_s4 + $0x110] sm:$0xff] }
 0x37f   : > { %11805 = vmatprep.subr.bf16.mxu1 %v11804_v29  ;;  %v8582_v29 = vld [vmem:[%s16638_s4 + $0x60] sm:$0xff] }
 0x381   : > { %11386 = vmatmul.mubr.f32.gmra.mrb[82].mxu1 %v16065_v44 }
 0x382   : > { %11807 = vmatpush3.bf16.msra.mxu1 %v11806_v11  ;;  %11388 = vmatprep.mubr.f32.mxu1 %v16067_v43  ;;  %v11818_v11 = vpack.c.bf16 %v8583_v39, %v8582_v29  ;;  %v8539_v29 = vld [vmem:[#allocation3 + $0x9] sm:$0xff] }
 0x383   : > { %11809 = vmatprep.subr.bf16.mxu1 %v11808_v23  ;;  %v16121_v23 = vld [vmem:[#allocation3 + $0xc2] sm:$0xff] }
 0x385   : > { %11389 = vmatmul.mubr.f32.gmra.mrb[84].mxu1 %v16083_v21 }
 0x386   : > { %11811 = vmatpush3.bf16.msra.mxu1 %v11810_v24  ;;  %11391 = vmatprep.mubr.f32.mxu1 %v16085_v60  ;;  %v8603_v24 = vld [vmem:[%s16638_s4 + $0x108] sm:$0xff] }
 0x387   : > { %11813 = vmatprep.subr.bf16.mxu1 %v11812_v54  ;;  %v16137_v54 = vld [vmem:[#allocation3 + $0xca] sm:$0xff]  ;;  %v11824_v57 = vpack.c.bf16 %v8603_v24, %v8602_v31  ;;  %v11836_v31 = vpack.c.bf16 %v8609_v19, %v8608_v45  ;;  %v8610_v24 = vld [vmem:[%s16638_s4 + $0x140] sm:$0xff] }
 0x388   : > { %v10535_v45 = vld [vmem:[%s16638_s4 + $0x308] sm:$0xff]  ;;  %v10552_v19 = vld [vmem:[%s16638_s4 + $0x390] sm:$0xff] }
 0x389   : > { %11392 = vmatmul.mubr.f32.gmra.mrb[86].mxu1 %v16101_v7 }
 0x38a   : > { %11815 = vmatpush3.bf16.msra.mxu1 %v11814_v53  ;;  %11394 = vmatprep.mubr.f32.mxu1 %v16103_v42  ;;  %v8605_v53 = vld [vmem:[%s16638_s4 + $0x118] sm:$0xff] }
 0x38b   : > { %11817 = vmatprep.subr.bf16.mxu1 %v11816_v51  ;;  %v8522_v51 = vld [vmem:[#allocation3] sm:$0xff]  ;;  %v11828_v39 = vpack.c.bf16 %v8605_v53, %v8604_v0  ;;  %v8615_v0 = vld [vmem:[%s16638_s4 + $0x168] sm:$0xff]  ;;  %v8616_v53 = vld [vmem:[%s16638_s4 + $0x170] sm:$0xff] }
 0x38d   : > { %11395 = vmatmul.mubr.f32.gmra.mrb[88].mxu1 %v16119_v27 }
 0x38e   : > { %11819 = vmatpush3.bf16.msra.mxu1 %v11818_v11  ;;  %11397 = vmatprep.mubr.f32.mxu1 %v16121_v23  ;;  %v8523_v11 = vld [vmem:[#allocation3 + $0x8] sm:$0xff] }
 0x38f   : > { %11821 = vmatprep.subr.bf16.mxu1 %v11820_v1  ;;  %v11832_v1 = vpack.c.bf16 %v8607_v12, %v8606_v2  ;;  %v10551_v2 = vld [vmem:[%s16638_s4 + $0x388] sm:$0xff] }
 0x391   : > { %11398 = vmatmul.mubr.f32.gmra.mrb[90].mxu1 %v16137_v54 }
 0x392   : > { %11823 = vmatpush3.bf16.msra.mxu1 %v11822_v55  ;;  %9070 = vmatprep.mubr.f32.mxu1 %v8538_v38  ;;  %v8611_v55 = vld [vmem:[%s16638_s4 + $0x148] sm:$0xff] }
 0x393   : > { %11825 = vmatprep.subr.bf16.mxu1 %v11824_v57  ;;  %v11840_v38 = vpack.c.bf16 %v8611_v55, %v8610_v24  ;;  %v8555_v24 = vld [vmem:[#allocation3 + $0xa] sm:$0xff] }
 0x395   : > { %9071 = vmatmul.mubr.f32.vlgmr.msra.gmra.mrb[92].mxu1 %v8522_v51  ;;  %v8617_v51 = vld [vmem:[%s16638_s4 + $0x178] sm:$0xff] }
 0x396   : > { %11827 = vmatpush3.bf16.msra.mxu1 %v11824_v57  ;;  %9075 = vmatprep.mubr.f32.mxu1 %v8539_v29  ;;  %v8613_v57 = vld [vmem:[%s16638_s4 + $0x158] sm:$0xff]  ;;  %v11852_v29 = vpack.c.bf16 %v8617_v51, %v8616_v53  ;;  %v10538_v53 = vld [vmem:[%s16638_s4 + $0x320] sm:$0xff]  ;;  %v10539_v51 = vld [vmem:[%s16638_s4 + $0x328] sm:$0xff] }
 0x397   : > { %11829 = vmatprep.subr.bf16.mxu1 %v11828_v39 }
 0x399   : > { %9076 = vmatmul.mubr.f32.gmra.mrb[94].mxu1 %v8523_v11  ;;  %v8554_v11 = vld [vmem:[#allocation3 + $0x2] sm:$0xff] }
 0x39a   : > { %9080 = vmatprep.mubr.f32.mxu1 %v15895_v4  ;;  %11831 = vmatpush3.bf16.msra.mxu1 %v11828_v39  ;;  %v8612_v4 = vld [vmem:[%s16638_s4 + $0x150] sm:$0xff]  ;;  %v10550_v39 = vld [vmem:[%s16638_s4 + $0x380] sm:$0xff] }
 0x39b   : > { %11833 = vmatprep.subr.bf16.mxu1 %v11832_v1  ;;  %v11856_v12 = vpack.c.bf16 %v10551_v2, %v10550_v39  ;;  %v10557_v39 = vld [vmem:[%s16638_s4 + $0x3b8] sm:$0xff] }
 0x39d   : > { %9081 = vmatmul.mubr.f32.gmra.mrb[96].mxu1 %v15897_v36  ;;  %v11844_v36 = vpack.c.bf16 %v8613_v57, %v8612_v4  ;;  %v10536_v4 = vld [vmem:[%s16638_s4 + $0x310] sm:$0xff]  ;;  %v10537_v57 = vld [vmem:[%s16638_s4 + $0x318] sm:$0xff] }
 0x39e   : > { %9085 = vmatprep.mubr.f32.mxu1 %v15804_v46  ;;  %11835 = vmatpush3.bf16.msra.mxu1 %v11832_v1  ;;  %v8614_v46 = vld [vmem:[%s16638_s4 + $0x160] sm:$0xff] }
 0x39f   : > { %11837 = vmatprep.subr.bf16.mxu1 %v11836_v31  ;;  %v10534_v1 = vld [vmem:[%s16638_s4 + $0x300] sm:$0xff] }
 0x3a0   : > { %v11858_v55 = vpack.c.bf16 %v10535_v45, %v10534_v1  ;;  %v10558_v1 = vld [vmem:[%s16638_s4 + $0x3c0] sm:$0xff] }
 0x3a1   : > { %9086 = vmatmul.mubr.f32.gmra.mrb[98].mxu1 %v15861_v16  ;;  %v11848_v16 = vpack.c.bf16 %v8615_v0, %v8614_v46  ;;  %v10555_v46 = vld [vmem:[%s16638_s4 + $0x3a8] sm:$0xff]  ;;  %v11862_v0 = vpack.c.bf16 %v10537_v57, %v10536_v4 }
 0x3a2   : > { %9090 = vmatprep.mubr.f32.mxu1 %v15863_v61  ;;  %11839 = vmatpush3.bf16.msra.mxu1 %v11836_v31  ;;  %v10553_v31 = vld [vmem:[%s16638_s4 + $0x398] sm:$0xff] }
 0x3a3   : > { %11841 = vmatprep.subr.bf16.mxu1 %v11840_v38 }
 0x3a5   : > { %9091 = vmatmul.mubr.f32.gmra.mrb[100].mxu1 %v15873_v62 }
 0x3a6   : > { %9095 = vmatprep.mubr.f32.mxu1 %v15875_v28  ;;  %11843 = vmatpush3.bf16.msra.mxu1 %v11840_v38  ;;  %v11860_v38 = vpack.c.bf16 %v10553_v31, %v10552_v19  ;;  %v10542_v31 = vld [vmem:[%s16638_s4 + $0x340] sm:$0xff] }
 0x3a7   : > { %11845 = vmatprep.subr.bf16.mxu1 %v11844_v36 }
 0x3a9   : > { %9096 = vmatmul.mubr.f32.gmra.mrb[102].mxu1 %v15885_v20 }
 0x3aa   : > { %9100 = vmatprep.mubr.f32.mxu1 %v15887_v17  ;;  %11847 = vmatpush3.bf16.msra.mxu1 %v11844_v36  ;;  %v10554_v36 = vld [vmem:[%s16638_s4 + $0x3a0] sm:$0xff] }
 0x3ab   : > { %11849 = vmatprep.subr.bf16.mxu1 %v11848_v16 }
 0x3ad   : > { %9101 = vmatmul.mubr.f32.gmra.mrb[104].mxu1 %v15902_v32 }
 0x3ae   : > { %9105 = vmatprep.mubr.f32.mxu1 %v15904_v25  ;;  %11851 = vmatpush3.bf16.msra.mxu1 %v11848_v16  ;;  %v11864_v16 = vpack.c.bf16 %v10555_v46, %v10554_v36  ;;  %v10544_v36 = vld [vmem:[%s16638_s4 + $0x350] sm:$0xff]  ;;  %v10545_v46 = vld [vmem:[%s16638_s4 + $0x358] sm:$0xff] }
 0x3af   : > { %11853 = vmatprep.subr.bf16.mxu1 %v11852_v29 }
 0x3b1   : > { %9106 = vmatmul.mubr.f32.gmra.mrb[106].mxu1 %v15915_v3 }
 0x3b2   : > { %9110 = vmatprep.mubr.f32.mxu1 %v15917_v22  ;;  %11855 = vmatpush3.bf16.msra.mxu1 %v11852_v29  ;;  %v10556_v29 = vld [vmem:[%s16638_s4 + $0x3b0] sm:$0xff] }
 0x3b3   : > { %11857 = vmatprep.subr.bf16.mxu1 %v11856_v12  ;;  %v11868_v2 = vpack.c.bf16 %v10557_v39, %v10556_v29  ;;  %v10540_v12 = vld [vmem:[%s16638_s4 + $0x330] sm:$0xff]  ;;  %v10546_v29 = vld [vmem:[%s16638_s4 + $0x360] sm:$0xff]  ;;  %v10547_v39 = vld [vmem:[%s16638_s4 + $0x368] sm:$0xff] }
 0x3b5   : > { %9111 = vmatmul.mubr.f32.gmra.mrb[108].mxu1 %v15927_v26 }
 0x3b6   : > { %9115 = vmatprep.mubr.f32.mxu1 %v15929_v8 }
 0x3b9   : > { %9116 = vmatmul.mubr.f32.gmra.mrb[110].mxu1 %v15939_v5 }
 0x3ba   : > { %9120 = vmatprep.mubr.f32.mxu1 %v15941_v49 }
 0x3bd   : > { %9121 = vmatmul.mubr.f32.gmra.mrb[112].mxu1 %v15951_v35 }
 0x3be   : > { %9125 = vmatprep.mubr.f32.mxu1 %v15953_v15 }
 0x3c1   : > { %9126 = vmatmul.mubr.f32.gmra.mrb[114].mxu1 %v15957_v14 }
 0x3c2   : > { %9130 = vmatprep.mubr.f32.mxu1 %v15959_v41 }
 0x3c5   : > { %9131 = vmatmul.mubr.f32.gmra.mrb[116].mxu1 %v15963_v30 }
 0x3c6   : > { %9135 = vmatprep.mubr.f32.mxu1 %v15965_v34 }
 0x3c9   : > { %9136 = vmatmul.mubr.f32.gmra.mrb[118].mxu1 %v15969_v13 }
 0x3ca   : > { %9140 = vmatprep.mubr.f32.mxu1 %v15971_v48 }
 0x3cd   : > { %9141 = vmatmul.mubr.f32.gmra.mrb[120].mxu1 %v15975_v33 }
 0x3ce   : > { %9145 = vmatprep.mubr.f32.mxu1 %v15977_v47 }
 0x3d1   : > { %9146 = vmatmul.mubr.f32.gmra.mrb[122].mxu1 %v15981_v52 }
 0x3d2   : > { %11432 = vmatprep.mubr.f32.mxu1 %v8554_v11  ;;  %v10541_v11 = vld [vmem:[%s16638_s4 + $0x338] sm:$0xff] }
 0x3d3   : > { %v11870_v45 = vpack.c.bf16 %v10541_v11, %v10540_v12  ;;  %v11882_v12 = vpack.c.bf16 %v10547_v39, %v10546_v29  ;;  %v10581_v29 = vld [vmem:[%s16638_s4 + $0x478] sm:$0xff] }
 0x3d5   : > { %11433 = vmatmul.mubr.f32.vlgmr.msra.gmra.mrb[76].mxu1 %v8555_v24  ;;  %v10543_v24 = vld [vmem:[%s16638_s4 + $0x348] sm:$0xff] }
 0x3d6   : > { %11859 = vmatpush3.bf16.msra.mxu1 %v11858_v55  ;;  %11435 = vmatprep.mubr.f32.mxu1 %v15995_v58  ;;  %v11866_v58 = vpack.c.bf16 %v10539_v51, %v10538_v53  ;;  %v10560_v55 = vld [vmem:[%s16638_s4 + $0x3d0] sm:$0xff]  ;;  %v11874_v4 = vpack.c.bf16 %v10543_v24, %v10542_v31  ;;  %v11878_v53 = vpack.c.bf16 %v10545_v46, %v10544_v36  ;;  %v10571_v36 = vld [vmem:[%s16638_s4 + $0x428] sm:$0xff] }
 0x3d7   : > { %11861 = vmatprep.subr.bf16.mxu1 %v11860_v38  ;;  %v10561_v38 = vld [vmem:[%s16638_s4 + $0x3d8] sm:$0xff] }
 0x3d8   : > { %v11876_v57 = vpack.c.bf16 %v10561_v38, %v10560_v55  ;;  %v10568_v55 = vld [vmem:[%s16638_s4 + $0x410] sm:$0xff]  ;;  %v10569_v38 = vld [vmem:[%s16638_s4 + $0x418] sm:$0xff] }
 0x3d9   : > { %11436 = vmatmul.mubr.f32.gmra.mrb[78].mxu1 %v16011_v18  ;;  %v10559_v18 = vld [vmem:[%s16638_s4 + $0x3c8] sm:$0xff] }
 0x3da   : > { %11863 = vmatpush3.bf16.msra.mxu1 %v11862_v0  ;;  %11438 = vmatprep.mubr.f32.mxu1 %v16013_v40  ;;  %v11872_v19 = vpack.c.bf16 %v10559_v18, %v10558_v1  ;;  %v10562_v0 = vld [vmem:[%s16638_s4 + $0x3e0] sm:$0xff]  ;;  %v10548_v1 = vld [vmem:[%s16638_s4 + $0x370] sm:$0xff]  ;;  %v10549_v18 = vld [vmem:[%s16638_s4 + $0x378] sm:$0xff] }
 0x3db   : > { %11865 = vmatprep.subr.bf16.mxu1 %v11864_v16  ;;  %v10563_v16 = vld [vmem:[%s16638_s4 + $0x3e8] sm:$0xff]  ;;  %v11886_v31 = vpack.c.bf16 %v10549_v18, %v10548_v1 }
 0x3dc   : > { %v11880_v51 = vpack.c.bf16 %v10563_v16, %v10562_v0  ;;  %v10573_v0 = vld [vmem:[%s16638_s4 + $0x438] sm:$0xff]  ;;  %v10575_v16 = vld [vmem:[%s16638_s4 + $0x448] sm:$0xff] }
 0x3dd   : > { %11439 = vmatmul.mubr.f32.gmra.mrb[80].mxu1 %v16029_v56 }
 0x3de   : > { %11867 = vmatpush3.bf16.msra.mxu1 %v11866_v58  ;;  %11441 = vmatprep.mubr.f32.mxu1 %v16031_v37  ;;  %v10564_v58 = vld [vmem:[%s16638_s4 + $0x3f0] sm:$0xff] }
 0x3df   : > { %11869 = vmatprep.subr.bf16.mxu1 %v11868_v2  ;;  %v10565_v2 = vld [vmem:[%s16638_s4 + $0x3f8] sm:$0xff] }
 0x3e0   : > { %v11884_v11 = vpack.c.bf16 %v10565_v2, %v10564_v58 }
 0x3e1   : > { %11442 = vmatmul.mubr.f32.gmra.mrb[82].mxu1 %v16047_v63 }
 0x3e2   : > { %11871 = vmatpush3.bf16.msra.mxu1 %v11870_v45  ;;  %11444 = vmatprep.mubr.f32.mxu1 %v16049_v9  ;;  %v10566_v45 = vld [vmem:[%s16638_s4 + $0x400] sm:$0xff] }
 0x3e3   : > { %11873 = vmatprep.subr.bf16.mxu1 %v11872_v19  ;;  %v10567_v19 = vld [vmem:[%s16638_s4 + $0x408] sm:$0xff] }
 0x3e4   : > { %v11888_v24 = vpack.c.bf16 %v10567_v19, %v10566_v45 }
 0x3e5   : > { %11445 = vmatmul.mubr.f32.gmra.mrb[84].mxu1 %v16065_v44 }
 0x3e6   : > { %11875 = vmatpush3.bf16.msra.mxu1 %v11874_v4  ;;  %11447 = vmatprep.mubr.f32.mxu1 %v16067_v43  ;;  %v11892_v4 = vpack.c.bf16 %v10569_v38, %v10568_v55 }
 0x3e7   : > { %11877 = vmatprep.subr.bf16.mxu1 %v11876_v57  ;;  %v10570_v57 = vld [vmem:[%s16638_s4 + $0x420] sm:$0xff] }
 0x3e8   : > { %v11896_v46 = vpack.c.bf16 %v10571_v36, %v10570_v57  ;;  %v9328_v36 = vld [vmem:[#allocation3 + $0xe1] sm:$0xff] }
 0x3e9   : > { %11448 = vmatmul.mubr.f32.gmra.mrb[86].mxu1 %v16083_v21 }
 0x3ea   : > { %11879 = vmatpush3.bf16.msra.mxu1 %v11878_v53  ;;  %11450 = vmatprep.mubr.f32.mxu1 %v16085_v60  ;;  %v10577_v53 = vld [vmem:[%s16638_s4 + $0x458] sm:$0xff] }
 0x3eb   : > { %11881 = vmatprep.subr.bf16.mxu1 %v11880_v51  ;;  %v10579_v51 = vld [vmem:[%s16638_s4 + $0x468] sm:$0xff] }
 0x3ed   : > { %11451 = vmatmul.mubr.f32.gmra.mrb[88].mxu1 %v16101_v7 }
 0x3ee   : > { %11883 = vmatpush3.bf16.msra.mxu1 %v11882_v12  ;;  %11453 = vmatprep.mubr.f32.mxu1 %v16103_v42 }
 0x3ef   : > { %11885 = vmatprep.subr.bf16.mxu1 %v11884_v11 }
 0x3f1   : > { %11454 = vmatmul.mubr.f32.gmra.mrb[90].mxu1 %v16119_v27 }
 0x3f2   : > { %11887 = vmatpush3.bf16.msra.mxu1 %v11886_v31  ;;  %9458 = vmatprep.mubr.f32.mxu1 %v15863_v61  ;;  %v10572_v61 = vld [vmem:[%s16638_s4 + $0x430] sm:$0xff] }
 0x3f3   : > { %11889 = vmatprep.subr.bf16.mxu1 %v11888_v24 }
 0x3f5   : > { %9459 = vmatmul.mubr.f32.vlgmr.msra.gmra.mrb[124].mxu1 %v15873_v62  ;;  %v11900_v62 = vpack.c.bf16 %v10573_v0, %v10572_v61 }
 0x3f6   : > { %11891 = vmatpush3.bf16.msra.mxu1 %v11888_v24  ;;  %9463 = vmatprep.mubr.f32.mxu1 %v15875_v28  ;;  %v10574_v28 = vld [vmem:[%s16638_s4 + $0x440] sm:$0xff] }
 0x3f7   : > { %11893 = vmatprep.subr.bf16.mxu1 %v11892_v4 }
 0x3f9   : > { %9464 = vmatmul.mubr.f32.gmra.mrb[126].mxu1 %v15885_v20  ;;  %v11904_v20 = vpack.c.bf16 %v10575_v16, %v10574_v28 }
 0x3fa   : > { %9468 = vmatprep.mubr.f32.mxu1 %v15887_v17  ;;  %11895 = vmatpush3.bf16.msra.mxu1 %v11892_v4  ;;  %v10576_v17 = vld [vmem:[%s16638_s4 + $0x450] sm:$0xff] }
 0x3fb   : > { %11897 = vmatprep.subr.bf16.mxu1 %v11896_v46 }
 0x3fd   : > { %9469 = vmatmul.mubr.f32.gmra.mrb[128].mxu1 %v15902_v32  ;;  %v11908_v32 = vpack.c.bf16 %v10577_v53, %v10576_v17 }
 0x3fe   : > { %9473 = vmatprep.mubr.f32.mxu1 %v15904_v25  ;;  %11899 = vmatpush3.bf16.msra.mxu1 %v11896_v46  ;;  %v10578_v25 = vld [vmem:[%s16638_s4 + $0x460] sm:$0xff] }
 0x3ff   : > { %11901 = vmatprep.subr.bf16.mxu1 %v11900_v62 }
 0x401   : > { %9474 = vmatmul.mubr.f32.gmra.mrb[130].mxu1 %v15915_v3  ;;  %v11912_v3 = vpack.c.bf16 %v10579_v51, %v10578_v25 }
 0x402   : > { %9478 = vmatprep.mubr.f32.mxu1 %v15917_v22  ;;  %11903 = vmatpush3.bf16.msra.mxu1 %v11900_v62  ;;  %v10580_v22 = vld [vmem:[%s16638_s4 + $0x470] sm:$0xff] }
 0x403   : > { %11905 = vmatprep.subr.bf16.mxu1 %v11904_v20 }
 0x405   : > { %9479 = vmatmul.mubr.f32.gmra.mrb[132].mxu1 %v15927_v26  ;;  %v11916_v26 = vpack.c.bf16 %v10581_v29, %v10580_v22 }
 0x406   : > { %9483 = vmatprep.mubr.f32.mxu1 %v15929_v8  ;;  %11907 = vmatpush3.bf16.msra.mxu1 %v11904_v20 }
 0x407   : > { %11909 = vmatprep.subr.bf16.mxu1 %v11908_v32 }
 0x409   : > { %9484 = vmatmul.mubr.f32.gmra.mrb[134].mxu1 %v15939_v5 }
 0x40a   : > { %9488 = vmatprep.mubr.f32.mxu1 %v15941_v49  ;;  %11911 = vmatpush3.bf16.msra.mxu1 %v11908_v32 }
 0x40b   : > { %11913 = vmatprep.subr.bf16.mxu1 %v11912_v3 }
 0x40c   : > { %v10740_v39 = vpop.f32.mrb[46].mxu1 }
 0x40d   : > { %v10741_v8 = vpop.f32.mrb[47].mxu1  ;;  %9489 = vmatmul.mubr.f32.gmra.mrb[136].mxu1 %v15951_v35 }
 0x40e   : > { %v16382_v58 = vadd.f32 %v10741_v8, %v10740_v39  ;;  %9493 = vmatprep.mubr.f32.mxu1 %v15953_v15  ;;  %11915 = vmatpush3.bf16.msra.mxu1 %v11912_v3  ;;  %v10737_v15 = vpop.f32.mrb[46].mxu0 }
 0x40f   : > { %11917 = vmatprep.subr.bf16.mxu1 %v11916_v26  ;;  %v10738_v1 = vpop.f32.mrb[47].mxu0 }
 0x410   : > { %v10743_v2 = vpop.f32.mrb[48].mxu1  ;;  %v16393_v45 = vadd.f32 %v10738_v1, %v10737_v15 }
 0x411   : > { %v10744_v12 = vpop.f32.mrb[49].mxu1  ;;  %9494 = vmatmul.mubr.f32.gmra.mrb[138].mxu1 %v15957_v14 }
 0x412   : > { %v16386_v5 = vadd.f32 %v10744_v12, %v10743_v2  ;;  %9498 = vmatprep.mubr.f32.mxu1 %v15959_v41  ;;  %11919 = vmatpush3.bf16.msra.mxu1 %v11916_v26 }
 0x414   : > { %v10746_v49 = vpop.f32.mrb[50].mxu1 }
 0x415   : > { %v10747_v11 = vpop.f32.mrb[51].mxu1  ;;  %9499 = vmatmul.mubr.f32.gmra.mrb[140].mxu1 %v15963_v30 }
 0x416   : > { %v16390_v35 = vadd.f32 %v10747_v11, %v10746_v49  ;;  %9503 = vmatprep.mubr.f32.mxu1 %v15965_v34 }
 0x418   : > { %v10749_v18 = vpop.f32.mrb[52].mxu1 }
 0x419   : > { %v10750_v19 = vpop.f32.mrb[53].mxu1  ;;  %9504 = vmatmul.mubr.f32.gmra.mrb[142].mxu1 %v15969_v13 }
 0x41a   : > { %v16396_v14 = vadd.f32 %v10750_v19, %v10749_v18  ;;  %9508 = vmatprep.mubr.f32.mxu1 %v15971_v48 }
 0x41c   : > { %v10752_v41 = vpop.f32.mrb[54].mxu1 }
 0x41d   : > { %v10753_v31 = vpop.f32.mrb[55].mxu1  ;;  %9509 = vmatmul.mubr.f32.gmra.mrb[144].mxu1 %v15975_v33  ;;  %v9327_v33 = vld [vmem:[#allocation3 + $0xd9] sm:$0xff] }
 0x41e   : > { %v16400_v30 = vadd.f32 %v10753_v31, %v10752_v41  ;;  %9513 = vmatprep.mubr.f32.mxu1 %v15977_v47 }
 0x420   : > { %v10755_v34 = vpop.f32.mrb[56].mxu1 }
 0x421   : > { %v10756_v24 = vpop.f32.mrb[57].mxu1  ;;  %9514 = vmatmul.mubr.f32.gmra.mrb[146].mxu1 %v15981_v52  ;;  %v9311_v52 = vld [vmem:[#allocation3 + $0xd8] sm:$0xff] }
 0x422   : > { %v16404_v55 = vadd.f32 %v10756_v24, %v10755_v34  ;;  %9518 = vmatprep.mubr.f32.mxu1 %v15983_v10 }
 0x424   : > { %v10758_v13 = vpop.f32.mrb[58].mxu1 }
 0x425   : > { %v10759_v38 = vpop.f32.mrb[59].mxu1  ;;  %9519 = vmatmul.mubr.f32.gmra.mrb[148].mxu1 %v15987_v59  ;;  %v9312_v59 = vld [vmem:[#allocation3 + $0xe0] sm:$0xff] }
 0x426   : > { %v16408_v48 = vadd.f32 %v10759_v38, %v10758_v13  ;;  %9523 = vmatprep.mubr.f32.mxu1 %v15989_v50 }
 0x428   : > { %v10761_v4 = vpop.f32.mrb[60].mxu1 }
 0x429   : > { %v10762_v57 = vpop.f32.mrb[61].mxu1  ;;  %9524 = vmatmul.mubr.f32.gmra.mrb[150].mxu1 %v15993_v6 }
 0x42a   : > { %v16412_v47 = vadd.f32 %v10762_v57, %v10761_v4  ;;  %9528 = vmatprep.mubr.f32.mxu1 %v9327_v33 }
 0x42c   : > { %v10764_v46 = vpop.f32.mrb[62].mxu1 }
 0x42d   : > { %v10765_v10 = vpop.f32.mrb[63].mxu1  ;;  %9529 = vmatmul.mubr.f32.gmra.mrb[152].mxu1 %v9311_v52 }
 0x42e   : > { %v16414_v61 = vadd.f32 %v10765_v10, %v10764_v46  ;;  %9533 = vmatprep.mubr.f32.mxu1 %v9328_v36 }
 0x430   : > { %v10767_v0 = vpop.f32.mrb[64].mxu1 }
 0x431   : > { %v10768_v62 = vpop.f32.mrb[65].mxu1  ;;  %9534 = vmatmul.mubr.f32.gmra.mrb[154].mxu1 %v9312_v59 }
 0x432   : > { %v16416_v50 = vadd.f32 %v10768_v62, %v10767_v0  ;;  %11488 = vmatprep.mubr.f32.mxu1 %v16013_v40 }
 0x434   : > { %v10770_v6 = vpop.f32.mrb[66].mxu1 }
 0x435   : > { %v10771_v28 = vpop.f32.mrb[67].mxu1  ;;  %11489 = vmatmul.mubr.f32.vlgmr.msra.gmra.mrb[76].mxu1 %v16029_v56 }
 0x436   : > { %v16420_v16 = vadd.f32 %v10771_v28, %v10770_v6  ;;  %11491 = vmatprep.mubr.f32.mxu1 %v16031_v37 }
 0x438   : > { %v10773_v20 = vpop.f32.mrb[68].mxu1 }
 0x439   : > { %v10774_v17 = vpop.f32.mrb[69].mxu1  ;;  %11492 = vmatmul.mubr.f32.gmra.mrb[78].mxu1 %v16047_v63 }
 0x43a   : > { %v16424_v53 = vadd.f32 %v10774_v17, %v10773_v20  ;;  %11494 = vmatprep.mubr.f32.mxu1 %v16049_v9 }
 0x43c   : > { %v10776_v32 = vpop.f32.mrb[70].mxu1 }
 0x43d   : > { %v10777_v25 = vpop.f32.mrb[71].mxu1  ;;  %11495 = vmatmul.mubr.f32.gmra.mrb[80].mxu1 %v16065_v44  ;;  %v9343_v44 = vld [vmem:[#allocation3 + $0xda] sm:$0xff] }
 0x43e   : > { %v16428_v40 = vadd.f32 %v10777_v25, %v10776_v32  ;;  %11497 = vmatprep.mubr.f32.mxu1 %v16067_v43  ;;  %v9344_v43 = vld [vmem:[#allocation3 + $0xe2] sm:$0xff] }
 0x440   : > { %v10779_v56 = vpop.f32.mrb[72].mxu1 }
 0x441   : > { %v10780_v51 = vpop.f32.mrb[73].mxu1  ;;  %11498 = vmatmul.mubr.f32.gmra.mrb[82].mxu1 %v16083_v21 }
 0x442   : > { %v16432_v37 = vadd.f32 %v10780_v51, %v10779_v56  ;;  %11500 = vmatprep.mubr.f32.mxu1 %v16085_v60 }
 0x444   : > { %v10782_v63 = vpop.f32.mrb[74].mxu1 }
 0x445   : > { %v10783_v3 = vpop.f32.mrb[75].mxu1  ;;  %11501 = vmatmul.mubr.f32.gmra.mrb[84].mxu1 %v16101_v7 }
 0x446   : > { %v16436_v9 = vadd.f32 %v10783_v3, %v10782_v63  ;;  %11503 = vmatprep.mubr.f32.mxu1 %v16103_v42 }
 0x449   : > { %11504 = vmatmul.mubr.f32.gmra.mrb[86].mxu1 %v16119_v27 }
 0x44a   : > { %11506 = vmatprep.mubr.f32.mxu1 %v16121_v23 }
 0x44d   : > { %11507 = vmatmul.mubr.f32.gmra.mrb[88].mxu1 %v16137_v54 }
 0x44e   : > { %11509 = vmatprep.mubr.f32.mxu1 %v9343_v44 }
 0x451   : > { %11510 = vmatmul.mubr.f32.gmra.mrb[90].mxu1 %v9344_v43 }
 0x468   : > { %v10849_v21 = vpop.f32.mrb[92].mxu1 }
 0x469   : > { %v10850_v60 = vpop.f32.mrb[93].mxu1 }
 0x46a   : > { %v10851_v22 = vadd.f32 %v10850_v60, %v10849_v21 }
 0x46c   : > { %v16443_v29 = vadd.f32 %v10851_v22, %v16393_v45  ;;  %v10852_v7 = vpop.f32.mrb[94].mxu1 }
 0x46d   : > { %v10853_v26 = vpop.f32.mrb[95].mxu1 }
 0x46e   : > { %v10854_v39 = vadd.f32 %v10853_v26, %v10852_v7 }
 0x470   : > { %v16446_v42 = vadd.f32 %v10854_v39, %v16382_v58  ;;  %v10855_v27 = vpop.f32.mrb[96].mxu1 }
 0x471   : > { %v10856_v23 = vpop.f32.mrb[97].mxu1 }
 0x472   : > { %v10857_v8 = vadd.f32 %v10856_v23, %v10855_v27 }
 0x474   : > { %v16449_v54 = vadd.f32 %v10857_v8, %v16386_v5  ;;  %v10858_v2 = vpop.f32.mrb[98].mxu1 }
 0x475   : > { %v10859_v12 = vpop.f32.mrb[99].mxu1 }
 0x476   : > { %v10860_v49 = vadd.f32 %v10859_v12, %v10858_v2 }
 0x478   : > { %v16452_v11 = vadd.f32 %v10860_v49, %v16390_v35  ;;  %v10861_v15 = vpop.f32.mrb[100].mxu1 }
 0x479   : > { %v10862_v1 = vpop.f32.mrb[101].mxu1 }
 0x47a   : > { %v10863_v18 = vadd.f32 %v10862_v1, %v10861_v15 }
 0x47c   : > { %v16455_v45 = vadd.f32 %v10863_v18, %v16396_v14  ;;  %v10864_v58 = vpop.f32.mrb[102].mxu1 }
 0x47d   : > { %v10865_v19 = vpop.f32.mrb[103].mxu1 }
 0x47e   : > { %v10866_v41 = vadd.f32 %v10865_v19, %v10864_v58 }
 0x480   : > { %v16458_v31 = vadd.f32 %v10866_v41, %v16400_v30  ;;  %v10867_v5 = vpop.f32.mrb[104].mxu1 }
 0x481   : > { %v10868_v34 = vpop.f32.mrb[105].mxu1 }
 0x482   : > { %v10869_v24 = vadd.f32 %v10868_v34, %v10867_v5 }
 0x484   : > { %v16461_v13 = vadd.f32 %v10869_v24, %v16404_v55  ;;  %v10870_v35 = vpop.f32.mrb[106].mxu1 }
 0x485   : > { %v10871_v38 = vpop.f32.mrb[107].mxu1 }
 0x486   : > { %v10872_v33 = vadd.f32 %v10871_v38, %v10870_v35 }
 0x488   : > { %v16464_v4 = vadd.f32 %v10872_v33, %v16408_v48  ;;  %v10873_v14 = vpop.f32.mrb[108].mxu1 }
 0x489   : > { %v10874_v57 = vpop.f32.mrb[109].mxu1 }
 0x48a   : > { %v10875_v52 = vadd.f32 %v10874_v57, %v10873_v14 }
 0x48c   : > { %v16467_v36 = vadd.f32 %v10875_v52, %v16412_v47  ;;  %v10876_v30 = vpop.f32.mrb[110].mxu1 }
 0x48d   : > { %v10877_v46 = vpop.f32.mrb[111].mxu1 }
 0x48e   : > { %v10878_v10 = vadd.f32 %v10877_v46, %v10876_v30 }
 0x490   : > { %v16470_v59 = vadd.f32 %v10878_v10, %v16414_v61  ;;  %v10879_v55 = vpop.f32.mrb[112].mxu1 }
 0x491   : > { %v10880_v0 = vpop.f32.mrb[113].mxu1 }
 0x492   : > { %v10881_v62 = vadd.f32 %v10880_v0, %v10879_v55 }
 0x494   : > { %v16473_v6 = vadd.f32 %v10881_v62, %v16416_v50  ;;  %v10882_v48 = vpop.f32.mrb[114].mxu1 }
 0x495   : > { %v10883_v28 = vpop.f32.mrb[115].mxu1 }
 0x496   : > { %v10884_v20 = vadd.f32 %v10883_v28, %v10882_v48 }
 0x498   : > { %v16476_v17 = vadd.f32 %v10884_v20, %v16420_v16  ;;  %v10885_v47 = vpop.f32.mrb[116].mxu1 }
 0x499   : > { %v10886_v32 = vpop.f32.mrb[117].mxu1 }
 0x49a   : > { %v10887_v25 = vadd.f32 %v10886_v32, %v10885_v47 }
 0x49c   : > { %v16479_v56 = vadd.f32 %v10887_v25, %v16424_v53  ;;  %v10888_v61 = vpop.f32.mrb[118].mxu1 }
 0x49d   : > { %v10889_v51 = vpop.f32.mrb[119].mxu1 }
 0x49e   : > { %v10890_v63 = vadd.f32 %v10889_v51, %v10888_v61 }
 0x4a0   : > { %v16482_v3 = vadd.f32 %v10890_v63, %v16428_v40  ;;  %v10891_v50 = vpop.f32.mrb[120].mxu1 }
 0x4a1   : > { %v10892_v44 = vpop.f32.mrb[121].mxu1 }
 0x4a2   : > { %v10893_v43 = vadd.f32 %v10892_v44, %v10891_v50 }
 0x4a4   : > { %v16485_v21 = vadd.f32 %v10893_v43, %v16432_v37  ;;  %v10894_v16 = vpop.f32.mrb[122].mxu1 }
 0x4a5   : > { %v10895_v60 = vpop.f32.mrb[123].mxu1 }
 0x4a6   : > { %v10896_v22 = vadd.f32 %v10895_v60, %v10894_v16 }
 0x4a8   : > { %v16488_v7 = vadd.f32 %v10896_v22, %v16436_v9 }
 0x4c8   : > { %v10961_v53 = vpop.f32.mrb[124].mxu1 }
 0x4c9   : > { %v10962_v26 = vpop.f32.mrb[125].mxu1 }
 0x4ca   : > { %v10963_v39 = vadd.f32 %v10962_v26, %v10961_v53 }
 0x4cc   : > { %v10964_v27 = vpop.f32.mrb[126].mxu1  ;;  %v16491_v23 = vadd.f32 %v16443_v29, %v10963_v39 }
 0x4cd   : > { %v10965_v40 = vpop.f32.mrb[127].mxu1 }
 0x4ce   : > { %v10966_v8 = vadd.f32 %v10965_v40, %v10964_v27 }
 0x4d0   : > { %v10967_v2 = vpop.f32.mrb[128].mxu1  ;;  %v11976_v12 = vadd.f32 %v16446_v42, %v10966_v8 }
 0x4d1   : > { %v10968_v37 = vpop.f32.mrb[129].mxu1 }
 0x4d2   : > { %v10969_v49 = vadd.f32 %v10968_v37, %v10967_v2  ;;  %v16540_v2 = vld [vmem:[%s16640_s6] ss:$0 sm:$0xff] }
 0x4d4   : > { %v10970_v15 = vpop.f32.mrb[130].mxu1  ;;  %v16495_v1 = vadd.f32 %v16449_v54, %v10969_v49 }
 0x4d5   : > { %v10971_v9 = vpop.f32.mrb[131].mxu1 }
 0x4d6   : > { %v10972_v18 = vadd.f32 %v10971_v9, %v10970_v15 }
 0x4d8   : > { %v10973_v58 = vpop.f32.mrb[132].mxu1  ;;  %v11982_v19 = vadd.f32 %v16452_v11, %v10972_v18 }
 0x4d9   : > { %v10974_v41 = vpop.f32.mrb[133].mxu1 }
 0x4da   : > { %v10975_v5 = vadd.f32 %v10974_v41, %v10973_v58 }
 0x4dc   : > { %v10976_v29 = vpop.f32.mrb[134].mxu1  ;;  %v16499_v34 = vadd.f32 %v16455_v45, %v10975_v5 }
 0x4dd   : > { %v10977_v24 = vpop.f32.mrb[135].mxu1 }
 0x4de   : > { %v10978_v35 = vadd.f32 %v10977_v24, %v10976_v29 }
 0x4e0   : > { %v10979_v42 = vpop.f32.mrb[136].mxu1  ;;  %v11988_v38 = vadd.f32 %v16458_v31, %v10978_v35 }
 0x4e1   : > { %v10980_v33 = vpop.f32.mrb[137].mxu1 }
 0x4e2   : > { %v10981_v14 = vadd.f32 %v10980_v33, %v10979_v42 }
 0x4e4   : > { %v10982_v54 = vpop.f32.mrb[138].mxu1  ;;  %v16503_v57 = vadd.f32 %v16461_v13, %v10981_v14 }
 0x4e5   : > { %v10983_v52 = vpop.f32.mrb[139].mxu1 }
 0x4e6   : > { %v10984_v30 = vadd.f32 %v10983_v52, %v10982_v54 }
 0x4e8   : > { %v10985_v11 = vpop.f32.mrb[140].mxu1  ;;  %v16506_v46 = vadd.f32 %v16464_v4, %v10984_v30 }
 0x4e9   : > { %v10986_v10 = vpop.f32.mrb[141].mxu1 }
 0x4ea   : > { %v10987_v45 = vadd.f32 %v10986_v10, %v10985_v11 }
 0x4ec   : > { %v10988_v55 = vpop.f32.mrb[142].mxu1  ;;  %v16509_v0 = vadd.f32 %v16467_v36, %v10987_v45 }
 0x4ed   : > { %v10989_v62 = vpop.f32.mrb[143].mxu1 }
 0x4ee   : > { %v10990_v31 = vadd.f32 %v10989_v62, %v10988_v55 }
 0x4f0   : > { %v10991_v48 = vpop.f32.mrb[144].mxu1  ;;  %v16512_v28 = vadd.f32 %v16470_v59, %v10990_v31 }
 0x4f1   : > { %v10992_v13 = vpop.f32.mrb[145].mxu1 }
 0x4f2   : > { %v10993_v20 = vadd.f32 %v10992_v13, %v10991_v48 }
 0x4f4   : > { %v10994_v47 = vpop.f32.mrb[146].mxu1  ;;  %v16515_v32 = vadd.f32 %v16473_v6, %v10993_v20 }
 0x4f5   : > { %v10995_v4 = vpop.f32.mrb[147].mxu1 }
 0x4f6   : > { %v10996_v25 = vadd.f32 %v10995_v4, %v10994_v47 }
 0x4f8   : > { %v10997_v61 = vpop.f32.mrb[148].mxu1  ;;  %v16518_v51 = vadd.f32 %v16476_v17, %v10996_v25 }
 0x4f9   : > { %v10998_v36 = vpop.f32.mrb[149].mxu1 }
 0x4fa   : > { %v10999_v63 = vadd.f32 %v10998_v36, %v10997_v61 }
 0x4fc   : > { %v11000_v50 = vpop.f32.mrb[150].mxu1  ;;  %v16521_v44 = vadd.f32 %v16479_v56, %v10999_v63  ;;  %v16532_v56 = vld [vmem:[%s16639_s5] ss:$0 sm:$0xff] }
 0x4fd   : > { %v11001_v59 = vpop.f32.mrb[151].mxu1 }
 0x4fe   : > { %v11002_v43 = vadd.f32 %v11001_v59, %v11000_v50 }
 0x500   : > { %v11003_v16 = vpop.f32.mrb[152].mxu1  ;;  %v16524_v60 = vadd.f32 %v16482_v3, %v11002_v43 }
 0x501   : > { %v11004_v6 = vpop.f32.mrb[153].mxu1 }
 0x502   : > { %v11005_v22 = vadd.f32 %v11004_v6, %v11003_v16 }
 0x504   : > { %v11006_v53 = vpop.f32.mrb[154].mxu1  ;;  %v16527_v26 = vadd.f32 %v16485_v21, %v11005_v22 }
 0x505   : > { %v11007_v17 = vpop.f32.mrb[155].mxu1 }
 0x506   : > { %v11008_v39 = vadd.f32 %v11007_v17, %v11006_v53 }
 0x508   : > { %v11490_v27 = vpop.f32.mrb[76].mxu1  ;;  %v16535_v40 = vadd.f32 %v16488_v7, %v11008_v39 }
 0x509   : > { %v11977_v8 = vadd.f32 %v11976_v12, %v11490_v27  ;;  %v9605_v3 = vpop.f32.mrb[77].mxu1 }
 0x50a   : > { %v11980_v21 = vadd.f32 %v16491_v23, %v9605_v3 }
 0x50b   : > { %v9708_v37 = vmul.f32 %v11977_v8, %v16532_v56 }
 0x50c   : > { %v9707_v49 = vmul.f32 %v11980_v21, %v16532_v56  ;;  %v11493_v15 = vpop.f32.mrb[78].mxu1 }
 0x50d   : > { %v9731_v9 = vadd.f32 %v16540_v2, %v9708_v37  ;;  %v11983_v7 = vadd.f32 %v11982_v19, %v11493_v15  ;;  %v9615_v18 = vpop.f32.mrb[79].mxu1 }
 0x50e   : > { %v9730_v12 = vadd.f32 %v16540_v2, %v9707_v49  ;;  %v11986_v58 = vadd.f32 %v16495_v1, %v9615_v18 }
 0x50f   : > { %v9747_v41 = vmax.f32 %v9731_v9, 0.0  ;;  %v9710_v5 = vmul.f32 %v11983_v7, %v16532_v56 }
 0x510   : > { %v9746_v23 = vmax.f32 %v9730_v12, 0.0  ;;  %v9709_v29 = vmul.f32 %v11986_v58, %v16532_v56  ;;  %v11496_v24 = vpop.f32.mrb[80].mxu1 }
 0x511   : > { %9764 = vst.msk [vmem:[%s12471_s18 + $0x8] sm:$0xff] %vm9762_vm1, %v9747_v41  ;;  %v9733_v35 = vadd.f32 %v16540_v2, %v9710_v5  ;;  %v11989_v19 = vadd.f32 %v11988_v38, %v11496_v24  ;;  %v9625_v42 = vpop.f32.mrb[81].mxu1 }
 0x512   : > { %9763 = vst.msk [vmem:[%s12471_s18] sm:$0xff] %vm9762_vm1, %v9746_v23  ;;  %v9732_v33 = vadd.f32 %v16540_v2, %v9709_v29  ;;  %v11992_v1 = vadd.f32 %v16499_v34, %v9625_v42 }
 0x513   : > { %v9749_v14 = vmax.f32 %v9733_v35, 0.0  ;;  %v9712_v54 = vmul.f32 %v11989_v19, %v16532_v56 }
 0x514   : > { %v9748_v52 = vmax.f32 %v9732_v33, 0.0  ;;  %v9711_v30 = vmul.f32 %v11992_v1, %v16532_v56  ;;  %v11499_v11 = vpop.f32.mrb[82].mxu1 }
 0x515   : > { %9766 = vst.msk [vmem:[%s12471_s18 + $0x18] sm:$0xff] %vm9762_vm1, %v9749_v14  ;;  %v9735_v38 = vadd.f32 %v16540_v2, %v9712_v54  ;;  %v11995_v10 = vadd.f32 %v16506_v46, %v11499_v11  ;;  %v9635_v45 = vpop.f32.mrb[83].mxu1 }
 0x516   : > { %9765 = vst.msk [vmem:[%s12471_s18 + $0x10] sm:$0xff] %vm9762_vm1, %v9748_v52  ;;  %v9734_v34 = vadd.f32 %v16540_v2, %v9711_v30  ;;  %v11998_v55 = vadd.f32 %v16503_v57, %v9635_v45 }
 0x517   : > { %v9751_v62 = vmax.f32 %v9735_v38, 0.0  ;;  %v9714_v31 = vmul.f32 %v11995_v10, %v16532_v56 }
 0x518   : > { %v9750_v48 = vmax.f32 %v9734_v34, 0.0  ;;  %v9713_v13 = vmul.f32 %v11998_v55, %v16532_v56  ;;  %v11502_v20 = vpop.f32.mrb[84].mxu1 }
 0x519   : > { %9768 = vst.msk [vmem:[%s12471_s18 + $0x28] sm:$0xff] %vm9762_vm1, %v9751_v62  ;;  %v9737_v46 = vadd.f32 %v16540_v2, %v9714_v31  ;;  %v12001_v47 = vadd.f32 %v16512_v28, %v11502_v20  ;;  %v9645_v4 = vpop.f32.mrb[85].mxu1 }
 0x51a   : > { %9767 = vst.msk [vmem:[%s12471_s18 + $0x20] sm:$0xff] %vm9762_vm1, %v9750_v48  ;;  %v9736_v57 = vadd.f32 %v16540_v2, %v9713_v13  ;;  %v12004_v25 = vadd.f32 %v16509_v0, %v9645_v4 }
 0x51b   : > { %v9753_v61 = vmax.f32 %v9737_v46, 0.0  ;;  %v9716_v36 = vmul.f32 %v12001_v47, %v16532_v56 }
 0x51c   : > { %v9752_v63 = vmax.f32 %v9736_v57, 0.0  ;;  %v9715_v50 = vmul.f32 %v12004_v25, %v16532_v56  ;;  %v11505_v59 = vpop.f32.mrb[86].mxu1 }
 0x51d   : > { %9770 = vst.msk [vmem:[%s12471_s18 + $0x38] sm:$0xff] %vm9762_vm1, %v9753_v61  ;;  %v9739_v28 = vadd.f32 %v16540_v2, %v9716_v36  ;;  %v12007_v43 = vadd.f32 %v16518_v51, %v11505_v59  ;;  %v9655_v16 = vpop.f32.mrb[87].mxu1 }
 0x51e   : > { %9769 = vst.msk [vmem:[%s12471_s18 + $0x30] sm:$0xff] %vm9762_vm1, %v9752_v63  ;;  %v9738_v0 = vadd.f32 %v16540_v2, %v9715_v50  ;;  %v12010_v6 = vadd.f32 %v16515_v32, %v9655_v16 }
 0x51f   : > { %v9755_v22 = vmax.f32 %v9739_v28, 0.0  ;;  %v9718_v53 = vmul.f32 %v12007_v43, %v16532_v56 }
 0x520   : > { %v9754_v17 = vmax.f32 %v9738_v0, 0.0  ;;  %v9717_v39 = vmul.f32 %v12010_v6, %v16532_v56  ;;  %v11508_v27 = vpop.f32.mrb[88].mxu1 }
 0x521   : > { %9772 = vst.msk [vmem:[%s12471_s18 + $0x48] sm:$0xff] %vm9762_vm1, %v9755_v22  ;;  %v9741_v51 = vadd.f32 %v16540_v2, %v9718_v53  ;;  %v12013_v8 = vadd.f32 %v16524_v60, %v11508_v27  ;;  %v9665_v3 = vpop.f32.mrb[89].mxu1 }
 0x522   : > { %9771 = vst.msk [vmem:[%s12471_s18 + $0x40] sm:$0xff] %vm9762_vm1, %v9754_v17  ;;  %v9740_v32 = vadd.f32 %v16540_v2, %v9717_v39  ;;  %v12016_v21 = vadd.f32 %v16521_v44, %v9665_v3 }
 0x523   : > { %v9757_v37 = vmax.f32 %v9741_v51, 0.0  ;;  %v9720_v49 = vmul.f32 %v12013_v8, %v16532_v56 }
 0x524   : > { %v9756_v15 = vmax.f32 %v9740_v32, 0.0  ;;  %v9719_v9 = vmul.f32 %v12016_v21, %v16532_v56  ;;  %v11511_v7 = vpop.f32.mrb[90].mxu1 }
 0x525   : > { %9774 = vst.msk [vmem:[%s12471_s18 + $0x58] sm:$0xff] %vm9762_vm1, %v9757_v37  ;;  %v9743_v60 = vadd.f32 %v16540_v2, %v9720_v49  ;;  %v12019_v18 = vadd.f32 %v16535_v40, %v11511_v7  ;;  %v9675_v12 = vpop.f32.mrb[91].mxu1 }
 0x526   : > { %9773 = vst.msk [vmem:[%s12471_s18 + $0x50] sm:$0xff] %vm9762_vm1, %v9756_v15  ;;  %v9742_v44 = vadd.f32 %v16540_v2, %v9719_v9  ;;  %v12022_v58 = vadd.f32 %v16527_v26, %v9675_v12 }
 0x527   : > { %v9759_v41 = vmax.f32 %v9743_v60, 0.0  ;;  %v9722_v5 = vmul.f32 %v12019_v18, %v16532_v56 }
 0x528   : > { %v9758_v23 = vmax.f32 %v9742_v44, 0.0  ;;  %v9721_v29 = vmul.f32 %v12022_v58, %v16532_v56 }
 0x529   : > { %9776 = vst.msk [vmem:[%s12471_s18 + $0x68] sm:$0xff] %vm9762_vm1, %v9759_v41  ;;  %v9745_v24 = vadd.f32 %v16540_v2, %v9722_v5 }
 0x52a   : > { %9775 = vst.msk [vmem:[%s12471_s18 + $0x60] sm:$0xff] %vm9762_vm1, %v9758_v23  ;;  %v9744_v40 = vadd.f32 %v16540_v2, %v9721_v29 }
 0x52b   : > { %v9761_v35 = vmax.f32 %v9745_v24, 0.0 }
 0x52c   : > { %v9760_v19 = vmax.f32 %v9744_v40, 0.0 }
 0x52d   : > { %9778 = vst.msk [vmem:[%s12471_s18 + $0x78] sm:$0xff] %vm9762_vm1, %v9761_v35 }
 0x52e   : > { %9777 = vst.msk [vmem:[%s12471_s18 + $0x70] sm:$0xff] %vm9762_vm1, %v9760_v19 }
 0x52f PF: > { %s17_s28 = sadd.s32 1, %s12380_s28   ;;  %s16905_s24 = smov %s12372_s26 }
 0x530   : > { %p14_p12 = scmp.ge.s32.totalorder %s17_s28, 6   ;;  %s16906_s25 = smov %s12376_s27 }
 0x531   : > { %s16907_s26 = smov %s16910_s29  ;;  %s16908_s27 = smov %s16914_s30 }
 0x532   :  { %16 = sbr.rel (!%p14_p12) target bundleno = 3 (0x3), region = 207 }
 0x539   :  { %9809 = vsyncmov [#allocation4] }
 0x53c   :  { %s9810_s18 = vpop.sfrf %9809 }
 0x53d   :  { %p10586_p13 = scmp.ne.s32.totalorder %s9810_s18, 0 }
 0x53f   :  { %9814 = shalt.err (%p10586_p13)  }
 0x540   :  { %9816 = vsyncmov [#allocation4 + $0x1] }
 0x543   :  { %s9817_s23 = vpop.sfrf %9816 }
 0x544   :  { %p10587_p0 = scmp.ne.s32.totalorder %s9817_s23, 0 }
 0x546   :  { %9821 = shalt.err (%p10587_p0)  }

</bundles_post_ra>
